<compile_context>
chip_gen: v7x
topology: tpu7x:2x2x1
jax: 0.10.0
libtpu: 0.0.40
codegen_flags: <defaults>
</compile_context>

<pallas_src>
import math
import numpy as np
import jax
import jax.numpy as jnp
from jax.experimental import pallas as pl
from jax.experimental.pallas import tpu as pltpu

# ------------------------ small config (SiglipVisionConfig) ------------------------
HIDDEN = 64
INTERMEDIATE = 128
NUM_LAYERS = 2
NUM_HEADS = 4
HEAD_DIM = HIDDEN // NUM_HEADS
NUM_CHANNELS = 3
IMAGE_SIZE = 32
PATCH_SIZE = 8
NUM_PATCHES = (IMAGE_SIZE // PATCH_SIZE) ** 2     # 16 image tokens
LN_EPS = 1e-6
BATCH = 2
CPP = NUM_CHANNELS * PATCH_SIZE * PATCH_SIZE      # flattened patch dim (c, kh, kw)
BS = BATCH * NUM_PATCHES                          # batch folded into rows -> 32
SCALE = HEAD_DIM ** -0.5
_GELU_C = math.sqrt(2.0 / math.pi)


# ------------------------------- in-kernel helpers --------------------------------
def _layernorm(x, g, b):
    mu = jnp.mean(x, axis=-1, keepdims=True)
    var = jnp.mean((x - mu) ** 2, axis=-1, keepdims=True)
    return (x - mu) * jax.lax.rsqrt(var + LN_EPS) * g + b


def _gelu_tanh(x):
    return 0.5 * x * (1.0 + jnp.tanh(_GELU_C * (x + 0.044715 * x * x * x)))


def _softmax(s):
    s = s - jnp.max(s, axis=-1, keepdims=True)
    p = jnp.exp(s)
    denom = jnp.sum(p, axis=-1, keepdims=True)
    return p * pl.reciprocal(denom, approx=True)


# ---------------------------------- fused kernel -----------------------------------
def fused_vit_kernel(patches_ref, we_ref, posb_ref,
                     ln1g_ref, ln1b_ref, qkvw_ref, qkvb_ref, ow_ref, ob_ref,
                     ln2g_ref, ln2b_ref, f1w_ref, f1b_ref, f2w_ref, f2b_ref,
                     postg_ref, postb_ref, out_ref):
    # ---- patch embedding (conv-as-matmul) + positional embedding + bias ----
    x = jnp.dot(patches_ref[...], we_ref[...],
                preferred_element_type=jnp.float32) + posb_ref[...]      # (BS, D)

    # ---- encoder layers (Python-unrolled; weights stacked along layer axis) ----
    for l in range(NUM_LAYERS):
        # layer_norm1 + fused QKV projection
        h1 = _layernorm(x, ln1g_ref[l], ln1b_ref[l])
        qkv = jnp.dot(h1, qkvw_ref[l],
                      preferred_element_type=jnp.float32) + qkvb_ref[l]  # (BS, 3D)
        q = qkv[:, 0 * HIDDEN:1 * HIDDEN]
        k = qkv[:, 1 * HIDDEN:2 * HIDDEN]
        v = qkv[:, 2 * HIDDEN:3 * HIDDEN]

        # per-image, per-head attention on (S, hd) = (16, 16) tiles
        per_image = []
        for b in range(BATCH):
            lo = b * NUM_PATCHES
            hi = lo + NUM_PATCHES
            qb, kb, vb = q[lo:hi], k[lo:hi], v[lo:hi]
            heads = []
            for h in range(NUM_HEADS):
                c0 = h * HEAD_DIM
                c1 = c0 + HEAD_DIM
                s = jnp.dot(qb[:, c0:c1], kb[:, c0:c1].T,
                            preferred_element_type=jnp.float32) * SCALE  # (S, S)
                p = _softmax(s)
                heads.append(jnp.dot(p, vb[:, c0:c1],
                                     preferred_element_type=jnp.float32))
            per_image.append(jnp.concatenate(heads, axis=-1))            # (S, D)
        ctx = jnp.concatenate(per_image, axis=0)                         # (BS, D)

        attn = jnp.dot(ctx, ow_ref[l],
                       preferred_element_type=jnp.float32) + ob_ref[l]
        x = x + attn

        # layer_norm2 + MLP (tanh GELU)
        h2 = _layernorm(x, ln2g_ref[l], ln2b_ref[l])
        m = jnp.dot(h2, f1w_ref[l],
                    preferred_element_type=jnp.float32) + f1b_ref[l]
        m = _gelu_tanh(m)
        m = jnp.dot(m, f2w_ref[l],
                    preferred_element_type=jnp.float32) + f2b_ref[l]
        x = x + m

    # ---- post layernorm ----
    out_ref[...] = _layernorm(x, postg_ref[...], postb_ref[...])


# ------------------------------- pallas_call wrapper --------------------------------
def _full(shape):
    rank = len(shape)
    return pl.BlockSpec(shape, lambda i, _r=rank: (0,) * _r)


def extract_patches(pixel_values):
    # NCHW -> (B, num_patches, C*P*P); patch order row-major over (ph, pw),
    # inner order (c, kh, kw) to match Conv2d weight flattening.
    B, C, H, W = pixel_values.shape
    nh, nw = H // PATCH_SIZE, W // PATCH_SIZE
    x = pixel_values.reshape(B, C, nh, PATCH_SIZE, nw, PATCH_SIZE)
    x = x.transpose(0, 2, 4, 1, 3, 5)
    return x.reshape(B, nh * nw, C * PATCH_SIZE * PATCH_SIZE)


def prepare_params(params):
    """One-time weight repacking into kernel-ready layouts."""
    layers = params["layers"]

    def stack(fn):
        return jnp.stack([fn(lp) for lp in layers], axis=0)

    we = params["patch_w"].reshape(HIDDEN, CPP).T                             # (CPP, D)
    # fold conv bias into the (batch-tiled) positional table
    posb = jnp.tile(params["pos_emb"] + params["patch_b"][None, :], (BATCH, 1))  # (BS, D)

    ln1g = stack(lambda lp: lp["ln1_g"].reshape(1, HIDDEN))
    ln1b = stack(lambda lp: lp["ln1_b"].reshape(1, HIDDEN))
    qkvw = stack(lambda lp: jnp.concatenate(
        [lp["q_w"].T, lp["k_w"].T, lp["v_w"].T], axis=1))                     # (L, D, 3D)
    qkvb = stack(lambda lp: jnp.concatenate(
        [lp["q_b"], lp["k_b"], lp["v_b"]]).reshape(1, 3 * HIDDEN))            # (L, 1, 3D)
    ow = stack(lambda lp: lp["o_w"].T)                                        # (L, D, D)
    ob = stack(lambda lp: lp["o_b"].reshape(1, HIDDEN))
    ln2g = stack(lambda lp: lp["ln2_g"].reshape(1, HIDDEN))
    ln2b = stack(lambda lp: lp["ln2_b"].reshape(1, HIDDEN))
    f1w = stack(lambda lp: lp["f1_w"].T)                                      # (L, D, I)
    f1b = stack(lambda lp: lp["f1_b"].reshape(1, INTERMEDIATE))
    f2w = stack(lambda lp: lp["f2_w"].T)                                      # (L, I, D)
    f2b = stack(lambda lp: lp["f2_b"].reshape(1, HIDDEN))
    postg = params["post_g"].reshape(1, HIDDEN)
    postb = params["post_b"].reshape(1, HIDDEN)

    return (we, posb, ln1g, ln1b, qkvw, qkvb, ow, ob,
            ln2g, ln2b, f1w, f1b, f2w, f2b, postg, postb)


def siglip_vision_forward(pixel_values, prepped):
    patches = extract_patches(pixel_values).reshape(BS, CPP)
    args = (patches,) + tuple(prepped)
    out = pl.pallas_call(
        fused_vit_kernel,
        out_shape=jax.ShapeDtypeStruct((BS, HIDDEN), jnp.float32),
        grid=(1,),
        in_specs=[_full(a.shape) for a in args],
        out_specs=_full((BS, HIDDEN)),
        compiler_params=pltpu.CompilerParams(
            dimension_semantics=("arbitrary",)),
    )(*args)
    return out.reshape(BATCH, NUM_PATCHES, HIDDEN)


# --------------------------- pure-JAX reference (for check) -------------------------
def _ref_ln(x, g, b):
    mu = jnp.mean(x, axis=-1, keepdims=True)
    var = jnp.mean((x - mu) ** 2, axis=-1, keepdims=True)
    return (x - mu) / jnp.sqrt(var + LN_EPS) * g + b


def reference_forward(pixel_values, params):
    patches = extract_patches(pixel_values)
    w = params["patch_w"].reshape(HIDDEN, CPP)
    x = patches @ w.T + params["patch_b"] + params["pos_emb"][None]
    B, S, D = x.shape
    for lp in params["layers"]:
        res = x
        h = _ref_ln(x, lp["ln1_g"], lp["ln1_b"])
        q = h @ lp["q_w"].T + lp["q_b"]
        k = h @ lp["k_w"].T + lp["k_b"]
        v = h @ lp["v_w"].T + lp["v_b"]
        q = q.reshape(B, S, NUM_HEADS, HEAD_DIM).transpose(0, 2, 1, 3)
        k = k.reshape(B, S, NUM_HEADS, HEAD_DIM).transpose(0, 2, 1, 3)
        v = v.reshape(B, S, NUM_HEADS, HEAD_DIM).transpose(0, 2, 1, 3)
        s = jnp.einsum("bhqd,bhkd->bhqk", q, k) * SCALE
        p = jax.nn.softmax(s.astype(jnp.float32), axis=-1)
        o = jnp.einsum("bhqk,bhkd->bhqd", p, v)
        o = o.transpose(0, 2, 1, 3).reshape(B, S, D)
        o = o @ lp["o_w"].T + lp["o_b"]
        x = res + o
        res = x
        h = _ref_ln(x, lp["ln2_g"], lp["ln2_b"])
        m = h @ lp["f1_w"].T + lp["f1_b"]
        m = 0.5 * m * (1.0 + jnp.tanh(_GELU_C * (m + 0.044715 * m ** 3)))
        m = m @ lp["f2_w"].T + lp["f2_b"]
        x = res + m
    return _ref_ln(x, params["post_g"], params["post_b"])


# ------------------------------------ main ------------------------------------------
def init_params(key):
    def nrm(k, shape, scale=0.02):
        return scale * jax.random.normal(k, shape, dtype=jnp.float32)

    keys = jax.random.split(key, 4 + NUM_LAYERS)
    params = {
        "patch_w": nrm(keys[0], (HIDDEN, NUM_CHANNELS, PATCH_SIZE, PATCH_SIZE)),
        "patch_b": nrm(keys[1], (HIDDEN,)),
        "pos_emb": nrm(keys[2], (NUM_PATCHES, HIDDEN)),
        "post_g": 1.0 + nrm(keys[3], (HIDDEN,), 0.1),
        "post_b": nrm(keys[3], (HIDDEN,)),
        "layers": [],
    }
    for li in range(NUM_LAYERS):
        lk = jax.random.split(keys[4 + li], 16)
        params["layers"].append({
            "ln1_g": 1.0 + nrm(lk[0], (HIDDEN,), 0.1), "ln1_b": nrm(lk[1], (HIDDEN,)),
            "q_w": nrm(lk[2], (HIDDEN, HIDDEN)), "q_b": nrm(lk[3], (HIDDEN,)),
            "k_w": nrm(lk[4], (HIDDEN, HIDDEN)), "k_b": nrm(lk[5], (HIDDEN,)),
            "v_w": nrm(lk[6], (HIDDEN, HIDDEN)), "v_b": nrm(lk[7], (HIDDEN,)),
            "o_w": nrm(lk[8], (HIDDEN, HIDDEN)), "o_b": nrm(lk[9], (HIDDEN,)),
            "ln2_g": 1.0 + nrm(lk[10], (HIDDEN,), 0.1), "ln2_b": nrm(lk[11], (HIDDEN,)),
            "f1_w": nrm(lk[12], (INTERMEDIATE, HIDDEN)), "f1_b": nrm(lk[13], (INTERMEDIATE,)),
            "f2_w": nrm(lk[14], (HIDDEN, INTERMEDIATE)), "f2_b": nrm(lk[15], (HIDDEN,)),
        })
    return params


if __name__ == "__main__":
    key = jax.random.PRNGKey(0)
    pkey, xkey = jax.random.split(key)
    params = init_params(pkey)
    pixel_values = jax.random.normal(
        xkey, (BATCH, NUM_CHANNELS, IMAGE_SIZE, IMAGE_SIZE), dtype=jnp.float32)

    prepped = prepare_params(params)              # one-time weight repacking
    fwd = jax.jit(siglip_vision_forward)

    out = jax.block_until_ready(fwd(pixel_values, prepped))

    ref = jax.block_until_ready(reference_forward(pixel_values, params))
    np.testing.assert_allclose(np.asarray(out), np.asarray(ref),
                               rtol=2e-2, atol=2e-2)
    assert out.shape == (BATCH, NUM_PATCHES, HIDDEN)
    assert not np.any(np.isnan(np.asarray(out)))
    print("KERNEL_OK")
</pallas_src>

<mosaic_0001>
module attributes {stable_mosaic.version = 11 : i64} {
  func.func @fused_vit_kernel(%arg0: i32, %arg1: memref<32x192xf32, #tpu.memory_space<vmem>>, %arg2: memref<192x64xf32, #tpu.memory_space<vmem>>, %arg3: memref<32x64xf32, #tpu.memory_space<vmem>>, %arg4: memref<2x1x64xf32, #tpu.memory_space<vmem>>, %arg5: memref<2x1x64xf32, #tpu.memory_space<vmem>>, %arg6: memref<2x64x192xf32, #tpu.memory_space<vmem>>, %arg7: memref<2x1x192xf32, #tpu.memory_space<vmem>>, %arg8: memref<2x64x64xf32, #tpu.memory_space<vmem>>, %arg9: memref<2x1x64xf32, #tpu.memory_space<vmem>>, %arg10: memref<2x1x64xf32, #tpu.memory_space<vmem>>, %arg11: memref<2x1x64xf32, #tpu.memory_space<vmem>>, %arg12: memref<2x64x128xf32, #tpu.memory_space<vmem>>, %arg13: memref<2x1x128xf32, #tpu.memory_space<vmem>>, %arg14: memref<2x128x64xf32, #tpu.memory_space<vmem>>, %arg15: memref<2x1x64xf32, #tpu.memory_space<vmem>>, %arg16: memref<1x64xf32, #tpu.memory_space<vmem>>, %arg17: memref<1x64xf32, #tpu.memory_space<vmem>>, %arg18: memref<32x64xf32, #tpu.memory_space<vmem>>) attributes {dimension_semantics = [#tpu.dimension_semantics<arbitrary>], iteration_bounds = array<i64: 1>, scalar_prefetch = 0 : i64, scratch_operands = 0 : i64, tpu.core_type = #tpu.core_type<tc>, window_params = [{pipeline_mode = #tpu.pipeline_mode<synchronous>, transform_indices = @transform_0, window_bounds = array<i64: 32, 192>}, {pipeline_mode = #tpu.pipeline_mode<synchronous>, transform_indices = @transform_1, window_bounds = array<i64: 192, 64>}, {pipeline_mode = #tpu.pipeline_mode<synchronous>, transform_indices = @transform_2, window_bounds = array<i64: 32, 64>}, {pipeline_mode = #tpu.pipeline_mode<synchronous>, transform_indices = @transform_3, window_bounds = array<i64: 2, 1, 64>}, {pipeline_mode = #tpu.pipeline_mode<synchronous>, transform_indices = @transform_4, window_bounds = array<i64: 2, 1, 64>}, {pipeline_mode = #tpu.pipeline_mode<synchronous>, transform_indices = @transform_5, window_bounds = array<i64: 2, 64, 192>}, {pipeline_mode = #tpu.pipeline_mode<synchronous>, transform_indices = @transform_6, window_bounds = array<i64: 2, 1, 192>}, {pipeline_mode = #tpu.pipeline_mode<synchronous>, transform_indices = @transform_7, window_bounds = array<i64: 2, 64, 64>}, {pipeline_mode = #tpu.pipeline_mode<synchronous>, transform_indices = @transform_8, window_bounds = array<i64: 2, 1, 64>}, {pipeline_mode = #tpu.pipeline_mode<synchronous>, transform_indices = @transform_9, window_bounds = array<i64: 2, 1, 64>}, {pipeline_mode = #tpu.pipeline_mode<synchronous>, transform_indices = @transform_10, window_bounds = array<i64: 2, 1, 64>}, {pipeline_mode = #tpu.pipeline_mode<synchronous>, transform_indices = @transform_11, window_bounds = array<i64: 2, 64, 128>}, {pipeline_mode = #tpu.pipeline_mode<synchronous>, transform_indices = @transform_12, window_bounds = array<i64: 2, 1, 128>}, {pipeline_mode = #tpu.pipeline_mode<synchronous>, transform_indices = @transform_13, window_bounds = array<i64: 2, 128, 64>}, {pipeline_mode = #tpu.pipeline_mode<synchronous>, transform_indices = @transform_14, window_bounds = array<i64: 2, 1, 64>}, {pipeline_mode = #tpu.pipeline_mode<synchronous>, transform_indices = @transform_15, window_bounds = array<i64: 1, 64>}, {pipeline_mode = #tpu.pipeline_mode<synchronous>, transform_indices = @transform_16, window_bounds = array<i64: 1, 64>}, {pipeline_mode = #tpu.pipeline_mode<synchronous>, transform_indices = @transform_17, window_bounds = array<i64: 32, 64>}]} {
    %c0 = arith.constant 0 : index
    %c0_0 = arith.constant 0 : index
    %0 = vector.load %arg1[%c0, %c0_0] : memref<32x192xf32, #tpu.memory_space<vmem>>, vector<32x192xf32>
    %c0_1 = arith.constant 0 : index
    %c0_2 = arith.constant 0 : index
    %1 = vector.load %arg2[%c0_1, %c0_2] : memref<192x64xf32, #tpu.memory_space<vmem>>, vector<192x64xf32>
    %cst = arith.constant dense<0.000000e+00> : vector<32x64xf32>
    %2 = tpu.matmul %0, %1, %cst {dimension_numbers = #tpu.dot_dimension_numbers<[1], [0], [0], [1], [0, 0, 1, 1], [], []>} : vector<32x192xf32>, vector<192x64xf32>, vector<32x64xf32> -> vector<32x64xf32>
    %c0_3 = arith.constant 0 : index
    %c0_4 = arith.constant 0 : index
    %3 = vector.load %arg3[%c0_3, %c0_4] : memref<32x64xf32, #tpu.memory_space<vmem>>, vector<32x64xf32>
    %4 = arith.addf %2, %3 : vector<32x64xf32>
    %c0_5 = arith.constant 0 : index
    %c0_6 = arith.constant 0 : index
    %c0_7 = arith.constant 0 : index
    %5 = vector.load %arg4[%c0_5, %c0_6, %c0_7] : memref<2x1x64xf32, #tpu.memory_space<vmem>>, vector<1x1x64xf32>
    %6 = vector.shape_cast %5 : vector<1x1x64xf32> to vector<1x64xf32>
    %c0_8 = arith.constant 0 : index
    %c0_9 = arith.constant 0 : index
    %c0_10 = arith.constant 0 : index
    %7 = vector.load %arg5[%c0_8, %c0_9, %c0_10] : memref<2x1x64xf32, #tpu.memory_space<vmem>>, vector<1x1x64xf32>
    %8 = vector.shape_cast %7 : vector<1x1x64xf32> to vector<1x64xf32>
    %cst_11 = arith.constant dense<0.000000e+00> : vector<32xf32>
    %9 = vector.multi_reduction <add>, %4, %cst_11 [1] : vector<32x64xf32> to vector<32xf32>
    %10 = vector.shape_cast %9 : vector<32xf32> to vector<32x1xf32>
    %cst_12 = arith.constant 6.400000e+01 : f32
    %11 = vector.broadcast %cst_12 : f32 to vector<32x1xf32>
    %12 = arith.divf %10, %11 : vector<32x1xf32>
    %13 = vector.broadcast %12 : vector<32x1xf32> to vector<32x64xf32>
    %14 = arith.subf %4, %13 : vector<32x64xf32>
    %15 = arith.mulf %14, %14 : vector<32x64xf32>
    %cst_13 = arith.constant dense<0.000000e+00> : vector<32xf32>
    %16 = vector.multi_reduction <add>, %15, %cst_13 [1] : vector<32x64xf32> to vector<32xf32>
    %17 = vector.shape_cast %16 : vector<32xf32> to vector<32x1xf32>
    %cst_14 = arith.constant 6.400000e+01 : f32
    %18 = vector.broadcast %cst_14 : f32 to vector<32x1xf32>
    %19 = arith.divf %17, %18 : vector<32x1xf32>
    %20 = vector.broadcast %12 : vector<32x1xf32> to vector<32x64xf32>
    %21 = arith.subf %4, %20 : vector<32x64xf32>
    %cst_15 = arith.constant 9.99999997E-7 : f32
    %22 = vector.broadcast %cst_15 : f32 to vector<32x1xf32>
    %23 = arith.addf %19, %22 : vector<32x1xf32>
    %24 = math.rsqrt %23 : vector<32x1xf32>
    %25 = vector.broadcast %24 : vector<32x1xf32> to vector<32x64xf32>
    %26 = arith.mulf %21, %25 : vector<32x64xf32>
    %27 = vector.broadcast %6 : vector<1x64xf32> to vector<32x64xf32>
    %28 = arith.mulf %26, %27 : vector<32x64xf32>
    %29 = vector.broadcast %8 : vector<1x64xf32> to vector<32x64xf32>
    %30 = arith.addf %28, %29 : vector<32x64xf32>
    %c0_16 = arith.constant 0 : index
    %c0_17 = arith.constant 0 : index
    %c0_18 = arith.constant 0 : index
    %31 = vector.load %arg6[%c0_16, %c0_17, %c0_18] : memref<2x64x192xf32, #tpu.memory_space<vmem>>, vector<1x64x192xf32>
    %32 = vector.shape_cast %31 : vector<1x64x192xf32> to vector<64x192xf32>
    %cst_19 = arith.constant dense<0.000000e+00> : vector<32x192xf32>
    %33 = tpu.matmul %30, %32, %cst_19 {dimension_numbers = #tpu.dot_dimension_numbers<[1], [0], [0], [1], [0, 0, 1, 1], [], []>} : vector<32x64xf32>, vector<64x192xf32>, vector<32x192xf32> -> vector<32x192xf32>
    %c0_20 = arith.constant 0 : index
    %c0_21 = arith.constant 0 : index
    %c0_22 = arith.constant 0 : index
    %34 = vector.load %arg7[%c0_20, %c0_21, %c0_22] : memref<2x1x192xf32, #tpu.memory_space<vmem>>, vector<1x1x192xf32>
    %35 = vector.shape_cast %34 : vector<1x1x192xf32> to vector<1x192xf32>
    %36 = vector.broadcast %35 : vector<1x192xf32> to vector<32x192xf32>
    %37 = arith.addf %33, %36 : vector<32x192xf32>
    %38 = vector.extract_strided_slice %37 {offsets = [0, 0], sizes = [32, 64], strides = [1, 1]} : vector<32x192xf32> to vector<32x64xf32>
    %39 = vector.extract_strided_slice %37 {offsets = [0, 64], sizes = [32, 64], strides = [1, 1]} : vector<32x192xf32> to vector<32x64xf32>
    %40 = vector.extract_strided_slice %37 {offsets = [0, 128], sizes = [32, 64], strides = [1, 1]} : vector<32x192xf32> to vector<32x64xf32>
    %41 = vector.extract_strided_slice %38 {offsets = [0, 0], sizes = [16, 64], strides = [1, 1]} : vector<32x64xf32> to vector<16x64xf32>
    %42 = vector.extract_strided_slice %39 {offsets = [0, 0], sizes = [16, 64], strides = [1, 1]} : vector<32x64xf32> to vector<16x64xf32>
    %43 = vector.extract_strided_slice %40 {offsets = [0, 0], sizes = [16, 64], strides = [1, 1]} : vector<32x64xf32> to vector<16x64xf32>
    %44 = vector.extract_strided_slice %41 {offsets = [0, 0], sizes = [16, 16], strides = [1, 1]} : vector<16x64xf32> to vector<16x16xf32>
    %45 = vector.extract_strided_slice %42 {offsets = [0, 0], sizes = [16, 16], strides = [1, 1]} : vector<16x64xf32> to vector<16x16xf32>
    %46 = tpu.transpose %45, [1, 0] : vector<16x16xf32> -> vector<16x16xf32>
    %cst_23 = arith.constant dense<0.000000e+00> : vector<16x16xf32>
    %47 = tpu.matmul %44, %46, %cst_23 {dimension_numbers = #tpu.dot_dimension_numbers<[1], [0], [0], [1], [0, 0, 1, 1], [], []>} : vector<16x16xf32>, vector<16x16xf32>, vector<16x16xf32> -> vector<16x16xf32>
    %cst_24 = arith.constant 2.500000e-01 : f32
    %48 = vector.broadcast %cst_24 : f32 to vector<16x16xf32>
    %49 = arith.mulf %47, %48 : vector<16x16xf32>
    %cst_25 = arith.constant dense<0xFF800000> : vector<16xf32>
    %50 = vector.multi_reduction <maximumf>, %49, %cst_25 [1] : vector<16x16xf32> to vector<16xf32>
    %51 = vector.shape_cast %50 : vector<16xf32> to vector<16x1xf32>
    %52 = vector.broadcast %51 : vector<16x1xf32> to vector<16x16xf32>
    %53 = arith.subf %49, %52 : vector<16x16xf32>
    %54 = math.exp %53 : vector<16x16xf32>
    %cst_26 = arith.constant dense<0.000000e+00> : vector<16xf32>
    %55 = vector.multi_reduction <add>, %54, %cst_26 [1] : vector<16x16xf32> to vector<16xf32>
    %56 = vector.shape_cast %55 : vector<16xf32> to vector<16x1xf32>
    %57 = tpu.reciprocal %56 {approx = true} : vector<16x1xf32> -> vector<16x1xf32>
    %58 = vector.broadcast %57 : vector<16x1xf32> to vector<16x16xf32>
    %59 = arith.mulf %54, %58 : vector<16x16xf32>
    %60 = vector.extract_strided_slice %43 {offsets = [0, 0], sizes = [16, 16], strides = [1, 1]} : vector<16x64xf32> to vector<16x16xf32>
    %cst_27 = arith.constant dense<0.000000e+00> : vector<16x16xf32>
    %61 = tpu.matmul %59, %60, %cst_27 {dimension_numbers = #tpu.dot_dimension_numbers<[1], [0], [0], [1], [0, 0, 1, 1], [], []>} : vector<16x16xf32>, vector<16x16xf32>, vector<16x16xf32> -> vector<16x16xf32>
    %62 = vector.extract_strided_slice %41 {offsets = [0, 16], sizes = [16, 16], strides = [1, 1]} : vector<16x64xf32> to vector<16x16xf32>
    %63 = vector.extract_strided_slice %42 {offsets = [0, 16], sizes = [16, 16], strides = [1, 1]} : vector<16x64xf32> to vector<16x16xf32>
    %64 = tpu.transpose %63, [1, 0] : vector<16x16xf32> -> vector<16x16xf32>
    %cst_28 = arith.constant dense<0.000000e+00> : vector<16x16xf32>
    %65 = tpu.matmul %62, %64, %cst_28 {dimension_numbers = #tpu.dot_dimension_numbers<[1], [0], [0], [1], [0, 0, 1, 1], [], []>} : vector<16x16xf32>, vector<16x16xf32>, vector<16x16xf32> -> vector<16x16xf32>
    %cst_29 = arith.constant 2.500000e-01 : f32
    %66 = vector.broadcast %cst_29 : f32 to vector<16x16xf32>
    %67 = arith.mulf %65, %66 : vector<16x16xf32>
    %cst_30 = arith.constant dense<0xFF800000> : vector<16xf32>
    %68 = vector.multi_reduction <maximumf>, %67, %cst_30 [1] : vector<16x16xf32> to vector<16xf32>
    %69 = vector.shape_cast %68 : vector<16xf32> to vector<16x1xf32>
    %70 = vector.broadcast %69 : vector<16x1xf32> to vector<16x16xf32>
    %71 = arith.subf %67, %70 : vector<16x16xf32>
    %72 = math.exp %71 : vector<16x16xf32>
    %cst_31 = arith.constant dense<0.000000e+00> : vector<16xf32>
    %73 = vector.multi_reduction <add>, %72, %cst_31 [1] : vector<16x16xf32> to vector<16xf32>
    %74 = vector.shape_cast %73 : vector<16xf32> to vector<16x1xf32>
    %75 = tpu.reciprocal %74 {approx = true} : vector<16x1xf32> -> vector<16x1xf32>
    %76 = vector.broadcast %75 : vector<16x1xf32> to vector<16x16xf32>
    %77 = arith.mulf %72, %76 : vector<16x16xf32>
    %78 = vector.extract_strided_slice %43 {offsets = [0, 16], sizes = [16, 16], strides = [1, 1]} : vector<16x64xf32> to vector<16x16xf32>
    %cst_32 = arith.constant dense<0.000000e+00> : vector<16x16xf32>
    %79 = tpu.matmul %77, %78, %cst_32 {dimension_numbers = #tpu.dot_dimension_numbers<[1], [0], [0], [1], [0, 0, 1, 1], [], []>} : vector<16x16xf32>, vector<16x16xf32>, vector<16x16xf32> -> vector<16x16xf32>
    %80 = vector.extract_strided_slice %41 {offsets = [0, 32], sizes = [16, 16], strides = [1, 1]} : vector<16x64xf32> to vector<16x16xf32>
    %81 = vector.extract_strided_slice %42 {offsets = [0, 32], sizes = [16, 16], strides = [1, 1]} : vector<16x64xf32> to vector<16x16xf32>
    %82 = tpu.transpose %81, [1, 0] : vector<16x16xf32> -> vector<16x16xf32>
    %cst_33 = arith.constant dense<0.000000e+00> : vector<16x16xf32>
    %83 = tpu.matmul %80, %82, %cst_33 {dimension_numbers = #tpu.dot_dimension_numbers<[1], [0], [0], [1], [0, 0, 1, 1], [], []>} : vector<16x16xf32>, vector<16x16xf32>, vector<16x16xf32> -> vector<16x16xf32>
    %cst_34 = arith.constant 2.500000e-01 : f32
    %84 = vector.broadcast %cst_34 : f32 to vector<16x16xf32>
    %85 = arith.mulf %83, %84 : vector<16x16xf32>
    %cst_35 = arith.constant dense<0xFF800000> : vector<16xf32>
    %86 = vector.multi_reduction <maximumf>, %85, %cst_35 [1] : vector<16x16xf32> to vector<16xf32>
    %87 = vector.shape_cast %86 : vector<16xf32> to vector<16x1xf32>
    %88 = vector.broadcast %87 : vector<16x1xf32> to vector<16x16xf32>
    %89 = arith.subf %85, %88 : vector<16x16xf32>
    %90 = math.exp %89 : vector<16x16xf32>
    %cst_36 = arith.constant dense<0.000000e+00> : vector<16xf32>
    %91 = vector.multi_reduction <add>, %90, %cst_36 [1] : vector<16x16xf32> to vector<16xf32>
    %92 = vector.shape_cast %91 : vector<16xf32> to vector<16x1xf32>
    %93 = tpu.reciprocal %92 {approx = true} : vector<16x1xf32> -> vector<16x1xf32>
    %94 = vector.broadcast %93 : vector<16x1xf32> to vector<16x16xf32>
    %95 = arith.mulf %90, %94 : vector<16x16xf32>
    %96 = vector.extract_strided_slice %43 {offsets = [0, 32], sizes = [16, 16], strides = [1, 1]} : vector<16x64xf32> to vector<16x16xf32>
    %cst_37 = arith.constant dense<0.000000e+00> : vector<16x16xf32>
    %97 = tpu.matmul %95, %96, %cst_37 {dimension_numbers = #tpu.dot_dimension_numbers<[1], [0], [0], [1], [0, 0, 1, 1], [], []>} : vector<16x16xf32>, vector<16x16xf32>, vector<16x16xf32> -> vector<16x16xf32>
    %98 = vector.extract_strided_slice %41 {offsets = [0, 48], sizes = [16, 16], strides = [1, 1]} : vector<16x64xf32> to vector<16x16xf32>
    %99 = vector.extract_strided_slice %42 {offsets = [0, 48], sizes = [16, 16], strides = [1, 1]} : vector<16x64xf32> to vector<16x16xf32>
    %100 = tpu.transpose %99, [1, 0] : vector<16x16xf32> -> vector<16x16xf32>
    %cst_38 = arith.constant dense<0.000000e+00> : vector<16x16xf32>
    %101 = tpu.matmul %98, %100, %cst_38 {dimension_numbers = #tpu.dot_dimension_numbers<[1], [0], [0], [1], [0, 0, 1, 1], [], []>} : vector<16x16xf32>, vector<16x16xf32>, vector<16x16xf32> -> vector<16x16xf32>
    %cst_39 = arith.constant 2.500000e-01 : f32
    %102 = vector.broadcast %cst_39 : f32 to vector<16x16xf32>
    %103 = arith.mulf %101, %102 : vector<16x16xf32>
    %cst_40 = arith.constant dense<0xFF800000> : vector<16xf32>
    %104 = vector.multi_reduction <maximumf>, %103, %cst_40 [1] : vector<16x16xf32> to vector<16xf32>
    %105 = vector.shape_cast %104 : vector<16xf32> to vector<16x1xf32>
    %106 = vector.broadcast %105 : vector<16x1xf32> to vector<16x16xf32>
    %107 = arith.subf %103, %106 : vector<16x16xf32>
    %108 = math.exp %107 : vector<16x16xf32>
    %cst_41 = arith.constant dense<0.000000e+00> : vector<16xf32>
    %109 = vector.multi_reduction <add>, %108, %cst_41 [1] : vector<16x16xf32> to vector<16xf32>
    %110 = vector.shape_cast %109 : vector<16xf32> to vector<16x1xf32>
    %111 = tpu.reciprocal %110 {approx = true} : vector<16x1xf32> -> vector<16x1xf32>
    %112 = vector.broadcast %111 : vector<16x1xf32> to vector<16x16xf32>
    %113 = arith.mulf %108, %112 : vector<16x16xf32>
    %114 = vector.extract_strided_slice %43 {offsets = [0, 48], sizes = [16, 16], strides = [1, 1]} : vector<16x64xf32> to vector<16x16xf32>
    %cst_42 = arith.constant dense<0.000000e+00> : vector<16x16xf32>
    %115 = tpu.matmul %113, %114, %cst_42 {dimension_numbers = #tpu.dot_dimension_numbers<[1], [0], [0], [1], [0, 0, 1, 1], [], []>} : vector<16x16xf32>, vector<16x16xf32>, vector<16x16xf32> -> vector<16x16xf32>
    %116 = tpu.concatenate %61, %79, %97, %115 in 1 : vector<16x16xf32>, vector<16x16xf32>, vector<16x16xf32>, vector<16x16xf32> -> vector<16x64xf32>
    %117 = vector.extract_strided_slice %38 {offsets = [16, 0], sizes = [16, 64], strides = [1, 1]} : vector<32x64xf32> to vector<16x64xf32>
    %118 = vector.extract_strided_slice %39 {offsets = [16, 0], sizes = [16, 64], strides = [1, 1]} : vector<32x64xf32> to vector<16x64xf32>
    %119 = vector.extract_strided_slice %40 {offsets = [16, 0], sizes = [16, 64], strides = [1, 1]} : vector<32x64xf32> to vector<16x64xf32>
    %120 = vector.extract_strided_slice %117 {offsets = [0, 0], sizes = [16, 16], strides = [1, 1]} : vector<16x64xf32> to vector<16x16xf32>
    %121 = vector.extract_strided_slice %118 {offsets = [0, 0], sizes = [16, 16], strides = [1, 1]} : vector<16x64xf32> to vector<16x16xf32>
    %122 = tpu.transpose %121, [1, 0] : vector<16x16xf32> -> vector<16x16xf32>
    %cst_43 = arith.constant dense<0.000000e+00> : vector<16x16xf32>
    %123 = tpu.matmul %120, %122, %cst_43 {dimension_numbers = #tpu.dot_dimension_numbers<[1], [0], [0], [1], [0, 0, 1, 1], [], []>} : vector<16x16xf32>, vector<16x16xf32>, vector<16x16xf32> -> vector<16x16xf32>
    %cst_44 = arith.constant 2.500000e-01 : f32
    %124 = vector.broadcast %cst_44 : f32 to vector<16x16xf32>
    %125 = arith.mulf %123, %124 : vector<16x16xf32>
    %cst_45 = arith.constant dense<0xFF800000> : vector<16xf32>
    %126 = vector.multi_reduction <maximumf>, %125, %cst_45 [1] : vector<16x16xf32> to vector<16xf32>
    %127 = vector.shape_cast %126 : vector<16xf32> to vector<16x1xf32>
    %128 = vector.broadcast %127 : vector<16x1xf32> to vector<16x16xf32>
    %129 = arith.subf %125, %128 : vector<16x16xf32>
    %130 = math.exp %129 : vector<16x16xf32>
    %cst_46 = arith.constant dense<0.000000e+00> : vector<16xf32>
    %131 = vector.multi_reduction <add>, %130, %cst_46 [1] : vector<16x16xf32> to vector<16xf32>
    %132 = vector.shape_cast %131 : vector<16xf32> to vector<16x1xf32>
    %133 = tpu.reciprocal %132 {approx = true} : vector<16x1xf32> -> vector<16x1xf32>
    %134 = vector.broadcast %133 : vector<16x1xf32> to vector<16x16xf32>
    %135 = arith.mulf %130, %134 : vector<16x16xf32>
    %136 = vector.extract_strided_slice %119 {offsets = [0, 0], sizes = [16, 16], strides = [1, 1]} : vector<16x64xf32> to vector<16x16xf32>
    %cst_47 = arith.constant dense<0.000000e+00> : vector<16x16xf32>
    %137 = tpu.matmul %135, %136, %cst_47 {dimension_numbers = #tpu.dot_dimension_numbers<[1], [0], [0], [1], [0, 0, 1, 1], [], []>} : vector<16x16xf32>, vector<16x16xf32>, vector<16x16xf32> -> vector<16x16xf32>
    %138 = vector.extract_strided_slice %117 {offsets = [0, 16], sizes = [16, 16], strides = [1, 1]} : vector<16x64xf32> to vector<16x16xf32>
    %139 = vector.extract_strided_slice %118 {offsets = [0, 16], sizes = [16, 16], strides = [1, 1]} : vector<16x64xf32> to vector<16x16xf32>
    %140 = tpu.transpose %139, [1, 0] : vector<16x16xf32> -> vector<16x16xf32>
    %cst_48 = arith.constant dense<0.000000e+00> : vector<16x16xf32>
    %141 = tpu.matmul %138, %140, %cst_48 {dimension_numbers = #tpu.dot_dimension_numbers<[1], [0], [0], [1], [0, 0, 1, 1], [], []>} : vector<16x16xf32>, vector<16x16xf32>, vector<16x16xf32> -> vector<16x16xf32>
    %cst_49 = arith.constant 2.500000e-01 : f32
    %142 = vector.broadcast %cst_49 : f32 to vector<16x16xf32>
    %143 = arith.mulf %141, %142 : vector<16x16xf32>
    %cst_50 = arith.constant dense<0xFF800000> : vector<16xf32>
    %144 = vector.multi_reduction <maximumf>, %143, %cst_50 [1] : vector<16x16xf32> to vector<16xf32>
    %145 = vector.shape_cast %144 : vector<16xf32> to vector<16x1xf32>
    %146 = vector.broadcast %145 : vector<16x1xf32> to vector<16x16xf32>
    %147 = arith.subf %143, %146 : vector<16x16xf32>
    %148 = math.exp %147 : vector<16x16xf32>
    %cst_51 = arith.constant dense<0.000000e+00> : vector<16xf32>
    %149 = vector.multi_reduction <add>, %148, %cst_51 [1] : vector<16x16xf32> to vector<16xf32>
    %150 = vector.shape_cast %149 : vector<16xf32> to vector<16x1xf32>
    %151 = tpu.reciprocal %150 {approx = true} : vector<16x1xf32> -> vector<16x1xf32>
    %152 = vector.broadcast %151 : vector<16x1xf32> to vector<16x16xf32>
    %153 = arith.mulf %148, %152 : vector<16x16xf32>
    %154 = vector.extract_strided_slice %119 {offsets = [0, 16], sizes = [16, 16], strides = [1, 1]} : vector<16x64xf32> to vector<16x16xf32>
    %cst_52 = arith.constant dense<0.000000e+00> : vector<16x16xf32>
    %155 = tpu.matmul %153, %154, %cst_52 {dimension_numbers = #tpu.dot_dimension_numbers<[1], [0], [0], [1], [0, 0, 1, 1], [], []>} : vector<16x16xf32>, vector<16x16xf32>, vector<16x16xf32> -> vector<16x16xf32>
    %156 = vector.extract_strided_slice %117 {offsets = [0, 32], sizes = [16, 16], strides = [1, 1]} : vector<16x64xf32> to vector<16x16xf32>
    %157 = vector.extract_strided_slice %118 {offsets = [0, 32], sizes = [16, 16], strides = [1, 1]} : vector<16x64xf32> to vector<16x16xf32>
    %158 = tpu.transpose %157, [1, 0] : vector<16x16xf32> -> vector<16x16xf32>
    %cst_53 = arith.constant dense<0.000000e+00> : vector<16x16xf32>
    %159 = tpu.matmul %156, %158, %cst_53 {dimension_numbers = #tpu.dot_dimension_numbers<[1], [0], [0], [1], [0, 0, 1, 1], [], []>} : vector<16x16xf32>, vector<16x16xf32>, vector<16x16xf32> -> vector<16x16xf32>
    %cst_54 = arith.constant 2.500000e-01 : f32
    %160 = vector.broadcast %cst_54 : f32 to vector<16x16xf32>
    %161 = arith.mulf %159, %160 : vector<16x16xf32>
    %cst_55 = arith.constant dense<0xFF800000> : vector<16xf32>
    %162 = vector.multi_reduction <maximumf>, %161, %cst_55 [1] : vector<16x16xf32> to vector<16xf32>
    %163 = vector.shape_cast %162 : vector<16xf32> to vector<16x1xf32>
    %164 = vector.broadcast %163 : vector<16x1xf32> to vector<16x16xf32>
    %165 = arith.subf %161, %164 : vector<16x16xf32>
    %166 = math.exp %165 : vector<16x16xf32>
    %cst_56 = arith.constant dense<0.000000e+00> : vector<16xf32>
    %167 = vector.multi_reduction <add>, %166, %cst_56 [1] : vector<16x16xf32> to vector<16xf32>
    %168 = vector.shape_cast %167 : vector<16xf32> to vector<16x1xf32>
    %169 = tpu.reciprocal %168 {approx = true} : vector<16x1xf32> -> vector<16x1xf32>
    %170 = vector.broadcast %169 : vector<16x1xf32> to vector<16x16xf32>
    %171 = arith.mulf %166, %170 : vector<16x16xf32>
    %172 = vector.extract_strided_slice %119 {offsets = [0, 32], sizes = [16, 16], strides = [1, 1]} : vector<16x64xf32> to vector<16x16xf32>
    %cst_57 = arith.constant dense<0.000000e+00> : vector<16x16xf32>
    %173 = tpu.matmul %171, %172, %cst_57 {dimension_numbers = #tpu.dot_dimension_numbers<[1], [0], [0], [1], [0, 0, 1, 1], [], []>} : vector<16x16xf32>, vector<16x16xf32>, vector<16x16xf32> -> vector<16x16xf32>
    %174 = vector.extract_strided_slice %117 {offsets = [0, 48], sizes = [16, 16], strides = [1, 1]} : vector<16x64xf32> to vector<16x16xf32>
    %175 = vector.extract_strided_slice %118 {offsets = [0, 48], sizes = [16, 16], strides = [1, 1]} : vector<16x64xf32> to vector<16x16xf32>
    %176 = tpu.transpose %175, [1, 0] : vector<16x16xf32> -> vector<16x16xf32>
    %cst_58 = arith.constant dense<0.000000e+00> : vector<16x16xf32>
    %177 = tpu.matmul %174, %176, %cst_58 {dimension_numbers = #tpu.dot_dimension_numbers<[1], [0], [0], [1], [0, 0, 1, 1], [], []>} : vector<16x16xf32>, vector<16x16xf32>, vector<16x16xf32> -> vector<16x16xf32>
    %cst_59 = arith.constant 2.500000e-01 : f32
    %178 = vector.broadcast %cst_59 : f32 to vector<16x16xf32>
    %179 = arith.mulf %177, %178 : vector<16x16xf32>
    %cst_60 = arith.constant dense<0xFF800000> : vector<16xf32>
    %180 = vector.multi_reduction <maximumf>, %179, %cst_60 [1] : vector<16x16xf32> to vector<16xf32>
    %181 = vector.shape_cast %180 : vector<16xf32> to vector<16x1xf32>
    %182 = vector.broadcast %181 : vector<16x1xf32> to vector<16x16xf32>
    %183 = arith.subf %179, %182 : vector<16x16xf32>
    %184 = math.exp %183 : vector<16x16xf32>
    %cst_61 = arith.constant dense<0.000000e+00> : vector<16xf32>
    %185 = vector.multi_reduction <add>, %184, %cst_61 [1] : vector<16x16xf32> to vector<16xf32>
    %186 = vector.shape_cast %185 : vector<16xf32> to vector<16x1xf32>
    %187 = tpu.reciprocal %186 {approx = true} : vector<16x1xf32> -> vector<16x1xf32>
    %188 = vector.broadcast %187 : vector<16x1xf32> to vector<16x16xf32>
    %189 = arith.mulf %184, %188 : vector<16x16xf32>
    %190 = vector.extract_strided_slice %119 {offsets = [0, 48], sizes = [16, 16], strides = [1, 1]} : vector<16x64xf32> to vector<16x16xf32>
    %cst_62 = arith.constant dense<0.000000e+00> : vector<16x16xf32>
    %191 = tpu.matmul %189, %190, %cst_62 {dimension_numbers = #tpu.dot_dimension_numbers<[1], [0], [0], [1], [0, 0, 1, 1], [], []>} : vector<16x16xf32>, vector<16x16xf32>, vector<16x16xf32> -> vector<16x16xf32>
    %192 = tpu.concatenate %137, %155, %173, %191 in 1 : vector<16x16xf32>, vector<16x16xf32>, vector<16x16xf32>, vector<16x16xf32> -> vector<16x64xf32>
    %193 = tpu.concatenate %116, %192 in 0 : vector<16x64xf32>, vector<16x64xf32> -> vector<32x64xf32>
    %c0_63 = arith.constant 0 : index
    %c0_64 = arith.constant 0 : index
    %c0_65 = arith.constant 0 : index
    %194 = vector.load %arg8[%c0_63, %c0_64, %c0_65] : memref<2x64x64xf32, #tpu.memory_space<vmem>>, vector<1x64x64xf32>
    %195 = vector.shape_cast %194 : vector<1x64x64xf32> to vector<64x64xf32>
    %cst_66 = arith.constant dense<0.000000e+00> : vector<32x64xf32>
    %196 = tpu.matmul %193, %195, %cst_66 {dimension_numbers = #tpu.dot_dimension_numbers<[1], [0], [0], [1], [0, 0, 1, 1], [], []>} : vector<32x64xf32>, vector<64x64xf32>, vector<32x64xf32> -> vector<32x64xf32>
    %c0_67 = arith.constant 0 : index
    %c0_68 = arith.constant 0 : index
    %c0_69 = arith.constant 0 : index
    %197 = vector.load %arg9[%c0_67, %c0_68, %c0_69] : memref<2x1x64xf32, #tpu.memory_space<vmem>>, vector<1x1x64xf32>
    %198 = vector.shape_cast %197 : vector<1x1x64xf32> to vector<1x64xf32>
    %199 = vector.broadcast %198 : vector<1x64xf32> to vector<32x64xf32>
    %200 = arith.addf %196, %199 : vector<32x64xf32>
    %201 = arith.addf %4, %200 : vector<32x64xf32>
    %c0_70 = arith.constant 0 : index
    %c0_71 = arith.constant 0 : index
    %c0_72 = arith.constant 0 : index
    %202 = vector.load %arg10[%c0_70, %c0_71, %c0_72] : memref<2x1x64xf32, #tpu.memory_space<vmem>>, vector<1x1x64xf32>
    %203 = vector.shape_cast %202 : vector<1x1x64xf32> to vector<1x64xf32>
    %c0_73 = arith.constant 0 : index
    %c0_74 = arith.constant 0 : index
    %c0_75 = arith.constant 0 : index
    %204 = vector.load %arg11[%c0_73, %c0_74, %c0_75] : memref<2x1x64xf32, #tpu.memory_space<vmem>>, vector<1x1x64xf32>
    %205 = vector.shape_cast %204 : vector<1x1x64xf32> to vector<1x64xf32>
    %cst_76 = arith.constant dense<0.000000e+00> : vector<32xf32>
    %206 = vector.multi_reduction <add>, %201, %cst_76 [1] : vector<32x64xf32> to vector<32xf32>
    %207 = vector.shape_cast %206 : vector<32xf32> to vector<32x1xf32>
    %cst_77 = arith.constant 6.400000e+01 : f32
    %208 = vector.broadcast %cst_77 : f32 to vector<32x1xf32>
    %209 = arith.divf %207, %208 : vector<32x1xf32>
    %210 = vector.broadcast %209 : vector<32x1xf32> to vector<32x64xf32>
    %211 = arith.subf %201, %210 : vector<32x64xf32>
    %212 = arith.mulf %211, %211 : vector<32x64xf32>
    %cst_78 = arith.constant dense<0.000000e+00> : vector<32xf32>
    %213 = vector.multi_reduction <add>, %212, %cst_78 [1] : vector<32x64xf32> to vector<32xf32>
    %214 = vector.shape_cast %213 : vector<32xf32> to vector<32x1xf32>
    %cst_79 = arith.constant 6.400000e+01 : f32
    %215 = vector.broadcast %cst_79 : f32 to vector<32x1xf32>
    %216 = arith.divf %214, %215 : vector<32x1xf32>
    %217 = vector.broadcast %209 : vector<32x1xf32> to vector<32x64xf32>
    %218 = arith.subf %201, %217 : vector<32x64xf32>
    %cst_80 = arith.constant 9.99999997E-7 : f32
    %219 = vector.broadcast %cst_80 : f32 to vector<32x1xf32>
    %220 = arith.addf %216, %219 : vector<32x1xf32>
    %221 = math.rsqrt %220 : vector<32x1xf32>
    %222 = vector.broadcast %221 : vector<32x1xf32> to vector<32x64xf32>
    %223 = arith.mulf %218, %222 : vector<32x64xf32>
    %224 = vector.broadcast %203 : vector<1x64xf32> to vector<32x64xf32>
    %225 = arith.mulf %223, %224 : vector<32x64xf32>
    %226 = vector.broadcast %205 : vector<1x64xf32> to vector<32x64xf32>
    %227 = arith.addf %225, %226 : vector<32x64xf32>
    %c0_81 = arith.constant 0 : index
    %c0_82 = arith.constant 0 : index
    %c0_83 = arith.constant 0 : index
    %228 = vector.load %arg12[%c0_81, %c0_82, %c0_83] : memref<2x64x128xf32, #tpu.memory_space<vmem>>, vector<1x64x128xf32>
    %229 = vector.shape_cast %228 : vector<1x64x128xf32> to vector<64x128xf32>
    %cst_84 = arith.constant dense<0.000000e+00> : vector<32x128xf32>
    %230 = tpu.matmul %227, %229, %cst_84 {dimension_numbers = #tpu.dot_dimension_numbers<[1], [0], [0], [1], [0, 0, 1, 1], [], []>} : vector<32x64xf32>, vector<64x128xf32>, vector<32x128xf32> -> vector<32x128xf32>
    %c0_85 = arith.constant 0 : index
    %c0_86 = arith.constant 0 : index
    %c0_87 = arith.constant 0 : index
    %231 = vector.load %arg13[%c0_85, %c0_86, %c0_87] : memref<2x1x128xf32, #tpu.memory_space<vmem>>, vector<1x1x128xf32>
    %232 = vector.shape_cast %231 : vector<1x1x128xf32> to vector<1x128xf32>
    %233 = vector.broadcast %232 : vector<1x128xf32> to vector<32x128xf32>
    %234 = arith.addf %230, %233 : vector<32x128xf32>
    %cst_88 = arith.constant 5.000000e-01 : f32
    %235 = vector.broadcast %cst_88 : f32 to vector<32x128xf32>
    %236 = arith.mulf %235, %234 : vector<32x128xf32>
    %cst_89 = arith.constant 4.471500e-02 : f32
    %237 = vector.broadcast %cst_89 : f32 to vector<32x128xf32>
    %238 = arith.mulf %237, %234 : vector<32x128xf32>
    %239 = arith.mulf %238, %234 : vector<32x128xf32>
    %240 = arith.mulf %239, %234 : vector<32x128xf32>
    %241 = arith.addf %234, %240 : vector<32x128xf32>
    %cst_90 = arith.constant 0.797884583 : f32
    %242 = vector.broadcast %cst_90 : f32 to vector<32x128xf32>
    %243 = arith.mulf %242, %241 : vector<32x128xf32>
    %244 = math.tanh %243 : vector<32x128xf32>
    %cst_91 = arith.constant 1.000000e+00 : f32
    %245 = vector.broadcast %cst_91 : f32 to vector<32x128xf32>
    %246 = arith.addf %245, %244 : vector<32x128xf32>
    %247 = arith.mulf %236, %246 : vector<32x128xf32>
    %c0_92 = arith.constant 0 : index
    %c0_93 = arith.constant 0 : index
    %c0_94 = arith.constant 0 : index
    %248 = vector.load %arg14[%c0_92, %c0_93, %c0_94] : memref<2x128x64xf32, #tpu.memory_space<vmem>>, vector<1x128x64xf32>
    %249 = vector.shape_cast %248 : vector<1x128x64xf32> to vector<128x64xf32>
    %cst_95 = arith.constant dense<0.000000e+00> : vector<32x64xf32>
    %250 = tpu.matmul %247, %249, %cst_95 {dimension_numbers = #tpu.dot_dimension_numbers<[1], [0], [0], [1], [0, 0, 1, 1], [], []>} : vector<32x128xf32>, vector<128x64xf32>, vector<32x64xf32> -> vector<32x64xf32>
    %c0_96 = arith.constant 0 : index
    %c0_97 = arith.constant 0 : index
    %c0_98 = arith.constant 0 : index
    %251 = vector.load %arg15[%c0_96, %c0_97, %c0_98] : memref<2x1x64xf32, #tpu.memory_space<vmem>>, vector<1x1x64xf32>
    %252 = vector.shape_cast %251 : vector<1x1x64xf32> to vector<1x64xf32>
    %253 = vector.broadcast %252 : vector<1x64xf32> to vector<32x64xf32>
    %254 = arith.addf %250, %253 : vector<32x64xf32>
    %255 = arith.addf %201, %254 : vector<32x64xf32>
    %c1 = arith.constant 1 : index
    %c0_99 = arith.constant 0 : index
    %c0_100 = arith.constant 0 : index
    %256 = vector.load %arg4[%c1, %c0_99, %c0_100] : memref<2x1x64xf32, #tpu.memory_space<vmem>>, vector<1x1x64xf32>
    %257 = vector.shape_cast %256 : vector<1x1x64xf32> to vector<1x64xf32>
    %c1_101 = arith.constant 1 : index
    %c0_102 = arith.constant 0 : index
    %c0_103 = arith.constant 0 : index
    %258 = vector.load %arg5[%c1_101, %c0_102, %c0_103] : memref<2x1x64xf32, #tpu.memory_space<vmem>>, vector<1x1x64xf32>
    %259 = vector.shape_cast %258 : vector<1x1x64xf32> to vector<1x64xf32>
    %cst_104 = arith.constant dense<0.000000e+00> : vector<32xf32>
    %260 = vector.multi_reduction <add>, %255, %cst_104 [1] : vector<32x64xf32> to vector<32xf32>
    %261 = vector.shape_cast %260 : vector<32xf32> to vector<32x1xf32>
    %cst_105 = arith.constant 6.400000e+01 : f32
    %262 = vector.broadcast %cst_105 : f32 to vector<32x1xf32>
    %263 = arith.divf %261, %262 : vector<32x1xf32>
    %264 = vector.broadcast %263 : vector<32x1xf32> to vector<32x64xf32>
    %265 = arith.subf %255, %264 : vector<32x64xf32>
    %266 = arith.mulf %265, %265 : vector<32x64xf32>
    %cst_106 = arith.constant dense<0.000000e+00> : vector<32xf32>
    %267 = vector.multi_reduction <add>, %266, %cst_106 [1] : vector<32x64xf32> to vector<32xf32>
    %268 = vector.shape_cast %267 : vector<32xf32> to vector<32x1xf32>
    %cst_107 = arith.constant 6.400000e+01 : f32
    %269 = vector.broadcast %cst_107 : f32 to vector<32x1xf32>
    %270 = arith.divf %268, %269 : vector<32x1xf32>
    %271 = vector.broadcast %263 : vector<32x1xf32> to vector<32x64xf32>
    %272 = arith.subf %255, %271 : vector<32x64xf32>
    %cst_108 = arith.constant 9.99999997E-7 : f32
    %273 = vector.broadcast %cst_108 : f32 to vector<32x1xf32>
    %274 = arith.addf %270, %273 : vector<32x1xf32>
    %275 = math.rsqrt %274 : vector<32x1xf32>
    %276 = vector.broadcast %275 : vector<32x1xf32> to vector<32x64xf32>
    %277 = arith.mulf %272, %276 : vector<32x64xf32>
    %278 = vector.broadcast %257 : vector<1x64xf32> to vector<32x64xf32>
    %279 = arith.mulf %277, %278 : vector<32x64xf32>
    %280 = vector.broadcast %259 : vector<1x64xf32> to vector<32x64xf32>
    %281 = arith.addf %279, %280 : vector<32x64xf32>
    %c1_109 = arith.constant 1 : index
    %c0_110 = arith.constant 0 : index
    %c0_111 = arith.constant 0 : index
    %282 = vector.load %arg6[%c1_109, %c0_110, %c0_111] : memref<2x64x192xf32, #tpu.memory_space<vmem>>, vector<1x64x192xf32>
    %283 = vector.shape_cast %282 : vector<1x64x192xf32> to vector<64x192xf32>
    %cst_112 = arith.constant dense<0.000000e+00> : vector<32x192xf32>
    %284 = tpu.matmul %281, %283, %cst_112 {dimension_numbers = #tpu.dot_dimension_numbers<[1], [0], [0], [1], [0, 0, 1, 1], [], []>} : vector<32x64xf32>, vector<64x192xf32>, vector<32x192xf32> -> vector<32x192xf32>
    %c1_113 = arith.constant 1 : index
    %c0_114 = arith.constant 0 : index
    %c0_115 = arith.constant 0 : index
    %285 = vector.load %arg7[%c1_113, %c0_114, %c0_115] : memref<2x1x192xf32, #tpu.memory_space<vmem>>, vector<1x1x192xf32>
    %286 = vector.shape_cast %285 : vector<1x1x192xf32> to vector<1x192xf32>
    %287 = vector.broadcast %286 : vector<1x192xf32> to vector<32x192xf32>
    %288 = arith.addf %284, %287 : vector<32x192xf32>
    %289 = vector.extract_strided_slice %288 {offsets = [0, 0], sizes = [32, 64], strides = [1, 1]} : vector<32x192xf32> to vector<32x64xf32>
    %290 = vector.extract_strided_slice %288 {offsets = [0, 64], sizes = [32, 64], strides = [1, 1]} : vector<32x192xf32> to vector<32x64xf32>
    %291 = vector.extract_strided_slice %288 {offsets = [0, 128], sizes = [32, 64], strides = [1, 1]} : vector<32x192xf32> to vector<32x64xf32>
    %292 = vector.extract_strided_slice %289 {offsets = [0, 0], sizes = [16, 64], strides = [1, 1]} : vector<32x64xf32> to vector<16x64xf32>
    %293 = vector.extract_strided_slice %290 {offsets = [0, 0], sizes = [16, 64], strides = [1, 1]} : vector<32x64xf32> to vector<16x64xf32>
    %294 = vector.extract_strided_slice %291 {offsets = [0, 0], sizes = [16, 64], strides = [1, 1]} : vector<32x64xf32> to vector<16x64xf32>
    %295 = vector.extract_strided_slice %292 {offsets = [0, 0], sizes = [16, 16], strides = [1, 1]} : vector<16x64xf32> to vector<16x16xf32>
    %296 = vector.extract_strided_slice %293 {offsets = [0, 0], sizes = [16, 16], strides = [1, 1]} : vector<16x64xf32> to vector<16x16xf32>
    %297 = tpu.transpose %296, [1, 0] : vector<16x16xf32> -> vector<16x16xf32>
    %cst_116 = arith.constant dense<0.000000e+00> : vector<16x16xf32>
    %298 = tpu.matmul %295, %297, %cst_116 {dimension_numbers = #tpu.dot_dimension_numbers<[1], [0], [0], [1], [0, 0, 1, 1], [], []>} : vector<16x16xf32>, vector<16x16xf32>, vector<16x16xf32> -> vector<16x16xf32>
    %cst_117 = arith.constant 2.500000e-01 : f32
    %299 = vector.broadcast %cst_117 : f32 to vector<16x16xf32>
    %300 = arith.mulf %298, %299 : vector<16x16xf32>
    %cst_118 = arith.constant dense<0xFF800000> : vector<16xf32>
    %301 = vector.multi_reduction <maximumf>, %300, %cst_118 [1] : vector<16x16xf32> to vector<16xf32>
    %302 = vector.shape_cast %301 : vector<16xf32> to vector<16x1xf32>
    %303 = vector.broadcast %302 : vector<16x1xf32> to vector<16x16xf32>
    %304 = arith.subf %300, %303 : vector<16x16xf32>
    %305 = math.exp %304 : vector<16x16xf32>
    %cst_119 = arith.constant dense<0.000000e+00> : vector<16xf32>
    %306 = vector.multi_reduction <add>, %305, %cst_119 [1] : vector<16x16xf32> to vector<16xf32>
    %307 = vector.shape_cast %306 : vector<16xf32> to vector<16x1xf32>
    %308 = tpu.reciprocal %307 {approx = true} : vector<16x1xf32> -> vector<16x1xf32>
    %309 = vector.broadcast %308 : vector<16x1xf32> to vector<16x16xf32>
    %310 = arith.mulf %305, %309 : vector<16x16xf32>
    %311 = vector.extract_strided_slice %294 {offsets = [0, 0], sizes = [16, 16], strides = [1, 1]} : vector<16x64xf32> to vector<16x16xf32>
    %cst_120 = arith.constant dense<0.000000e+00> : vector<16x16xf32>
    %312 = tpu.matmul %310, %311, %cst_120 {dimension_numbers = #tpu.dot_dimension_numbers<[1], [0], [0], [1], [0, 0, 1, 1], [], []>} : vector<16x16xf32>, vector<16x16xf32>, vector<16x16xf32> -> vector<16x16xf32>
    %313 = vector.extract_strided_slice %292 {offsets = [0, 16], sizes = [16, 16], strides = [1, 1]} : vector<16x64xf32> to vector<16x16xf32>
    %314 = vector.extract_strided_slice %293 {offsets = [0, 16], sizes = [16, 16], strides = [1, 1]} : vector<16x64xf32> to vector<16x16xf32>
    %315 = tpu.transpose %314, [1, 0] : vector<16x16xf32> -> vector<16x16xf32>
    %cst_121 = arith.constant dense<0.000000e+00> : vector<16x16xf32>
    %316 = tpu.matmul %313, %315, %cst_121 {dimension_numbers = #tpu.dot_dimension_numbers<[1], [0], [0], [1], [0, 0, 1, 1], [], []>} : vector<16x16xf32>, vector<16x16xf32>, vector<16x16xf32> -> vector<16x16xf32>
    %cst_122 = arith.constant 2.500000e-01 : f32
    %317 = vector.broadcast %cst_122 : f32 to vector<16x16xf32>
    %318 = arith.mulf %316, %317 : vector<16x16xf32>
    %cst_123 = arith.constant dense<0xFF800000> : vector<16xf32>
    %319 = vector.multi_reduction <maximumf>, %318, %cst_123 [1] : vector<16x16xf32> to vector<16xf32>
    %320 = vector.shape_cast %319 : vector<16xf32> to vector<16x1xf32>
    %321 = vector.broadcast %320 : vector<16x1xf32> to vector<16x16xf32>
    %322 = arith.subf %318, %321 : vector<16x16xf32>
    %323 = math.exp %322 : vector<16x16xf32>
    %cst_124 = arith.constant dense<0.000000e+00> : vector<16xf32>
    %324 = vector.multi_reduction <add>, %323, %cst_124 [1] : vector<16x16xf32> to vector<16xf32>
    %325 = vector.shape_cast %324 : vector<16xf32> to vector<16x1xf32>
    %326 = tpu.reciprocal %325 {approx = true} : vector<16x1xf32> -> vector<16x1xf32>
    %327 = vector.broadcast %326 : vector<16x1xf32> to vector<16x16xf32>
    %328 = arith.mulf %323, %327 : vector<16x16xf32>
    %329 = vector.extract_strided_slice %294 {offsets = [0, 16], sizes = [16, 16], strides = [1, 1]} : vector<16x64xf32> to vector<16x16xf32>
    %cst_125 = arith.constant dense<0.000000e+00> : vector<16x16xf32>
    %330 = tpu.matmul %328, %329, %cst_125 {dimension_numbers = #tpu.dot_dimension_numbers<[1], [0], [0], [1], [0, 0, 1, 1], [], []>} : vector<16x16xf32>, vector<16x16xf32>, vector<16x16xf32> -> vector<16x16xf32>
    %331 = vector.extract_strided_slice %292 {offsets = [0, 32], sizes = [16, 16], strides = [1, 1]} : vector<16x64xf32> to vector<16x16xf32>
    %332 = vector.extract_strided_slice %293 {offsets = [0, 32], sizes = [16, 16], strides = [1, 1]} : vector<16x64xf32> to vector<16x16xf32>
    %333 = tpu.transpose %332, [1, 0] : vector<16x16xf32> -> vector<16x16xf32>
    %cst_126 = arith.constant dense<0.000000e+00> : vector<16x16xf32>
    %334 = tpu.matmul %331, %333, %cst_126 {dimension_numbers = #tpu.dot_dimension_numbers<[1], [0], [0], [1], [0, 0, 1, 1], [], []>} : vector<16x16xf32>, vector<16x16xf32>, vector<16x16xf32> -> vector<16x16xf32>
    %cst_127 = arith.constant 2.500000e-01 : f32
    %335 = vector.broadcast %cst_127 : f32 to vector<16x16xf32>
    %336 = arith.mulf %334, %335 : vector<16x16xf32>
    %cst_128 = arith.constant dense<0xFF800000> : vector<16xf32>
    %337 = vector.multi_reduction <maximumf>, %336, %cst_128 [1] : vector<16x16xf32> to vector<16xf32>
    %338 = vector.shape_cast %337 : vector<16xf32> to vector<16x1xf32>
    %339 = vector.broadcast %338 : vector<16x1xf32> to vector<16x16xf32>
    %340 = arith.subf %336, %339 : vector<16x16xf32>
    %341 = math.exp %340 : vector<16x16xf32>
    %cst_129 = arith.constant dense<0.000000e+00> : vector<16xf32>
    %342 = vector.multi_reduction <add>, %341, %cst_129 [1] : vector<16x16xf32> to vector<16xf32>
    %343 = vector.shape_cast %342 : vector<16xf32> to vector<16x1xf32>
    %344 = tpu.reciprocal %343 {approx = true} : vector<16x1xf32> -> vector<16x1xf32>
    %345 = vector.broadcast %344 : vector<16x1xf32> to vector<16x16xf32>
    %346 = arith.mulf %341, %345 : vector<16x16xf32>
    %347 = vector.extract_strided_slice %294 {offsets = [0, 32], sizes = [16, 16], strides = [1, 1]} : vector<16x64xf32> to vector<16x16xf32>
    %cst_130 = arith.constant dense<0.000000e+00> : vector<16x16xf32>
    %348 = tpu.matmul %346, %347, %cst_130 {dimension_numbers = #tpu.dot_dimension_numbers<[1], [0], [0], [1], [0, 0, 1, 1], [], []>} : vector<16x16xf32>, vector<16x16xf32>, vector<16x16xf32> -> vector<16x16xf32>
    %349 = vector.extract_strided_slice %292 {offsets = [0, 48], sizes = [16, 16], strides = [1, 1]} : vector<16x64xf32> to vector<16x16xf32>
    %350 = vector.extract_strided_slice %293 {offsets = [0, 48], sizes = [16, 16], strides = [1, 1]} : vector<16x64xf32> to vector<16x16xf32>
    %351 = tpu.transpose %350, [1, 0] : vector<16x16xf32> -> vector<16x16xf32>
    %cst_131 = arith.constant dense<0.000000e+00> : vector<16x16xf32>
    %352 = tpu.matmul %349, %351, %cst_131 {dimension_numbers = #tpu.dot_dimension_numbers<[1], [0], [0], [1], [0, 0, 1, 1], [], []>} : vector<16x16xf32>, vector<16x16xf32>, vector<16x16xf32> -> vector<16x16xf32>
    %cst_132 = arith.constant 2.500000e-01 : f32
    %353 = vector.broadcast %cst_132 : f32 to vector<16x16xf32>
    %354 = arith.mulf %352, %353 : vector<16x16xf32>
    %cst_133 = arith.constant dense<0xFF800000> : vector<16xf32>
    %355 = vector.multi_reduction <maximumf>, %354, %cst_133 [1] : vector<16x16xf32> to vector<16xf32>
    %356 = vector.shape_cast %355 : vector<16xf32> to vector<16x1xf32>
    %357 = vector.broadcast %356 : vector<16x1xf32> to vector<16x16xf32>
    %358 = arith.subf %354, %357 : vector<16x16xf32>
    %359 = math.exp %358 : vector<16x16xf32>
    %cst_134 = arith.constant dense<0.000000e+00> : vector<16xf32>
    %360 = vector.multi_reduction <add>, %359, %cst_134 [1] : vector<16x16xf32> to vector<16xf32>
    %361 = vector.shape_cast %360 : vector<16xf32> to vector<16x1xf32>
    %362 = tpu.reciprocal %361 {approx = true} : vector<16x1xf32> -> vector<16x1xf32>
    %363 = vector.broadcast %362 : vector<16x1xf32> to vector<16x16xf32>
    %364 = arith.mulf %359, %363 : vector<16x16xf32>
    %365 = vector.extract_strided_slice %294 {offsets = [0, 48], sizes = [16, 16], strides = [1, 1]} : vector<16x64xf32> to vector<16x16xf32>
    %cst_135 = arith.constant dense<0.000000e+00> : vector<16x16xf32>
    %366 = tpu.matmul %364, %365, %cst_135 {dimension_numbers = #tpu.dot_dimension_numbers<[1], [0], [0], [1], [0, 0, 1, 1], [], []>} : vector<16x16xf32>, vector<16x16xf32>, vector<16x16xf32> -> vector<16x16xf32>
    %367 = tpu.concatenate %312, %330, %348, %366 in 1 : vector<16x16xf32>, vector<16x16xf32>, vector<16x16xf32>, vector<16x16xf32> -> vector<16x64xf32>
    %368 = vector.extract_strided_slice %289 {offsets = [16, 0], sizes = [16, 64], strides = [1, 1]} : vector<32x64xf32> to vector<16x64xf32>
    %369 = vector.extract_strided_slice %290 {offsets = [16, 0], sizes = [16, 64], strides = [1, 1]} : vector<32x64xf32> to vector<16x64xf32>
    %370 = vector.extract_strided_slice %291 {offsets = [16, 0], sizes = [16, 64], strides = [1, 1]} : vector<32x64xf32> to vector<16x64xf32>
    %371 = vector.extract_strided_slice %368 {offsets = [0, 0], sizes = [16, 16], strides = [1, 1]} : vector<16x64xf32> to vector<16x16xf32>
    %372 = vector.extract_strided_slice %369 {offsets = [0, 0], sizes = [16, 16], strides = [1, 1]} : vector<16x64xf32> to vector<16x16xf32>
    %373 = tpu.transpose %372, [1, 0] : vector<16x16xf32> -> vector<16x16xf32>
    %cst_136 = arith.constant dense<0.000000e+00> : vector<16x16xf32>
    %374 = tpu.matmul %371, %373, %cst_136 {dimension_numbers = #tpu.dot_dimension_numbers<[1], [0], [0], [1], [0, 0, 1, 1], [], []>} : vector<16x16xf32>, vector<16x16xf32>, vector<16x16xf32> -> vector<16x16xf32>
    %cst_137 = arith.constant 2.500000e-01 : f32
    %375 = vector.broadcast %cst_137 : f32 to vector<16x16xf32>
    %376 = arith.mulf %374, %375 : vector<16x16xf32>
    %cst_138 = arith.constant dense<0xFF800000> : vector<16xf32>
    %377 = vector.multi_reduction <maximumf>, %376, %cst_138 [1] : vector<16x16xf32> to vector<16xf32>
    %378 = vector.shape_cast %377 : vector<16xf32> to vector<16x1xf32>
    %379 = vector.broadcast %378 : vector<16x1xf32> to vector<16x16xf32>
    %380 = arith.subf %376, %379 : vector<16x16xf32>
    %381 = math.exp %380 : vector<16x16xf32>
    %cst_139 = arith.constant dense<0.000000e+00> : vector<16xf32>
    %382 = vector.multi_reduction <add>, %381, %cst_139 [1] : vector<16x16xf32> to vector<16xf32>
    %383 = vector.shape_cast %382 : vector<16xf32> to vector<16x1xf32>
    %384 = tpu.reciprocal %383 {approx = true} : vector<16x1xf32> -> vector<16x1xf32>
    %385 = vector.broadcast %384 : vector<16x1xf32> to vector<16x16xf32>
    %386 = arith.mulf %381, %385 : vector<16x16xf32>
    %387 = vector.extract_strided_slice %370 {offsets = [0, 0], sizes = [16, 16], strides = [1, 1]} : vector<16x64xf32> to vector<16x16xf32>
    %cst_140 = arith.constant dense<0.000000e+00> : vector<16x16xf32>
    %388 = tpu.matmul %386, %387, %cst_140 {dimension_numbers = #tpu.dot_dimension_numbers<[1], [0], [0], [1], [0, 0, 1, 1], [], []>} : vector<16x16xf32>, vector<16x16xf32>, vector<16x16xf32> -> vector<16x16xf32>
    %389 = vector.extract_strided_slice %368 {offsets = [0, 16], sizes = [16, 16], strides = [1, 1]} : vector<16x64xf32> to vector<16x16xf32>
    %390 = vector.extract_strided_slice %369 {offsets = [0, 16], sizes = [16, 16], strides = [1, 1]} : vector<16x64xf32> to vector<16x16xf32>
    %391 = tpu.transpose %390, [1, 0] : vector<16x16xf32> -> vector<16x16xf32>
    %cst_141 = arith.constant dense<0.000000e+00> : vector<16x16xf32>
    %392 = tpu.matmul %389, %391, %cst_141 {dimension_numbers = #tpu.dot_dimension_numbers<[1], [0], [0], [1], [0, 0, 1, 1], [], []>} : vector<16x16xf32>, vector<16x16xf32>, vector<16x16xf32> -> vector<16x16xf32>
    %cst_142 = arith.constant 2.500000e-01 : f32
    %393 = vector.broadcast %cst_142 : f32 to vector<16x16xf32>
    %394 = arith.mulf %392, %393 : vector<16x16xf32>
    %cst_143 = arith.constant dense<0xFF800000> : vector<16xf32>
    %395 = vector.multi_reduction <maximumf>, %394, %cst_143 [1] : vector<16x16xf32> to vector<16xf32>
    %396 = vector.shape_cast %395 : vector<16xf32> to vector<16x1xf32>
    %397 = vector.broadcast %396 : vector<16x1xf32> to vector<16x16xf32>
    %398 = arith.subf %394, %397 : vector<16x16xf32>
    %399 = math.exp %398 : vector<16x16xf32>
    %cst_144 = arith.constant dense<0.000000e+00> : vector<16xf32>
    %400 = vector.multi_reduction <add>, %399, %cst_144 [1] : vector<16x16xf32> to vector<16xf32>
    %401 = vector.shape_cast %400 : vector<16xf32> to vector<16x1xf32>
    %402 = tpu.reciprocal %401 {approx = true} : vector<16x1xf32> -> vector<16x1xf32>
    %403 = vector.broadcast %402 : vector<16x1xf32> to vector<16x16xf32>
    %404 = arith.mulf %399, %403 : vector<16x16xf32>
    %405 = vector.extract_strided_slice %370 {offsets = [0, 16], sizes = [16, 16], strides = [1, 1]} : vector<16x64xf32> to vector<16x16xf32>
    %cst_145 = arith.constant dense<0.000000e+00> : vector<16x16xf32>
    %406 = tpu.matmul %404, %405, %cst_145 {dimension_numbers = #tpu.dot_dimension_numbers<[1], [0], [0], [1], [0, 0, 1, 1], [], []>} : vector<16x16xf32>, vector<16x16xf32>, vector<16x16xf32> -> vector<16x16xf32>
    %407 = vector.extract_strided_slice %368 {offsets = [0, 32], sizes = [16, 16], strides = [1, 1]} : vector<16x64xf32> to vector<16x16xf32>
    %408 = vector.extract_strided_slice %369 {offsets = [0, 32], sizes = [16, 16], strides = [1, 1]} : vector<16x64xf32> to vector<16x16xf32>
    %409 = tpu.transpose %408, [1, 0] : vector<16x16xf32> -> vector<16x16xf32>
    %cst_146 = arith.constant dense<0.000000e+00> : vector<16x16xf32>
    %410 = tpu.matmul %407, %409, %cst_146 {dimension_numbers = #tpu.dot_dimension_numbers<[1], [0], [0], [1], [0, 0, 1, 1], [], []>} : vector<16x16xf32>, vector<16x16xf32>, vector<16x16xf32> -> vector<16x16xf32>
    %cst_147 = arith.constant 2.500000e-01 : f32
    %411 = vector.broadcast %cst_147 : f32 to vector<16x16xf32>
    %412 = arith.mulf %410, %411 : vector<16x16xf32>
    %cst_148 = arith.constant dense<0xFF800000> : vector<16xf32>
    %413 = vector.multi_reduction <maximumf>, %412, %cst_148 [1] : vector<16x16xf32> to vector<16xf32>
    %414 = vector.shape_cast %413 : vector<16xf32> to vector<16x1xf32>
    %415 = vector.broadcast %414 : vector<16x1xf32> to vector<16x16xf32>
    %416 = arith.subf %412, %415 : vector<16x16xf32>
    %417 = math.exp %416 : vector<16x16xf32>
    %cst_149 = arith.constant dense<0.000000e+00> : vector<16xf32>
    %418 = vector.multi_reduction <add>, %417, %cst_149 [1] : vector<16x16xf32> to vector<16xf32>
    %419 = vector.shape_cast %418 : vector<16xf32> to vector<16x1xf32>
    %420 = tpu.reciprocal %419 {approx = true} : vector<16x1xf32> -> vector<16x1xf32>
    %421 = vector.broadcast %420 : vector<16x1xf32> to vector<16x16xf32>
    %422 = arith.mulf %417, %421 : vector<16x16xf32>
    %423 = vector.extract_strided_slice %370 {offsets = [0, 32], sizes = [16, 16], strides = [1, 1]} : vector<16x64xf32> to vector<16x16xf32>
    %cst_150 = arith.constant dense<0.000000e+00> : vector<16x16xf32>
    %424 = tpu.matmul %422, %423, %cst_150 {dimension_numbers = #tpu.dot_dimension_numbers<[1], [0], [0], [1], [0, 0, 1, 1], [], []>} : vector<16x16xf32>, vector<16x16xf32>, vector<16x16xf32> -> vector<16x16xf32>
    %425 = vector.extract_strided_slice %368 {offsets = [0, 48], sizes = [16, 16], strides = [1, 1]} : vector<16x64xf32> to vector<16x16xf32>
    %426 = vector.extract_strided_slice %369 {offsets = [0, 48], sizes = [16, 16], strides = [1, 1]} : vector<16x64xf32> to vector<16x16xf32>
    %427 = tpu.transpose %426, [1, 0] : vector<16x16xf32> -> vector<16x16xf32>
    %cst_151 = arith.constant dense<0.000000e+00> : vector<16x16xf32>
    %428 = tpu.matmul %425, %427, %cst_151 {dimension_numbers = #tpu.dot_dimension_numbers<[1], [0], [0], [1], [0, 0, 1, 1], [], []>} : vector<16x16xf32>, vector<16x16xf32>, vector<16x16xf32> -> vector<16x16xf32>
    %cst_152 = arith.constant 2.500000e-01 : f32
    %429 = vector.broadcast %cst_152 : f32 to vector<16x16xf32>
    %430 = arith.mulf %428, %429 : vector<16x16xf32>
    %cst_153 = arith.constant dense<0xFF800000> : vector<16xf32>
    %431 = vector.multi_reduction <maximumf>, %430, %cst_153 [1] : vector<16x16xf32> to vector<16xf32>
    %432 = vector.shape_cast %431 : vector<16xf32> to vector<16x1xf32>
    %433 = vector.broadcast %432 : vector<16x1xf32> to vector<16x16xf32>
    %434 = arith.subf %430, %433 : vector<16x16xf32>
    %435 = math.exp %434 : vector<16x16xf32>
    %cst_154 = arith.constant dense<0.000000e+00> : vector<16xf32>
    %436 = vector.multi_reduction <add>, %435, %cst_154 [1] : vector<16x16xf32> to vector<16xf32>
    %437 = vector.shape_cast %436 : vector<16xf32> to vector<16x1xf32>
    %438 = tpu.reciprocal %437 {approx = true} : vector<16x1xf32> -> vector<16x1xf32>
    %439 = vector.broadcast %438 : vector<16x1xf32> to vector<16x16xf32>
    %440 = arith.mulf %435, %439 : vector<16x16xf32>
    %441 = vector.extract_strided_slice %370 {offsets = [0, 48], sizes = [16, 16], strides = [1, 1]} : vector<16x64xf32> to vector<16x16xf32>
    %cst_155 = arith.constant dense<0.000000e+00> : vector<16x16xf32>
    %442 = tpu.matmul %440, %441, %cst_155 {dimension_numbers = #tpu.dot_dimension_numbers<[1], [0], [0], [1], [0, 0, 1, 1], [], []>} : vector<16x16xf32>, vector<16x16xf32>, vector<16x16xf32> -> vector<16x16xf32>
    %443 = tpu.concatenate %388, %406, %424, %442 in 1 : vector<16x16xf32>, vector<16x16xf32>, vector<16x16xf32>, vector<16x16xf32> -> vector<16x64xf32>
    %444 = tpu.concatenate %367, %443 in 0 : vector<16x64xf32>, vector<16x64xf32> -> vector<32x64xf32>
    %c1_156 = arith.constant 1 : index
    %c0_157 = arith.constant 0 : index
    %c0_158 = arith.constant 0 : index
    %445 = vector.load %arg8[%c1_156, %c0_157, %c0_158] : memref<2x64x64xf32, #tpu.memory_space<vmem>>, vector<1x64x64xf32>
    %446 = vector.shape_cast %445 : vector<1x64x64xf32> to vector<64x64xf32>
    %cst_159 = arith.constant dense<0.000000e+00> : vector<32x64xf32>
    %447 = tpu.matmul %444, %446, %cst_159 {dimension_numbers = #tpu.dot_dimension_numbers<[1], [0], [0], [1], [0, 0, 1, 1], [], []>} : vector<32x64xf32>, vector<64x64xf32>, vector<32x64xf32> -> vector<32x64xf32>
    %c1_160 = arith.constant 1 : index
    %c0_161 = arith.constant 0 : index
    %c0_162 = arith.constant 0 : index
    %448 = vector.load %arg9[%c1_160, %c0_161, %c0_162] : memref<2x1x64xf32, #tpu.memory_space<vmem>>, vector<1x1x64xf32>
    %449 = vector.shape_cast %448 : vector<1x1x64xf32> to vector<1x64xf32>
    %450 = vector.broadcast %449 : vector<1x64xf32> to vector<32x64xf32>
    %451 = arith.addf %447, %450 : vector<32x64xf32>
    %452 = arith.addf %255, %451 : vector<32x64xf32>
    %c1_163 = arith.constant 1 : index
    %c0_164 = arith.constant 0 : index
    %c0_165 = arith.constant 0 : index
    %453 = vector.load %arg10[%c1_163, %c0_164, %c0_165] : memref<2x1x64xf32, #tpu.memory_space<vmem>>, vector<1x1x64xf32>
    %454 = vector.shape_cast %453 : vector<1x1x64xf32> to vector<1x64xf32>
    %c1_166 = arith.constant 1 : index
    %c0_167 = arith.constant 0 : index
    %c0_168 = arith.constant 0 : index
    %455 = vector.load %arg11[%c1_166, %c0_167, %c0_168] : memref<2x1x64xf32, #tpu.memory_space<vmem>>, vector<1x1x64xf32>
    %456 = vector.shape_cast %455 : vector<1x1x64xf32> to vector<1x64xf32>
    %cst_169 = arith.constant dense<0.000000e+00> : vector<32xf32>
    %457 = vector.multi_reduction <add>, %452, %cst_169 [1] : vector<32x64xf32> to vector<32xf32>
    %458 = vector.shape_cast %457 : vector<32xf32> to vector<32x1xf32>
    %cst_170 = arith.constant 6.400000e+01 : f32
    %459 = vector.broadcast %cst_170 : f32 to vector<32x1xf32>
    %460 = arith.divf %458, %459 : vector<32x1xf32>
    %461 = vector.broadcast %460 : vector<32x1xf32> to vector<32x64xf32>
    %462 = arith.subf %452, %461 : vector<32x64xf32>
    %463 = arith.mulf %462, %462 : vector<32x64xf32>
    %cst_171 = arith.constant dense<0.000000e+00> : vector<32xf32>
    %464 = vector.multi_reduction <add>, %463, %cst_171 [1] : vector<32x64xf32> to vector<32xf32>
    %465 = vector.shape_cast %464 : vector<32xf32> to vector<32x1xf32>
    %cst_172 = arith.constant 6.400000e+01 : f32
    %466 = vector.broadcast %cst_172 : f32 to vector<32x1xf32>
    %467 = arith.divf %465, %466 : vector<32x1xf32>
    %468 = vector.broadcast %460 : vector<32x1xf32> to vector<32x64xf32>
    %469 = arith.subf %452, %468 : vector<32x64xf32>
    %cst_173 = arith.constant 9.99999997E-7 : f32
    %470 = vector.broadcast %cst_173 : f32 to vector<32x1xf32>
    %471 = arith.addf %467, %470 : vector<32x1xf32>
    %472 = math.rsqrt %471 : vector<32x1xf32>
    %473 = vector.broadcast %472 : vector<32x1xf32> to vector<32x64xf32>
    %474 = arith.mulf %469, %473 : vector<32x64xf32>
    %475 = vector.broadcast %454 : vector<1x64xf32> to vector<32x64xf32>
    %476 = arith.mulf %474, %475 : vector<32x64xf32>
    %477 = vector.broadcast %456 : vector<1x64xf32> to vector<32x64xf32>
    %478 = arith.addf %476, %477 : vector<32x64xf32>
    %c1_174 = arith.constant 1 : index
    %c0_175 = arith.constant 0 : index
    %c0_176 = arith.constant 0 : index
    %479 = vector.load %arg12[%c1_174, %c0_175, %c0_176] : memref<2x64x128xf32, #tpu.memory_space<vmem>>, vector<1x64x128xf32>
    %480 = vector.shape_cast %479 : vector<1x64x128xf32> to vector<64x128xf32>
    %cst_177 = arith.constant dense<0.000000e+00> : vector<32x128xf32>
    %481 = tpu.matmul %478, %480, %cst_177 {dimension_numbers = #tpu.dot_dimension_numbers<[1], [0], [0], [1], [0, 0, 1, 1], [], []>} : vector<32x64xf32>, vector<64x128xf32>, vector<32x128xf32> -> vector<32x128xf32>
    %c1_178 = arith.constant 1 : index
    %c0_179 = arith.constant 0 : index
    %c0_180 = arith.constant 0 : index
    %482 = vector.load %arg13[%c1_178, %c0_179, %c0_180] : memref<2x1x128xf32, #tpu.memory_space<vmem>>, vector<1x1x128xf32>
    %483 = vector.shape_cast %482 : vector<1x1x128xf32> to vector<1x128xf32>
    %484 = vector.broadcast %483 : vector<1x128xf32> to vector<32x128xf32>
    %485 = arith.addf %481, %484 : vector<32x128xf32>
    %cst_181 = arith.constant 5.000000e-01 : f32
    %486 = vector.broadcast %cst_181 : f32 to vector<32x128xf32>
    %487 = arith.mulf %486, %485 : vector<32x128xf32>
    %cst_182 = arith.constant 4.471500e-02 : f32
    %488 = vector.broadcast %cst_182 : f32 to vector<32x128xf32>
    %489 = arith.mulf %488, %485 : vector<32x128xf32>
    %490 = arith.mulf %489, %485 : vector<32x128xf32>
    %491 = arith.mulf %490, %485 : vector<32x128xf32>
    %492 = arith.addf %485, %491 : vector<32x128xf32>
    %cst_183 = arith.constant 0.797884583 : f32
    %493 = vector.broadcast %cst_183 : f32 to vector<32x128xf32>
    %494 = arith.mulf %493, %492 : vector<32x128xf32>
    %495 = math.tanh %494 : vector<32x128xf32>
    %cst_184 = arith.constant 1.000000e+00 : f32
    %496 = vector.broadcast %cst_184 : f32 to vector<32x128xf32>
    %497 = arith.addf %496, %495 : vector<32x128xf32>
    %498 = arith.mulf %487, %497 : vector<32x128xf32>
    %c1_185 = arith.constant 1 : index
    %c0_186 = arith.constant 0 : index
    %c0_187 = arith.constant 0 : index
    %499 = vector.load %arg14[%c1_185, %c0_186, %c0_187] : memref<2x128x64xf32, #tpu.memory_space<vmem>>, vector<1x128x64xf32>
    %500 = vector.shape_cast %499 : vector<1x128x64xf32> to vector<128x64xf32>
    %cst_188 = arith.constant dense<0.000000e+00> : vector<32x64xf32>
    %501 = tpu.matmul %498, %500, %cst_188 {dimension_numbers = #tpu.dot_dimension_numbers<[1], [0], [0], [1], [0, 0, 1, 1], [], []>} : vector<32x128xf32>, vector<128x64xf32>, vector<32x64xf32> -> vector<32x64xf32>
    %c1_189 = arith.constant 1 : index
    %c0_190 = arith.constant 0 : index
    %c0_191 = arith.constant 0 : index
    %502 = vector.load %arg15[%c1_189, %c0_190, %c0_191] : memref<2x1x64xf32, #tpu.memory_space<vmem>>, vector<1x1x64xf32>
    %503 = vector.shape_cast %502 : vector<1x1x64xf32> to vector<1x64xf32>
    %504 = vector.broadcast %503 : vector<1x64xf32> to vector<32x64xf32>
    %505 = arith.addf %501, %504 : vector<32x64xf32>
    %506 = arith.addf %452, %505 : vector<32x64xf32>
    %c0_192 = arith.constant 0 : index
    %c0_193 = arith.constant 0 : index
    %507 = vector.load %arg16[%c0_192, %c0_193] : memref<1x64xf32, #tpu.memory_space<vmem>>, vector<1x64xf32>
    %c0_194 = arith.constant 0 : index
    %c0_195 = arith.constant 0 : index
    %508 = vector.load %arg17[%c0_194, %c0_195] : memref<1x64xf32, #tpu.memory_space<vmem>>, vector<1x64xf32>
    %cst_196 = arith.constant dense<0.000000e+00> : vector<32xf32>
    %509 = vector.multi_reduction <add>, %506, %cst_196 [1] : vector<32x64xf32> to vector<32xf32>
    %510 = vector.shape_cast %509 : vector<32xf32> to vector<32x1xf32>
    %cst_197 = arith.constant 6.400000e+01 : f32
    %511 = vector.broadcast %cst_197 : f32 to vector<32x1xf32>
    %512 = arith.divf %510, %511 : vector<32x1xf32>
    %513 = vector.broadcast %512 : vector<32x1xf32> to vector<32x64xf32>
    %514 = arith.subf %506, %513 : vector<32x64xf32>
    %515 = arith.mulf %514, %514 : vector<32x64xf32>
    %cst_198 = arith.constant dense<0.000000e+00> : vector<32xf32>
    %516 = vector.multi_reduction <add>, %515, %cst_198 [1] : vector<32x64xf32> to vector<32xf32>
    %517 = vector.shape_cast %516 : vector<32xf32> to vector<32x1xf32>
    %cst_199 = arith.constant 6.400000e+01 : f32
    %518 = vector.broadcast %cst_199 : f32 to vector<32x1xf32>
    %519 = arith.divf %517, %518 : vector<32x1xf32>
    %520 = vector.broadcast %512 : vector<32x1xf32> to vector<32x64xf32>
    %521 = arith.subf %506, %520 : vector<32x64xf32>
    %cst_200 = arith.constant 9.99999997E-7 : f32
    %522 = vector.broadcast %cst_200 : f32 to vector<32x1xf32>
    %523 = arith.addf %519, %522 : vector<32x1xf32>
    %524 = math.rsqrt %523 : vector<32x1xf32>
    %525 = vector.broadcast %524 : vector<32x1xf32> to vector<32x64xf32>
    %526 = arith.mulf %521, %525 : vector<32x64xf32>
    %527 = vector.broadcast %507 : vector<1x64xf32> to vector<32x64xf32>
    %528 = arith.mulf %526, %527 : vector<32x64xf32>
    %529 = vector.broadcast %508 : vector<1x64xf32> to vector<32x64xf32>
    %530 = arith.addf %528, %529 : vector<32x64xf32>
    %c0_201 = arith.constant 0 : index
    %c0_202 = arith.constant 0 : index
    %531 = vector.load %arg18[%c0_201, %c0_202] : memref<32x64xf32, #tpu.memory_space<vmem>>, vector<32x64xf32>
    tpu.vector_store %arg18[%c0_201, %c0_202], %530 {strides = array<i32>} : memref<32x64xf32, #tpu.memory_space<vmem>>, vector<32x64xf32>,
    return
  }
  func.func @transform_0(%arg0: i32) -> (i32, i32) {
    %c0_i32 = arith.constant 0 : i32
    %c0_i32_0 = arith.constant 0 : i32
    %c0_i32_1 = arith.constant 0 : i32
    return %c0_i32, %c0_i32_0 : i32, i32
  }
  func.func @transform_1(%arg0: i32) -> (i32, i32) {
    %c0_i32 = arith.constant 0 : i32
    %c0_i32_0 = arith.constant 0 : i32
    %c0_i32_1 = arith.constant 0 : i32
    return %c0_i32, %c0_i32_0 : i32, i32
  }
  func.func @transform_2(%arg0: i32) -> (i32, i32) {
    %c0_i32 = arith.constant 0 : i32
    %c0_i32_0 = arith.constant 0 : i32
    %c0_i32_1 = arith.constant 0 : i32
    return %c0_i32, %c0_i32_0 : i32, i32
  }
  func.func @transform_3(%arg0: i32) -> (i32, i32, i32) {
    %c0_i32 = arith.constant 0 : i32
    %c0_i32_0 = arith.constant 0 : i32
    %c0_i32_1 = arith.constant 0 : i32
    %c0_i32_2 = arith.constant 0 : i32
    return %c0_i32, %c0_i32_0, %c0_i32_1 : i32, i32, i32
  }
  func.func @transform_4(%arg0: i32) -> (i32, i32, i32) {
    %c0_i32 = arith.constant 0 : i32
    %c0_i32_0 = arith.constant 0 : i32
    %c0_i32_1 = arith.constant 0 : i32
    %c0_i32_2 = arith.constant 0 : i32
    return %c0_i32, %c0_i32_0, %c0_i32_1 : i32, i32, i32
  }
  func.func @transform_5(%arg0: i32) -> (i32, i32, i32) {
    %c0_i32 = arith.constant 0 : i32
    %c0_i32_0 = arith.constant 0 : i32
    %c0_i32_1 = arith.constant 0 : i32
    %c0_i32_2 = arith.constant 0 : i32
    return %c0_i32, %c0_i32_0, %c0_i32_1 : i32, i32, i32
  }
  func.func @transform_6(%arg0: i32) -> (i32, i32, i32) {
    %c0_i32 = arith.constant 0 : i32
    %c0_i32_0 = arith.constant 0 : i32
    %c0_i32_1 = arith.constant 0 : i32
    %c0_i32_2 = arith.constant 0 : i32
    return %c0_i32, %c0_i32_0, %c0_i32_1 : i32, i32, i32
  }
  func.func @transform_7(%arg0: i32) -> (i32, i32, i32) {
    %c0_i32 = arith.constant 0 : i32
    %c0_i32_0 = arith.constant 0 : i32
    %c0_i32_1 = arith.constant 0 : i32
    %c0_i32_2 = arith.constant 0 : i32
    return %c0_i32, %c0_i32_0, %c0_i32_1 : i32, i32, i32
  }
  func.func @transform_8(%arg0: i32) -> (i32, i32, i32) {
    %c0_i32 = arith.constant 0 : i32
    %c0_i32_0 = arith.constant 0 : i32
    %c0_i32_1 = arith.constant 0 : i32
    %c0_i32_2 = arith.constant 0 : i32
    return %c0_i32, %c0_i32_0, %c0_i32_1 : i32, i32, i32
  }
  func.func @transform_9(%arg0: i32) -> (i32, i32, i32) {
    %c0_i32 = arith.constant 0 : i32
    %c0_i32_0 = arith.constant 0 : i32
    %c0_i32_1 = arith.constant 0 : i32
    %c0_i32_2 = arith.constant 0 : i32
    return %c0_i32, %c0_i32_0, %c0_i32_1 : i32, i32, i32
  }
  func.func @transform_10(%arg0: i32) -> (i32, i32, i32) {
    %c0_i32 = arith.constant 0 : i32
    %c0_i32_0 = arith.constant 0 : i32
    %c0_i32_1 = arith.constant 0 : i32
    %c0_i32_2 = arith.constant 0 : i32
    return %c0_i32, %c0_i32_0, %c0_i32_1 : i32, i32, i32
  }
  func.func @transform_11(%arg0: i32) -> (i32, i32, i32) {
    %c0_i32 = arith.constant 0 : i32
    %c0_i32_0 = arith.constant 0 : i32
    %c0_i32_1 = arith.constant 0 : i32
    %c0_i32_2 = arith.constant 0 : i32
    return %c0_i32, %c0_i32_0, %c0_i32_1 : i32, i32, i32
  }
  func.func @transform_12(%arg0: i32) -> (i32, i32, i32) {
    %c0_i32 = arith.constant 0 : i32
    %c0_i32_0 = arith.constant 0 : i32
    %c0_i32_1 = arith.constant 0 : i32
    %c0_i32_2 = arith.constant 0 : i32
    return %c0_i32, %c0_i32_0, %c0_i32_1 : i32, i32, i32
  }
  func.func @transform_13(%arg0: i32) -> (i32, i32, i32) {
    %c0_i32 = arith.constant 0 : i32
    %c0_i32_0 = arith.constant 0 : i32
    %c0_i32_1 = arith.constant 0 : i32
    %c0_i32_2 = arith.constant 0 : i32
    return %c0_i32, %c0_i32_0, %c0_i32_1 : i32, i32, i32
  }
  func.func @transform_14(%arg0: i32) -> (i32, i32, i32) {
    %c0_i32 = arith.constant 0 : i32
    %c0_i32_0 = arith.constant 0 : i32
    %c0_i32_1 = arith.constant 0 : i32
    %c0_i32_2 = arith.constant 0 : i32
    return %c0_i32, %c0_i32_0, %c0_i32_1 : i32, i32, i32
  }
  func.func @transform_15(%arg0: i32) -> (i32, i32) {
    %c0_i32 = arith.constant 0 : i32
    %c0_i32_0 = arith.constant 0 : i32
    %c0_i32_1 = arith.constant 0 : i32
    return %c0_i32, %c0_i32_0 : i32, i32
  }
  func.func @transform_16(%arg0: i32) -> (i32, i32) {
    %c0_i32 = arith.constant 0 : i32
    %c0_i32_0 = arith.constant 0 : i32
    %c0_i32_1 = arith.constant 0 : i32
    return %c0_i32, %c0_i32_0 : i32, i32
  }
  func.func @transform_17(%arg0: i32) -> (i32, i32) {
    %c0_i32 = arith.constant 0 : i32
    %c0_i32_0 = arith.constant 0 : i32
    %c0_i32_1 = arith.constant 0 : i32
    return %c0_i32, %c0_i32_0 : i32, i32
  }
}

</mosaic_0001>

<bundles_post_ra>
// kernel: siglip_vision_forward.1
= control target key start
LH: loop header
LB: loop body
LE: loop exit
PB: predicated region body
PF: predicated region fallthrough
CT: control target
= control target key end

     0   :  { %s7757_s0 = inlined_call_operand.vmem [shape: f32[32,192], index: 0, kind: input, shape index: {}]   ;;  %s7758_s1 = inlined_call_operand.vmem [shape: f32[192,64], index: 1, kind: input, shape index: {}]   ;;  %s7759_s2 = inlined_call_operand.vmem [shape: f32[32,64], index: 2, kind: input, shape index: {}]   ;;  %s7760_s3 = inlined_call_operand.vmem [shape: f32[2,1,64], index: 3, kind: input, shape index: {}]   ;;  %s7761_s4 = inlined_call_operand.vmem [shape: f32[2,1,64], index: 4, kind: input, shape index: {}]   ;;  %s7762_s5 = inlined_call_operand.vmem [shape: f32[2,64,192], index: 5, kind: input, shape index: {}]   ;;  %s7763_s6 = inlined_call_operand.vmem [shape: f32[2,1,192], index: 6, kind: input, shape index: {}]   ;;  %s7764_s7 = inlined_call_operand.vmem [shape: f32[2,64,64], index: 7, kind: input, shape index: {}]   ;;  %s7765_s8 = inlined_call_operand.vmem [shape: f32[2,1,64], index: 8, kind: input, shape index: {}]   ;;  %s7766_s9 = inlined_call_operand.vmem [shape: f32[2,1,64], index: 9, kind: input, shape index: {}]   ;;  %s7767_s10 = inlined_call_operand.vmem [shape: f32[2,1,64], index: 10, kind: input, shape index: {}]   ;;  %s7768_s11 = inlined_call_operand.vmem [shape: f32[2,64,128], index: 11, kind: input, shape index: {}]   ;;  %s7769_s12 = inlined_call_operand.vmem [shape: f32[2,1,128], index: 12, kind: input, shape index: {}]   ;;  %s7770_s13 = inlined_call_operand.vmem [shape: f32[2,128,64], index: 13, kind: input, shape index: {}]   ;;  %s7771_s14 = inlined_call_operand.vmem [shape: f32[2,1,64], index: 14, kind: input, shape index: {}]   ;;  %s7772_s15 = inlined_call_operand.vmem [shape: f32[1,64], index: 15, kind: input, shape index: {}]   ;;  %s7773_s16 = inlined_call_operand.vmem [shape: f32[1,64], index: 16, kind: input, shape index: {}]   ;;  %s7774_s17 = inlined_call_operand.hbm [shape: f32[32,64], index: 17, kind: output, shape index: {}]  }
   0x1   :  { %7779 = sst [smem:[#allocation5_spill]] %s7757_s0 }
   0x2   :  { %7780 = sst [smem:[#allocation6_spill]] %s7758_s1 }
   0x3   :  { %s7781_s26 = sld [smem:[#allocation6_spill]]  ;;  %v6451_v3 = vmov 0.0|0.0   ;;  %vm93_vm0 = vcmask 523264   ;;  %s7782_s29 = sld [smem:[#allocation5_spill]] }
   0x4   :  { %5735 = vmatprep.subr.bf16.mxu0 %v6451_v3 }
   0x9   :  { %v65_v0 = vld [vmem:[%s7781_s26] sm:$0xff]  ;;  %v66_v1 = vld [vmem:[%s7781_s26 + $0x8] sm:$0xff]  ;;  %v67_v2 = vld [vmem:[%s7781_s26 + $0x10] sm:$0xff] }
   0xa   :  { %v5736_v4 = vpack.c.bf16 %v66_v1, %v65_v0  ;;  %v68_v5 = vld [vmem:[%s7781_s26 + $0x18] sm:$0xff]  ;;  %v69_v7 = vld [vmem:[%s7781_s26 + $0x20] sm:$0xff]  ;;  %v70_v8 = vld [vmem:[%s7781_s26 + $0x28] sm:$0xff] }
   0xb   :  { %v5739_v6 = vpack.c.bf16 %v68_v5, %v67_v2  ;;  %v5742_v9 = vpack.c.bf16 %v70_v8, %v69_v7  ;;  %v71_v10 = vld [vmem:[%s7781_s26 + $0x30] sm:$0xff]  ;;  %v72_v11 = vld [vmem:[%s7781_s26 + $0x38] sm:$0xff]  ;;  %v58_v12 = vld [vmem:[%s7782_s29 + $0x8] sm:$0xff] }
   0xc   :  { %5737 = vmatpush1.bf16.msra.mxu0 %v5736_v4  ;;  %4935 = vmatprep.mubr.msk.f32.mxu0 %vm93_vm0, %v58_v12  ;;  %v5745_v13 = vpack.c.bf16 %v72_v11, %v71_v10 }
   0xd   :  { %5738 = vmatprep.subr.bf16.mxu0 %v6451_v3 }
  0x10   :  { %5740 = vmatpush1.bf16.msra.mxu0 %v5739_v6 }
  0x11   :  { %5741 = vmatprep.subr.bf16.mxu0 %v6451_v3 }
  0x14   :  { %5743 = vmatpush1.bf16.msra.mxu0 %v5742_v9 }
  0x15   :  { %22 = vsyncpa [#allocation3], 0  ;;  %5744 = vmatprep.subr.bf16.mxu0 %v6451_v3  ;;  %v73_v14 = vld [vmem:[%s7781_s26 + $0x40] sm:$0xff]  ;;  %v74_v15 = vld [vmem:[%s7781_s26 + $0x48] sm:$0xff]  ;;  %vm401_vm1 = vcmask 130048   ;;  %s6453_s1 = smov 64  }
  0x16   :  { %v5748_v16 = vpack.c.bf16 %v74_v15, %v73_v14  ;;  %v75_v17 = vld [vmem:[%s7781_s26 + $0x50] sm:$0xff]  ;;  %v76_v18 = vld [vmem:[%s7781_s26 + $0x58] sm:$0xff]  ;;  %v77_v20 = vld [vmem:[%s7781_s26 + $0x60] sm:$0xff]  ;;  %s6454_s20 = smov 112   ;;  %s6455_s21 = smov 48   ;;  %vm1224_vm3 = vcmask 261120  }
  0x17   :  { %v5751_v19 = vpack.c.bf16 %v76_v18, %v75_v17  ;;  %v78_v21 = vld [vmem:[%s7781_s26 + $0x68] sm:$0xff]  ;;  %v79_v23 = vld [vmem:[%s7781_s26 + $0x70] sm:$0xff]  ;;  %v80_v24 = vld [vmem:[%s7781_s26 + $0x78] sm:$0xff]  ;;  %s6456_s22 = smov 32   ;;  %s6457_s23 = smov 16   ;;  %vm1227_vm4 = vcmask 392192  }
  0x18   :  { %5746 = vmatpush1.bf16.msra.mxu0 %v5745_v13  ;;  %v5754_v22 = vpack.c.bf16 %v78_v21, %v77_v20  ;;  %v5757_v25 = vpack.c.bf16 %v80_v24, %v79_v23  ;;  %v81_v26 = vld [vmem:[%s7781_s26 + $0x80] sm:$0xff]  ;;  %v82_v27 = vld [vmem:[%s7781_s26 + $0x88] sm:$0xff]  ;;  %v83_v29 = vld [vmem:[%s7781_s26 + $0x90] sm:$0xff]  ;;  %s6458_s24 = smov 96  }
  0x19   :  { %5747 = vmatprep.subr.bf16.mxu0 %v6451_v3  ;;  %v5760_v28 = vpack.c.bf16 %v82_v27, %v81_v26  ;;  %v84_v30 = vld [vmem:[%s7781_s26 + $0x98] sm:$0xff]  ;;  %v85_v32 = vld [vmem:[%s7781_s26 + $0xa0] sm:$0xff]  ;;  %v86_v33 = vld [vmem:[%s7781_s26 + $0xa8] sm:$0xff] }
  0x1a   :  { %v5763_v31 = vpack.c.bf16 %v84_v30, %v83_v29  ;;  %v5766_v34 = vpack.c.bf16 %v86_v33, %v85_v32  ;;  %v87_v35 = vld [vmem:[%s7781_s26 + $0xb0] sm:$0xff]  ;;  %v88_v36 = vld [vmem:[%s7781_s26 + $0xb8] sm:$0xff]  ;;  %v57_v38 = vld [vmem:[%s7782_s29] sm:$0xff] }
  0x1b   :  { %v5769_v37 = vpack.c.bf16 %v88_v36, %v87_v35  ;;  %v60_v39 = vld [vmem:[%s7782_s29 + $0x18] sm:$0xff]  ;;  %v59_v40 = vld [vmem:[%s7782_s29 + $0x10] sm:$0xff]  ;;  %v62_v41 = vld [vmem:[%s7782_s29 + $0x28] sm:$0xff] }
  0x1c   :  { %5749 = vmatpush1.bf16.msra.mxu0 %v5748_v16  ;;  %v61_v42 = vld [vmem:[%s7782_s29 + $0x20] sm:$0xff]  ;;  %v64_v43 = vld [vmem:[%s7782_s29 + $0x38] sm:$0xff]  ;;  %v63_v44 = vld [vmem:[%s7782_s29 + $0x30] sm:$0xff]  ;;  %s7777_s29 = smov 80  }
  0x1d   :  { %5750 = vmatprep.subr.bf16.mxu0 %v6451_v3  ;;  %v89_v45 = vld [vmem:[%s7759_s2] sm:$0xff]  ;;  %v90_v49 = vld [vmem:[%s7759_s2 + $0x8] sm:$0xff]  ;;  %v91_v54 = vld [vmem:[%s7759_s2 + $0x10] sm:$0xff] }
  0x1e   :  { %v92_v4 = vld [vmem:[%s7759_s2 + $0x18] sm:$0xff]  ;;  %v267_v16 = vld [vmem:[%s7762_s5 + $0x8] sm:$0xff]  ;;  %v268_v20 = vld [vmem:[%s7762_s5 + $0x10] sm:$0xff] }
  0x1f   :  { %v269_v17 = vld [vmem:[%s7762_s5 + $0x18] sm:$0xff]  ;;  %v272_v26 = vld [vmem:[%s7762_s5 + $0x30] sm:$0xff]  ;;  %v274_v30 = vld [vmem:[%s7762_s5 + $0x40] sm:$0xff] }
  0x20   :  { %5752 = vmatpush1.bf16.msra.mxu0 %v5751_v19  ;;  %v5771_v18 = vpack.c.bf16 %v269_v17, %v267_v16  ;;  %v266_v19 = vld [vmem:[%s7762_s5] sm:$0xff]  ;;  %v273_v23 = vld [vmem:[%s7762_s5 + $0x38] sm:$0xff]  ;;  %v276_v32 = vld [vmem:[%s7762_s5 + $0x50] sm:$0xff] }
  0x21   :  { %5753 = vmatprep.subr.bf16.mxu0 %v6451_v3  ;;  %v5773_v21 = vpack.c.bf16 %v268_v20, %v266_v19  ;;  %v277_v29 = vld [vmem:[%s7762_s5 + $0x58] sm:$0xff]  ;;  %v5781_v33 = vpack.c.bf16 %v276_v32, %v274_v30  ;;  %v282_v19 = vld [vmem:[%s7763_s6] sm:$0x3]  ;;  %vm6803_vm2 = vmpackc.low %vm401_vm1, %vm401_vm1 }
  0x22   :  { %5772 = vmatprep.subr.bf16.mxu1 %v5771_v18  ;;  %v281_v35 = vld [vmem:[%s7762_s5 + $0x78] sm:$0xff] }
  0x23   :  { %5774 = vmatpush1.bf16.msra.mxu1 %v5773_v21 }
  0x24   :  { %5755 = vmatpush1.bf16.msra.mxu0 %v5754_v22  ;;  %v271_v22 = vld [vmem:[%s7762_s5 + $0x28] sm:$0xff] }
  0x25   :  { %5756 = vmatprep.subr.bf16.mxu0 %v6451_v3  ;;  %v5775_v24 = vpack.c.bf16 %v273_v23, %v271_v22 }
  0x27   :  { %5776 = vmatprep.subr.bf16.mxu1 %v5775_v24 }
  0x28   :  { %5758 = vmatpush1.bf16.msra.mxu0 %v5757_v25  ;;  %v270_v25 = vld [vmem:[%s7762_s5 + $0x20] sm:$0xff] }
  0x29   :  { %5759 = vmatprep.subr.bf16.mxu0 %v6451_v3  ;;  %v5777_v27 = vpack.c.bf16 %v272_v26, %v270_v25 }
  0x2b   :  { %5778 = vmatpush1.bf16.msra.mxu1 %v5777_v27 }
  0x2c   :  { %5761 = vmatpush1.bf16.msra.mxu0 %v5760_v28  ;;  %v275_v28 = vld [vmem:[%s7762_s5 + $0x48] sm:$0xff] }
  0x2d   :  { %5762 = vmatprep.subr.bf16.mxu0 %v6451_v3 }
  0x30   :  { %5764 = vmatpush1.bf16.msra.mxu0 %v5763_v31  ;;  %v5779_v31 = vpack.c.bf16 %v277_v29, %v275_v28 }
  0x31   :  { %5765 = vmatprep.subr.bf16.mxu0 %v6451_v3 }
  0x32   :  { %5780 = vmatprep.subr.bf16.mxu1 %v5779_v31 }
  0x33   :  { %5782 = vmatpush1.bf16.msra.mxu1 %v5781_v33 }
  0x34   :  { %5767 = vmatpush1.bf16.msra.mxu0 %v5766_v34  ;;  %v279_v34 = vld [vmem:[%s7762_s5 + $0x68] sm:$0xff] }
  0x35   :  { %5768 = vmatprep.subr.bf16.mxu0 %v6451_v3  ;;  %v5783_v36 = vpack.c.bf16 %v281_v35, %v279_v34 }
  0x37   :  { %5784 = vmatprep.subr.bf16.mxu1 %v5783_v36 }
  0x38   :  { %5770 = vmatpush1.bf16.msra.mxu0 %v5769_v37  ;;  %v278_v37 = vld [vmem:[%s7762_s5 + $0x60] sm:$0xff] }
  0x3b   :  { %171 = vmatmul.mubr.f32.vlgmr.msra.gmra.mrb[0].mxu0 %v57_v38  ;;  %v280_v38 = vld [vmem:[%s7762_s5 + $0x70] sm:$0xff] }
  0x3c   :  { %4936 = vmatprep.mubr.msk.f32.mxu0 %vm93_vm0, %v60_v39  ;;  %v5785_v39 = vpack.c.bf16 %v280_v38, %v278_v37 }
  0x3e   :  { %5786 = vmatpush1.bf16.msra.mxu1 %v5785_v39 }
  0x3f   :  { %176 = vmatmul.mubr.f32.gmra.mrb[2].mxu0 %v59_v40  ;;  %v6452_v40 = vmov 0.0  }
  0x40   :  { %4937 = vmatprep.mubr.msk.f32.mxu0 %vm93_vm0, %v62_v41  ;;  %370 = vmatprep.mubr.f32.mxu1 %v6452_v40 }
  0x43   :  { %181 = vmatmul.mubr.f32.gmra.mrb[4].mxu0 %v61_v42 }
  0x44   :  { %4938 = vmatprep.mubr.msk.f32.mxu0 %vm93_vm0, %v64_v43 }
  0x47   :  { %186 = vmatmul.mubr.f32.gmra.mrb[6].mxu0 %v63_v44 }
 0x10e   :  { %v172_v46 = vpop.f32.mrb[0].mxu0 }
 0x10f   :  { %v6656_v47 = vadd.f32 %v172_v46, %v89_v45  ;;  %v174_v48 = vpop.f32.mrb[1].mxu0 }
 0x111   :  { %v193_v50 = vsel %vm93_vm0, %v6656_v47, 0.0 }
 0x112   :  { %v177_v51 = vpop.f32.mrb[2].mxu0  ;;  %194 = vadd.xlane.f32.xlu0 %v193_v50 }
 0x113   :  { %v6663_v52 = vadd.f32 %v177_v51, %v90_v49  ;;  %v179_v53 = vpop.f32.mrb[3].mxu0 }
 0x115   :  { %v196_v55 = vsel %vm93_vm0, %v6663_v52, 0.0 }
 0x116   :  { %197 = vadd.xlane.f32.xlu0 %v196_v55  ;;  %v182_v56 = vpop.f32.mrb[4].mxu0 }
 0x117   :  { %v6670_v57 = vadd.f32 %v182_v56, %v91_v54  ;;  %v184_v58 = vpop.f32.mrb[5].mxu0 }
 0x119   :  { %v199_v59 = vsel %vm93_vm0, %v6670_v57, 0.0 }
 0x11a   :  { %200 = vadd.xlane.f32.xlu0 %v199_v59  ;;  %v187_v60 = vpop.f32.mrb[6].mxu0  ;;  %v4939_v59 = vld [vmem:[%s7760_s3] ss:$0 sm:$0xff] }
 0x11b   :  { %v189_v61 = vpop.f32.mrb[7].mxu0  ;;  %v6686_v8 = vadd.f32 %v187_v60, %v92_v4 }
 0x11c   :  { %v4940_v61 = vld [vmem:[%s7761_s4] ss:$0 sm:$0xff] }
 0x11d   :  { %v202_v13 = vsel %vm93_vm0, %v6686_v8, 0.0 }
 0x19f   :  { %v195_v62 = vpop.xlane.xlu0 %194 }
 0x1a0   :  { %v206_v63 = vmul.f32 0.015625, %v195_v62 }
 0x1a2   :  { %v6675_v0 = vsub.f32 %v6656_v47, %v206_v63 }
 0x1a3   :  { %v198_v1 = vpop.xlane.xlu0 %197 }
 0x1a4   :  { %v207_v2 = vmul.f32 0.015625, %v198_v1  ;;  %v214_v3 = vmul.f32 %v6675_v0, %v6675_v0 }
 0x1a6   :  { %v6683_v5 = vsub.f32 %v6663_v52, %v207_v2  ;;  %v218_v6 = vsel %vm93_vm0, %v214_v3, 0.0 }
 0x1a7   :  { %219 = vadd.xlane.f32.xlu1 %v218_v6  ;;  %v201_v7 = vpop.xlane.xlu0 %200 }
 0x1a8   :  { %v215_v9 = vmul.f32 %v6683_v5, %v6683_v5  ;;  %v208_v10 = vmul.f32 0.015625, %v201_v7 }
 0x1aa   :  { %v221_v11 = vsel %vm93_vm0, %v215_v9, 0.0  ;;  %v6692_v12 = vsub.f32 %v6670_v57, %v208_v10 }
 0x1ab   :  { %222 = vadd.xlane.f32.xlu1 %v221_v11 }
 0x1ac   :  { %v216_v14 = vmul.f32 %v6692_v12, %v6692_v12 }
 0x1ae   :  { %v224_v15 = vsel %vm93_vm0, %v216_v14, 0.0 }
 0x1af   :  { %203 = vadd.xlane.f32.xlu1 %v202_v13  ;;  %225 = vadd.xlane.f32.xlu0 %v224_v15 }
 0x234   :  { %v220_v41 = vpop.xlane.xlu1 %219 }
 0x235   :  { %v230_v42 = vmul.f32 0.015625, %v220_v41 }
 0x237   :  { %v234_v43 = vadd.f32 1e-06, %v230_v42 }
 0x238   :  { %v223_v44 = vpop.xlane.xlu1 %222 }
 0x239   :  { %6243 = vrsqrt.f32 %v234_v43  ;;  %v231_v45 = vmul.f32 0.015625, %v223_v44 }
 0x23b   :  { %v235_v46 = vadd.f32 1e-06, %v231_v45 }
 0x23c   :  { %v204_v48 = vpop.xlane.xlu1 %203  ;;  %v226_v49 = vpop.xlane.xlu0 %225 }
 0x23d   :  { %6245 = vrsqrt.f32 %v235_v46  ;;  %v209_v50 = vmul.f32 0.015625, %v204_v48  ;;  %v232_v51 = vmul.f32 0.015625, %v226_v49 }
 0x23f   :  { %v213_v53 = vsub.f32 %v6686_v8, %v209_v50  ;;  %v236_v54 = vadd.f32 1e-06, %v232_v51 }
 0x241   :  { %v217_v55 = vmul.f32 %v213_v53, %v213_v53  ;;  %6247 = vrsqrt.f32 %v236_v54 }
 0x243   :  { %v6244_v56 = vpop.eup %6243  ;;  %v227_v58 = vsel %vm93_vm0, %v217_v55, 0.0 }
 0x244   :  { %228 = vadd.xlane.f32.xlu1 %v227_v58  ;;  %v242_v60 = vmul.f32 %v6244_v56, %v6675_v0 }
 0x246   :  { %v252_v62 = vmul.f32 %v4939_v59, %v242_v60 }
 0x247   :  { %v6246_v63 = vpop.eup %6245 }
 0x248   :  { %v262_v1 = vadd.f32 %v4940_v61, %v252_v62  ;;  %v243_v2 = vmul.f32 %v6246_v63, %v6683_v5 }
 0x24a   :  { %4941 = vmatmul.mubr.msk.f32.vlgmr.msra.gmra.mrb[0].mxu1 %vm93_vm0, %v262_v1  ;;  %v253_v3 = vmul.f32 %v4939_v59, %v243_v2 }
 0x24b   :  { %v6248_v4 = vpop.eup %6247  ;;  %376 = vmatprep.mubr.f32.mxu1 %v6452_v40 }
 0x24c   :  { %v263_v6 = vadd.f32 %v4940_v61, %v253_v3  ;;  %v244_v7 = vmul.f32 %v6248_v4, %v6692_v12  ;;  %v284_v12 = vlaneseq }
 0x24e   :  { %4942 = vmatmul.mubr.msk.f32.gmra.mrb[2].mxu1 %vm93_vm0, %v263_v6  ;;  %v254_v0 = vmul.f32 %v4939_v59, %v244_v7  ;;  %v6766_v17 = vshrl.u32 %v284_v12, 7 }
 0x24f   :  { %382 = vmatprep.mubr.f32.mxu1 %v6452_v40 }
 0x250   :  { %v264_v9 = vadd.f32 %v4940_v61, %v254_v0  ;;  %v286_v18 = vsub.s32 0, %v6766_v17  ;;  %v290_v21 = vsub.s32 1, %v6766_v17 }
 0x252   :  { %4943 = vmatmul.mubr.msk.f32.gmra.mrb[4].mxu1 %vm93_vm0, %v264_v9  ;;  %v6774_v20 = vrot.slane %v282_v19, %v286_v18  ;;  %v291_v25 = vrot.slane %v282_v19, %v290_v21 }
 0x253   :  { %388 = vmatprep.mubr.f32.mxu1 %v6452_v40 }
 0x2d1   :  { %v229_v5 = vpop.xlane.xlu1 %228 }
 0x2d2   :  { %v233_v10 = vmul.f32 0.015625, %v229_v5 }
 0x2d4   :  { %v237_v11 = vadd.f32 1e-06, %v233_v10 }
 0x2d6   :  { %6249 = vrsqrt.f32 %v237_v11 }
 0x2e0   :  { %v6250_v13 = vpop.eup %6249 }
 0x2e1   :  { %v245_v14 = vmul.f32 %v6250_v13, %v213_v53 }
 0x2e3   :  { %v255_v15 = vmul.f32 %v4939_v59, %v245_v14 }
 0x2e5   :  { %v265_v16 = vadd.f32 %v4940_v61, %v255_v15 }
 0x2e7   :  { %4944 = vmatmul.mubr.msk.f32.gmra.mrb[6].mxu1 %vm93_vm0, %v265_v16 }
 0x31d   :  { %v372_v22 = vpop.f32.mrb[0].mxu1 }
 0x31e   :  { %v6778_v23 = vadd.f32 %v372_v22, %v6774_v20  ;;  %v374_v24 = vpop.f32.mrb[1].mxu1 }
 0x31f   :  { %v375_v29 = vadd.f32 %v374_v24, %v291_v25 }
 0x320   :  { %5351 = vmatprep.mubr.msk.f32.mxu1 %vm401_vm1, %v6778_v23 }
 0x321   :  { %v378_v26 = vpop.f32.mrb[2].mxu1 }
 0x322   :  { %v6785_v27 = vadd.f32 %v378_v26, %v6774_v20  ;;  %v380_v28 = vpop.f32.mrb[3].mxu1 }
 0x323   :  { %v381_v30 = vadd.f32 %v380_v28, %v291_v25 }
 0x324   :  { %v6789_v31 = vpack.i.bf16 %v6785_v27, %v6778_v23 }
 0x325   :  { %v6791_v32 = vpop.f32.mrb[4].mxu1  ;;  %v5793_v33 = vpack.c.bf16 %v381_v30, %v375_v29  ;;  %v6793_v34 = vpack.i.bf16 %v381_v30, %v375_v29 }
 0x326   :  { %6104 = vrot.lane.b32.xlu0 %v6789_v31, %s6453_s1  ;;  %v386_v35 = vpop.f32.mrb[5].mxu1 }
 0x327   :  { %v387_v44 = vadd.f32 %v386_v35, %v291_v25 }
 0x32a   :  { %590 = vrot.lane.b32.xlu0 %v6778_v23, %s6454_s20 }
 0x32e   :  { %592 = vrot.lane.b32.xlu0 %v6785_v27, %s6454_s20 }
 0x398   :  { %v6105_v36 = vpop.permute.xlu0 %6104 }
 0x399   :  { %v6107_v37 = vunpack.i.h.bf16 %v6105_v36  ;;  %v6106_v38 = vunpack.i.l.bf16 %v6105_v36 }
 0x39b   :  { %v5787_v41 = vpack.c.bf16 %v6107_v37, %v6106_v38 }
 0x39c   :  { %v591_v15 = vpop.permute.xlu0 %590 }
 0x39d   :  { %5789 = vmatprep.subr.msk.bf16.mxu1 %vm6803_vm2, %v5787_v41 }
 0x39e   :  { %5792 = vmatpush3.bf16.xpose.msk.msra.mxu1 %vm6803_vm2, %v5787_v41 }
 0x39f   :  { %5794 = vmatprep.subr.bf16.mxu1 %v5793_v33 }
 0x3a0   :  { %v593_v16 = vpop.permute.xlu0 %592 }
 0x3a5   :  { %5352 = vmatmul.mubr.msk.f32.vlgmr.msra.gmra.mrb[8].mxu1 %vm401_vm1, %v6785_v27 }
 0x3a6   :  { %5796 = vmatpush3.bf16.msra.mxu1 %v5793_v33 }
 0x3ba   :  { %v6813_v42 = vpop.f32.mrb[6].mxu1 }
 0x3bb   :  { %v392_v43 = vpop.f32.mrb[7].mxu1 }
 0x3bc   :  { %v393_v45 = vadd.f32 %v392_v43, %v291_v25 }
 0x3be   :  { %v6815_v46 = vpack.c.bf16 %v393_v45, %v387_v44  ;;  %v6817_v48 = vpack.i.bf16 %v393_v45, %v387_v44 }
 0x478   :  { %v5353_v49 = vpop.f32.mrb[8].mxu1 }
 0x479   :  { %v476_v50 = vpop.f32.mrb[9].mxu1  ;;  %v486_v53 = vmul.f32 0.25, %v5353_v49 }
 0x47a   :  { %v485_v51 = vmul.f32 0.25, %v476_v50 }
 0x47b   :  { %v490_v55 = vsel %vm401_vm1, %v486_v53, -inf }
 0x47c   :  { %v487_v54 = vsel %vm401_vm1, %v485_v51, -inf }
 0x47d   :  { %488 = vmax.xlane.f32.xlu1 %v487_v54  ;;  %v6857_v54 = vadd.f32 %v6791_v32, %v6774_v20 }
 0x481   :  { %491 = vmax.xlane.f32.xlu1 %v490_v55 }
 0x50a   :  { %v489_v56 = vpop.xlane.xlu1 %488 }
 0x50b   :  { %v493_v58 = vsub.f32 %v485_v51, %v489_v56 }
 0x50d   :  { %v495_v61 = vmul.f32 1.442695, %v493_v58  ;;  %v6867_v58 = vadd.f32 %v6813_v42, %v6774_v20 }
 0x50e   :  { %v492_v59 = vpop.xlane.xlu1 %491 }
 0x50f   :  { %v494_v60 = vsub.f32 %v486_v53, %v492_v59  ;;  %v6873_v32 = vpack.i.bf16 %v6867_v58, %v6857_v54 }
 0x511   :  { %v497_v62 = vmul.f32 1.442695, %v494_v60 }
 0x513   :  { %6251 = vpow2.f32 %v497_v62 }
 0x514   :  { %6253 = vpow2.f32 %v495_v61 }
 0x51d   :  { %v6252_v63 = vpop.eup %6251 }
 0x51e   :  { %v502_v1 = vsel %vm401_vm1, %v6252_v63, 0.0  ;;  %v6254_v2 = vpop.eup %6253 }
 0x51f   :  { %503 = vadd.xlane.f32.xlu1 %v502_v1  ;;  %v499_v3 = vsel %vm401_vm1, %v6254_v2, 0.0 }
 0x523   :  { %500 = vadd.xlane.f32.xlu1 %v499_v3 }
 0x534   :  { %6109 = vrot.lane.b32.xlu1 %v6789_v31, %s6455_s21 }
 0x5ac   :  { %v504_v4 = vpop.xlane.xlu1 %503 }
 0x5ad   :  { %6255 = vrcp.f32 %v504_v4 }
 0x5b0   :  { %v501_v6 = vpop.xlane.xlu1 %500 }
 0x5b1   :  { %6257 = vrcp.f32 %v501_v6 }
 0x5b4   :  { %v6110_v7 = vpop.permute.xlu1 %6109 }
 0x5b5   :  { %v6112_v0 = vunpack.i.h.bf16 %v6110_v7  ;;  %v6111_v9 = vunpack.i.l.bf16 %v6110_v7 }
 0x5b7   :  { %v5797_v5 = vpack.c.bf16 %v6112_v0, %v6111_v9  ;;  %v6256_v10 = vpop.eup %6255 }
 0x5b8   :  { %v508_v14 = vmul.f32 %v6256_v10, %v6252_v63 }
 0x5b9   :  { %5799 = vmatprep.subr.msk.bf16.mxu1 %vm6803_vm2, %v5797_v5 }
 0x5bb   :  { %v6258_v11 = vpop.eup %6257 }
 0x5bc   :  { %v507_v13 = vmul.f32 %v6258_v11, %v6254_v2 }
 0x5be   :  { %5358 = vmatprep.mubr.msk.f32.mxu1 %vm401_vm1, %v507_v13 }
 0x5bf   :  { %5359 = vmatmul.mubr.msk.f32.vlgmr.msra.gmra.mrb[10].mxu1 %vm401_vm1, %v508_v14 }
 0x5c0   :  { %5802 = vmatpush3.bf16.xpose.msk.msra.mxu1 %vm6803_vm2, %v5797_v5  ;;  %5365 = vmatprep.mubr.msk.f32.mxu1 %vm401_vm1, %v591_v15 }
 0x5c7   :  { %5366 = vmatmul.mubr.msk.f32.vlgmr.msra.gmra.mrb[12].mxu1 %vm401_vm1, %v593_v16 }
 0x692   :  { %v6833_v12 = vpop.f32.mrb[10].mxu1 }
 0x693   :  { %v6835_v19 = vpop.f32.mrb[11].mxu1 }
 0x69a   :  { %v5367_v22 = vpop.f32.mrb[12].mxu1 }
 0x69b   :  { %v682_v24 = vmul.f32 0.25, %v5367_v22  ;;  %v672_v25 = vpop.f32.mrb[13].mxu1 }
 0x69c   :  { %v681_v26 = vmul.f32 0.25, %v672_v25 }
 0x69d   :  { %v686_v28 = vsel %vm401_vm1, %v682_v24, -inf }
 0x69e   :  { %687 = vmax.xlane.f32.xlu1 %v686_v28  ;;  %v683_v29 = vsel %vm401_vm1, %v681_v26, -inf }
 0x69f   :  { %684 = vmax.xlane.f32.xlu0 %v683_v29 }
 0x6af   :  { %6119 = vrot.lane.b32.xlu1 %v6789_v31, %s6456_s22 }
 0x6b3   :  { %6124 = vrot.lane.b32.xlu1 %v6789_v31, %s6457_s23 }
 0x6b7   :  { %794 = vrot.lane.b32.xlu1 %v6778_v23, %s6458_s24 }
 0x6bb   :  { %996 = vrot.lane.b32.xlu1 %v6778_v23, %s7777_s29 }
 0x6bf   :  { %998 = vrot.lane.b32.xlu1 %v6785_v27, %s7777_s29 }
 0x72b   :  { %v688_v30 = vpop.xlane.xlu1 %687 }
 0x72c   :  { %v690_v33 = vsub.f32 %v682_v24, %v688_v30  ;;  %v685_v35 = vpop.xlane.xlu0 %684 }
 0x72d   :  { %v689_v36 = vsub.f32 %v681_v26, %v685_v35 }
 0x72e   :  { %v693_v37 = vmul.f32 1.442695, %v690_v33 }
 0x72f   :  { %v691_v38 = vmul.f32 1.442695, %v689_v36  ;;  %v6120_v41 = vpop.permute.xlu1 %6119 }
 0x730   :  { %6259 = vpow2.f32 %v693_v37  ;;  %v6122_v62 = vunpack.i.h.bf16 %v6120_v41  ;;  %v6121_v63 = vunpack.i.l.bf16 %v6120_v41 }
 0x731   :  { %6261 = vpow2.f32 %v691_v38 }
 0x732   :  { %v5807_v3 = vpack.c.bf16 %v6122_v62, %v6121_v63 }
 0x733   :  { %v6125_v31 = vpop.permute.xlu1 %6124 }
 0x734   :  { %v6127_v43 = vunpack.i.h.bf16 %v6125_v31  ;;  %v6126_v44 = vunpack.i.l.bf16 %v6125_v31 }
 0x736   :  { %v5817_v45 = vpack.c.bf16 %v6127_v43, %v6126_v44 }
 0x737   :  { %v795_v49 = vpop.permute.xlu1 %794 }
 0x738   :  { %5819 = vmatprep.subr.msk.bf16.mxu0 %vm6803_vm2, %v5817_v45 }
 0x739   :  { %5822 = vmatpush3.bf16.xpose.msk.msra.mxu0 %vm6803_vm2, %v5817_v45 }
 0x73a   :  { %v6260_v23 = vpop.eup %6259 }
 0x73b   :  { %v997_v50 = vpop.permute.xlu1 %996  ;;  %v698_v51 = vsel %vm401_vm1, %v6260_v23, 0.0  ;;  %v6262_v53 = vpop.eup %6261 }
 0x73c   :  { %5393 = vmatprep.mubr.msk.f32.mxu0 %vm401_vm1, %v997_v50  ;;  %699 = vadd.xlane.f32.xlu0 %v698_v51  ;;  %v695_v56 = vsel %vm401_vm1, %v6262_v53, 0.0 }
 0x73f   :  { %v999_v55 = vpop.permute.xlu1 %998 }
 0x740   :  { %5394 = vmatmul.mubr.msk.f32.vlgmr.msra.gmra.mrb[8].mxu0 %vm401_vm1, %v999_v55  ;;  %696 = vadd.xlane.f32.xlu0 %v695_v56 }
 0x741   :  { %5407 = vmatprep.mubr.msk.f32.mxu0 %vm401_vm1, %v6857_v54 }
 0x756   :  { %6114 = vrot.lane.b32.xlu0 %v6793_v34, %s6454_s20 }
 0x75a   :  { %796 = vrot.lane.b32.xlu0 %v6785_v27, %s6458_s24 }
 0x75e   :  { %6129 = vrot.lane.b32.xlu0 %v6873_v32, %s6453_s1 }
 0x7c9   :  { %v700_v59 = vpop.xlane.xlu0 %699 }
 0x7ca   :  { %6263 = vrcp.f32 %v700_v59 }
 0x7cd   :  { %v697_v60 = vpop.xlane.xlu0 %696 }
 0x7ce   :  { %6265 = vrcp.f32 %v697_v60 }
 0x7d1   :  { %v6115_v61 = vpop.permute.xlu0 %6114 }
 0x7d2   :  { %v6117_v1 = vunpack.i.h.bf16 %v6115_v61  ;;  %v6116_v20 = vunpack.i.l.bf16 %v6115_v61 }
 0x7d4   :  { %v5803_v42 = vpack.c.bf16 %v6117_v1, %v6116_v20  ;;  %v6264_v27 = vpop.eup %6263 }
 0x7d5   :  { %v797_v2 = vpop.permute.xlu0 %796  ;;  %v704_v5 = vmul.f32 %v6264_v27, %v6260_v23 }
 0x7d6   :  { %5804 = vmatprep.subr.bf16.mxu1 %v5803_v42 }
 0x7d7   :  { %5806 = vmatpush3.bf16.msra.mxu1 %v5803_v42 }
 0x7d8   :  { %v6266_v4 = vpop.eup %6265  ;;  %5809 = vmatprep.subr.msk.bf16.mxu1 %vm6803_vm2, %v5807_v3 }
 0x7d9   :  { %v6130_v6 = vpop.permute.xlu0 %6129  ;;  %v703_v7 = vmul.f32 %v6266_v4, %v6262_v53 }
 0x7da   :  { %v6132_v0 = vunpack.i.h.bf16 %v6130_v6  ;;  %v6131_v9 = vunpack.i.l.bf16 %v6130_v6 }
 0x7db   :  { %5372 = vmatprep.mubr.msk.f32.mxu1 %vm401_vm1, %v703_v7 }
 0x7dc   :  { %v5827_v10 = vpack.c.bf16 %v6132_v0, %v6131_v9  ;;  %5373 = vmatmul.mubr.msk.f32.vlgmr.msra.gmra.mrb[14].mxu1 %vm401_vm1, %v704_v5 }
 0x7dd   :  { %5379 = vmatprep.mubr.msk.f32.mxu1 %vm401_vm1, %v795_v49 }
 0x7de   :  { %5829 = vmatprep.subr.msk.bf16.mxu0 %vm6803_vm2, %v5827_v10 }
 0x7df   :  { %5832 = vmatpush3.bf16.xpose.msk.msra.mxu0 %vm6803_vm2, %v5827_v10 }
 0x7e0   :  { %5812 = vmatpush3.bf16.xpose.msk.msra.mxu1 %vm6803_vm2, %v5807_v3 }
 0x7e6   :  { %5408 = vmatmul.mubr.msk.f32.vlgmr.msra.gmra.mrb[10].mxu0 %vm401_vm1, %v6867_v58 }
 0x7e7   :  { %5380 = vmatmul.mubr.msk.f32.vlgmr.msra.gmra.mrb[16].mxu1 %vm401_vm1, %v797_v2 }
 0x813   :  { %v5395_v11 = vpop.f32.mrb[8].mxu0 }
 0x814   :  { %v1078_v13 = vpop.f32.mrb[9].mxu0  ;;  %v1088_v37 = vmul.f32 0.25, %v5395_v11 }
 0x815   :  { %v1087_v33 = vmul.f32 0.25, %v1078_v13 }
 0x816   :  { %v1092_v31 = vsel %vm401_vm1, %v1088_v37, -inf }
 0x817   :  { %v1089_v38 = vsel %vm401_vm1, %v1087_v33, -inf }
 0x8af   :  { %v6891_v14 = vpop.f32.mrb[14].mxu1 }
 0x8b0   :  { %v6893_v15 = vpop.f32.mrb[15].mxu1 }
 0x8b9   :  { %v5409_v16 = vpop.f32.mrb[10].mxu0 }
 0x8ba   :  { %v5381_v22 = vpop.f32.mrb[16].mxu1  ;;  %v1310_v24 = vpop.f32.mrb[11].mxu0  ;;  %v1320_v29 = vmul.f32 0.25, %v5409_v16 }
 0x8bb   :  { %v886_v25 = vmul.f32 0.25, %v5381_v22  ;;  %v876_v26 = vpop.f32.mrb[17].mxu1  ;;  %v1319_v41 = vmul.f32 0.25, %v1310_v24 }
 0x8bc   :  { %v885_v28 = vmul.f32 0.25, %v876_v26  ;;  %v1324_v36 = vsel %vm401_vm1, %v1320_v29, -inf }
 0x8bd   :  { %v890_v30 = vsel %vm401_vm1, %v886_v25, -inf  ;;  %v1321_v43 = vsel %vm401_vm1, %v1319_v41, -inf }
 0x8be   :  { %891 = vmax.xlane.f32.xlu1 %v890_v30  ;;  %v887_v35 = vsel %vm401_vm1, %v885_v28, -inf }
 0x8bf   :  { %888 = vmax.xlane.f32.xlu0 %v887_v35 }
 0x8c2   :  { %1325 = vmax.xlane.f32.xlu1 %v1324_v36 }
 0x8c3   :  { %1090 = vmax.xlane.f32.xlu0 %v1089_v38 }
 0x8c7   :  { %1093 = vmax.xlane.f32.xlu0 %v1092_v31 }
 0x8cb   :  { %1322 = vmax.xlane.f32.xlu0 %v1321_v43 }
 0x94b   :  { %v892_v44 = vpop.xlane.xlu1 %891 }
 0x94c   :  { %v889_v45 = vpop.xlane.xlu0 %888  ;;  %v894_v59 = vsub.f32 %v886_v25, %v892_v44 }
 0x94d   :  { %v893_v60 = vsub.f32 %v885_v28, %v889_v45 }
 0x94e   :  { %v897_v20 = vmul.f32 1.442695, %v894_v59 }
 0x94f   :  { %v1326_v49 = vpop.xlane.xlu1 %1325  ;;  %v895_v42 = vmul.f32 1.442695, %v893_v60 }
 0x950   :  { %v1091_v23 = vpop.xlane.xlu0 %1090  ;;  %v1328_v51 = vsub.f32 %v1320_v29, %v1326_v49 }
 0x951   :  { %v1095_v50 = vsub.f32 %v1087_v33, %v1091_v23 }
 0x952   :  { %v1331_v61 = vmul.f32 1.442695, %v1328_v51 }
 0x953   :  { %v1097_v53 = vmul.f32 1.442695, %v1095_v50 }
 0x954   :  { %v1094_v55 = vpop.xlane.xlu0 %1093 }
 0x955   :  { %6267 = vpow2.f32 %v1097_v53  ;;  %v1096_v56 = vsub.f32 %v1088_v37, %v1094_v55 }
 0x957   :  { %v1099_v62 = vmul.f32 1.442695, %v1096_v56 }
 0x958   :  { %v1323_v63 = vpop.xlane.xlu0 %1322 }
 0x959   :  { %6269 = vpow2.f32 %v1099_v62  ;;  %v1327_v1 = vsub.f32 %v1319_v41, %v1323_v63 }
 0x95a   :  { %6271 = vpow2.f32 %v1331_v61 }
 0x95b   :  { %v1329_v2 = vmul.f32 1.442695, %v1327_v1 }
 0x95d   :  { %6273 = vpow2.f32 %v1329_v2 }
 0x95e   :  { %6275 = vpow2.f32 %v897_v20 }
 0x95f   :  { %v6268_v3 = vpop.eup %6267  ;;  %6277 = vpow2.f32 %v895_v42 }
 0x960   :  { %v1101_v27 = vsel %vm401_vm1, %v6268_v3, 0.0 }
 0x961   :  { %1102 = vadd.xlane.f32.xlu0 %v1101_v27 }
 0x963   :  { %v6270_v4 = vpop.eup %6269 }
 0x964   :  { %v1104_v6 = vsel %vm401_vm1, %v6270_v4, 0.0  ;;  %v6903_v7 = vpop.eup %6271 }
 0x965   :  { %1105 = vadd.xlane.f32.xlu1 %v1104_v6  ;;  %v1336_v5 = vsel %vm401_vm1, %v6903_v7, 0.0 }
 0x967   :  { %v6274_v0 = vpop.eup %6273 }
 0x968   :  { %v6276_v9 = vpop.eup %6275  ;;  %v1333_v10 = vsel %vm401_vm1, %v6274_v0, 0.0 }
 0x969   :  { %v6278_v11 = vpop.eup %6277  ;;  %1337 = vadd.xlane.f32.xlu1 %v1336_v5  ;;  %1334 = vadd.xlane.f32.xlu0 %v1333_v10  ;;  %v902_v13 = vsel %vm401_vm1, %v6276_v9, 0.0 }
 0x96a   :  { %v899_v16 = vsel %vm401_vm1, %v6278_v11, 0.0 }
 0x96d   :  { %903 = vadd.xlane.f32.xlu1 %v902_v13  ;;  %900 = vadd.xlane.f32.xlu0 %v899_v16 }
 0x97e   :  { %6139 = vrot.lane.b32.xlu1 %v6793_v34, %s7777_s29 }
 0x982   :  { %6144 = vrot.lane.b32.xlu1 %v6873_v32, %s6455_s21 }
 0x983   :  { %6134 = vrot.lane.b32.xlu0 %v6793_v34, %s6458_s24 }
 0x986   :  { %1424 = vrot.lane.b32.xlu1 %v6857_v54, %s6454_s20 }
 0x987   :  { %1426 = vrot.lane.b32.xlu0 %v6867_v58, %s6454_s20 }
 0x9ee   :  { %v1103_v22 = vpop.xlane.xlu0 %1102 }
 0x9ef   :  { %6279 = vrcp.f32 %v1103_v22 }
 0x9f2   :  { %v1106_v24 = vpop.xlane.xlu1 %1105 }
 0x9f6   :  { %v1338_v25 = vpop.xlane.xlu1 %1337  ;;  %v1335_v26 = vpop.xlane.xlu0 %1334 }
 0x9f9   :  { %v6280_v31 = vpop.eup %6279 }
 0x9fa   :  { %v904_v28 = vpop.xlane.xlu1 %903  ;;  %v901_v29 = vpop.xlane.xlu0 %900  ;;  %v1109_v51 = vmul.f32 %v6280_v31, %v6268_v3 }
 0x9fb   :  { %6281 = vrcp.f32 %v904_v28 }
 0x9fc   :  { %6283 = vrcp.f32 %v901_v29 }
 0x9fd   :  { %6285 = vrcp.f32 %v1106_v24 }
 0x9fe   :  { %v6140_v30 = vpop.permute.xlu1 %6139  ;;  %v6135_v33 = vpop.permute.xlu0 %6134  ;;  %6287 = vrcp.f32 %v1335_v26 }
 0x9ff   :  { %v6142_v35 = vunpack.i.h.bf16 %v6140_v30  ;;  %v6141_v34 = vunpack.i.l.bf16 %v6140_v30  ;;  %v6137_v36 = vunpack.i.h.bf16 %v6135_v33  ;;  %v6136_v37 = vunpack.i.l.bf16 %v6135_v33 }
 0xa00   :  { %6289 = vrcp.f32 %v1338_v25 }
 0xa01   :  { %v5813_v38 = vpack.c.bf16 %v6137_v36, %v6136_v37  ;;  %v5823_v41 = vpack.c.bf16 %v6142_v35, %v6141_v34 }
 0xa02   :  { %v6145_v49 = vpop.permute.xlu1 %6144  ;;  %v1427_v20 = vpop.permute.xlu0 %1426 }
 0xa03   :  { %5814 = vmatprep.subr.bf16.mxu1 %v5813_v38  ;;  %v6147_v55 = vunpack.i.h.bf16 %v6145_v49  ;;  %v6146_v56 = vunpack.i.l.bf16 %v6145_v49 }
 0xa04   :  { %5816 = vmatpush3.bf16.msra.mxu1 %v5813_v38 }
 0xa05   :  { %v6282_v43 = vpop.eup %6281  ;;  %5824 = vmatprep.subr.bf16.mxu1 %v5823_v41  ;;  %v5837_v62 = vpack.c.bf16 %v6147_v55, %v6146_v56 }
 0xa06   :  { %v6284_v44 = vpop.eup %6283  ;;  %v908_v45 = vmul.f32 %v6282_v43, %v6276_v9  ;;  %v1425_v1 = vpop.permute.xlu1 %1424 }
 0xa07   :  { %v907_v23 = vmul.f32 %v6284_v44, %v6278_v11  ;;  %v6286_v50 = vpop.eup %6285 }
 0xa08   :  { %v6288_v53 = vpop.eup %6287  ;;  %v1110_v59 = vmul.f32 %v6286_v50, %v6270_v4 }
 0xa09   :  { %5386 = vmatprep.mubr.msk.f32.mxu1 %vm401_vm1, %v907_v23  ;;  %v1341_v61 = vmul.f32 %v6288_v53, %v6274_v0 }
 0xa0a   :  { %5387 = vmatmul.mubr.msk.f32.vlgmr.msra.gmra.mrb[18].mxu1 %vm401_vm1, %v908_v45  ;;  %v6290_v60 = vpop.eup %6289 }
 0xa0b   :  { %5826 = vmatpush3.bf16.msra.mxu1 %v5823_v41  ;;  %5400 = vmatprep.mubr.msk.f32.mxu1 %vm401_vm1, %v1109_v51  ;;  %v1342_v63 = vmul.f32 %v6290_v60, %v6903_v7 }
 0xa0c   :  { %5834 = vmatprep.subr.bf16.mxu1 %v6815_v46 }
 0xa0e   :  { %5401 = vmatmul.mubr.msk.f32.vlgmr.msra.gmra.mrb[20].mxu1 %vm401_vm1, %v1110_v59 }
 0xa0f   :  { %5836 = vmatpush3.bf16.msra.mxu1 %v6815_v46  ;;  %5414 = vmatprep.mubr.msk.f32.mxu1 %vm401_vm1, %v1341_v61 }
 0xa10   :  { %5839 = vmatprep.subr.msk.bf16.mxu1 %vm6803_vm2, %v5837_v62 }
 0xa12   :  { %5415 = vmatmul.mubr.msk.f32.vlgmr.msra.gmra.mrb[22].mxu1 %vm401_vm1, %v1342_v63 }
 0xa13   :  { %5421 = vmatprep.mubr.msk.f32.mxu1 %vm401_vm1, %v1425_v1 }
 0xa18   :  { %5842 = vmatpush3.bf16.xpose.msk.msra.mxu1 %vm6803_vm2, %v5837_v62 }
 0xa1f   :  { %5422 = vmatmul.mubr.msk.f32.vlgmr.msra.gmra.mrb[24].mxu1 %vm401_vm1, %v1427_v20 }
 0xadd   :  { %v6935_v42 = vpop.f32.mrb[18].mxu1 }
 0xade   :  { %v6937_v46 = vpop.f32.mrb[19].mxu1 }
 0xae1   :  { %v6939_v2 = vpop.f32.mrb[20].mxu1 }
 0xae2   :  { %v6941_v3 = vpop.f32.mrb[21].mxu1 }
 0xae5   :  { %v6943_v27 = vpop.f32.mrb[22].mxu1 }
 0xae6   :  { %v6945_v4 = vpop.f32.mrb[23].mxu1 }
 0xaf2   :  { %v5423_v6 = vpop.f32.mrb[24].mxu1 }
 0xaf3   :  { %v1516_v7 = vmul.f32 0.25, %v5423_v6  ;;  %v1506_v0 = vpop.f32.mrb[25].mxu1 }
 0xaf4   :  { %v1515_v9 = vmul.f32 0.25, %v1506_v0 }
 0xaf5   :  { %v1520_v5 = vsel %vm401_vm1, %v1516_v7, -inf }
 0xaf6   :  { %1521 = vmax.xlane.f32.xlu0 %v1520_v5  ;;  %v1517_v10 = vsel %vm401_vm1, %v1515_v9, -inf }
 0xaf7   :  { %1518 = vmax.xlane.f32.xlu1 %v1517_v10 }
 0xb08   :  { %6149 = vrot.lane.b32.xlu1 %v6817_v48, %s6454_s20 }
 0xb0c   :  { %1628 = vrot.lane.b32.xlu1 %v6857_v54, %s6458_s24 }
 0xb10   :  { %1630 = vrot.lane.b32.xlu1 %v6867_v58, %s6458_s24 }
 0xb83   :  { %v1522_v11 = vpop.xlane.xlu0 %1521 }
 0xb84   :  { %v1524_v13 = vsub.f32 %v1516_v7, %v1522_v11  ;;  %v1519_v16 = vpop.xlane.xlu1 %1518 }
 0xb85   :  { %v1523_v22 = vsub.f32 %v1515_v9, %v1519_v16 }
 0xb86   :  { %v1527_v24 = vmul.f32 1.442695, %v1524_v13 }
 0xb87   :  { %v1525_v25 = vmul.f32 1.442695, %v1523_v22 }
 0xb88   :  { %6291 = vpow2.f32 %v1527_v24  ;;  %v6150_v26 = vpop.permute.xlu1 %6149 }
 0xb89   :  { %v6152_v28 = vunpack.i.h.bf16 %v6150_v26  ;;  %v6151_v29 = vunpack.i.l.bf16 %v6150_v26  ;;  %6293 = vpow2.f32 %v1525_v25 }
 0xb8b   :  { %v5843_v30 = vpack.c.bf16 %v6152_v28, %v6151_v29 }
 0xb8c   :  { %v1629_v51 = vpop.permute.xlu1 %1628 }
 0xb8d   :  { %5844 = vmatprep.subr.bf16.mxu0 %v5843_v30 }
 0xb8e   :  { %5846 = vmatpush3.bf16.msra.mxu0 %v5843_v30 }
 0xb90   :  { %v1631_v53 = vpop.permute.xlu1 %1630 }
 0xb92   :  { %v6292_v33 = vpop.eup %6291 }
 0xb93   :  { %v1532_v35 = vsel %vm401_vm1, %v6292_v33, 0.0  ;;  %v6294_v34 = vpop.eup %6293 }
 0xb94   :  { %1533 = vadd.xlane.f32.xlu0 %v1532_v35  ;;  %v1529_v36 = vsel %vm401_vm1, %v6294_v34, 0.0 }
 0xb98   :  { %1530 = vadd.xlane.f32.xlu0 %v1529_v36 }
 0xbae   :  { %6154 = vrot.lane.b32.xlu0 %v6873_v32, %s6456_s22 }
 0xc21   :  { %v1534_v37 = vpop.xlane.xlu0 %1533 }
 0xc22   :  { %6295 = vrcp.f32 %v1534_v37 }
 0xc25   :  { %v1531_v38 = vpop.xlane.xlu0 %1530 }
 0xc26   :  { %6297 = vrcp.f32 %v1531_v38 }
 0xc29   :  { %v6155_v41 = vpop.permute.xlu0 %6154 }
 0xc2a   :  { %v6157_v31 = vunpack.i.h.bf16 %v6155_v41  ;;  %v6156_v43 = vunpack.i.l.bf16 %v6155_v41 }
 0xc2c   :  { %v5847_v44 = vpack.c.bf16 %v6157_v31, %v6156_v43  ;;  %v6296_v45 = vpop.eup %6295 }
 0xc2d   :  { %v1538_v50 = vmul.f32 %v6296_v45, %v6292_v33 }
 0xc2e   :  { %5849 = vmatprep.subr.msk.bf16.mxu0 %vm6803_vm2, %v5847_v44 }
 0xc30   :  { %v6298_v49 = vpop.eup %6297 }
 0xc31   :  { %v1537_v23 = vmul.f32 %v6298_v49, %v6294_v34 }
 0xc33   :  { %5428 = vmatprep.mubr.msk.f32.mxu0 %vm401_vm1, %v1537_v23 }
 0xc34   :  { %5429 = vmatmul.mubr.msk.f32.vlgmr.msra.gmra.mrb[12].mxu0 %vm401_vm1, %v1538_v50 }
 0xc35   :  { %5852 = vmatpush3.bf16.xpose.msk.msra.mxu0 %vm6803_vm2, %v5847_v44  ;;  %5435 = vmatprep.mubr.msk.f32.mxu0 %vm401_vm1, %v1629_v51 }
 0xc3c   :  { %5436 = vmatmul.mubr.msk.f32.vlgmr.msra.gmra.mrb[14].mxu0 %vm401_vm1, %v1631_v53 }
 0xd07   :  { %v6967_v55 = vpop.f32.mrb[12].mxu0 }
 0xd08   :  { %v6969_v56 = vpop.f32.mrb[13].mxu0 }
 0xd0f   :  { %v5437_v59 = vpop.f32.mrb[14].mxu0 }
 0xd10   :  { %v1720_v60 = vmul.f32 0.25, %v5437_v59  ;;  %v1710_v61 = vpop.f32.mrb[15].mxu0 }
 0xd11   :  { %v1719_v62 = vmul.f32 0.25, %v1710_v61 }
 0xd12   :  { %v1724_v63 = vsel %vm401_vm1, %v1720_v60, -inf }
 0xd13   :  { %1725 = vmax.xlane.f32.xlu0 %v1724_v63  ;;  %v1721_v1 = vsel %vm401_vm1, %v1719_v62, -inf }
 0xd14   :  { %1722 = vmax.xlane.f32.xlu1 %v1721_v1 }
 0xd25   :  { %6159 = vrot.lane.b32.xlu1 %v6817_v48, %s6458_s24 }
 0xd29   :  { %1830 = vrot.lane.b32.xlu1 %v6857_v54, %s7777_s29 }
 0xd2d   :  { %1832 = vrot.lane.b32.xlu1 %v6867_v58, %s7777_s29 }
 0xda0   :  { %v1726_v20 = vpop.xlane.xlu0 %1725 }
 0xda1   :  { %v1728_v6 = vsub.f32 %v1720_v60, %v1726_v20  ;;  %v1723_v7 = vpop.xlane.xlu1 %1722 }
 0xda2   :  { %v1727_v0 = vsub.f32 %v1719_v62, %v1723_v7 }
 0xda3   :  { %v1731_v9 = vmul.f32 1.442695, %v1728_v6 }
 0xda4   :  { %v1729_v5 = vmul.f32 1.442695, %v1727_v0 }
 0xda5   :  { %6299 = vpow2.f32 %v1731_v9  ;;  %v6160_v10 = vpop.permute.xlu1 %6159 }
 0xda6   :  { %v6162_v11 = vunpack.i.h.bf16 %v6160_v10  ;;  %v6161_v13 = vunpack.i.l.bf16 %v6160_v10  ;;  %6301 = vpow2.f32 %v1729_v5 }
 0xda8   :  { %v5853_v16 = vpack.c.bf16 %v6162_v11, %v6161_v13 }
 0xda9   :  { %v1831_v38 = vpop.permute.xlu1 %1830 }
 0xdaa   :  { %5854 = vmatprep.subr.bf16.mxu1 %v5853_v16 }
 0xdab   :  { %5856 = vmatpush3.bf16.msra.mxu1 %v5853_v16 }
 0xdaf   :  { %v6300_v22 = vpop.eup %6299 }
 0xdb0   :  { %v1736_v54 = vsel %vm401_vm1, %v6300_v22, 0.0  ;;  %v6302_v24 = vpop.eup %6301 }
 0xdb1   :  { %1737 = vadd.xlane.f32.xlu0 %v1736_v54  ;;  %v1733_v58 = vsel %vm401_vm1, %v6302_v24, 0.0 }
 0xdb5   :  { %1734 = vadd.xlane.f32.xlu0 %v1733_v58 }
 0xdcb   :  { %6164 = vrot.lane.b32.xlu0 %v6873_v32, %s6457_s23  ;;  %v1833_v32 = vpop.permute.xlu1 %1832 }
 0xe3e   :  { %v1738_v25 = vpop.xlane.xlu0 %1737 }
 0xe3f   :  { %6303 = vrcp.f32 %v1738_v25  ;;  %v2068_v25 = vld [vmem:[%s7764_s7 + $0x30] sm:$0xff] }
 0xe42   :  { %v1735_v26 = vpop.xlane.xlu0 %1734 }
 0xe43   :  { %6305 = vrcp.f32 %v1735_v26  ;;  %v2069_v26 = vld [vmem:[%s7764_s7 + $0x38] sm:$0xff] }
 0xe46   :  { %v6165_v28 = vpop.permute.xlu0 %6164 }
 0xe47   :  { %v6167_v29 = vunpack.i.h.bf16 %v6165_v28  ;;  %v6166_v30 = vunpack.i.l.bf16 %v6165_v28  ;;  %v5879_v28 = vpack.c.bf16 %v2069_v26, %v2068_v25  ;;  %v2259_v25 = vld [vmem:[%s7768_s11 + $0x38] sm:$0xff] }
 0xe49   :  { %v5857_v33 = vpack.c.bf16 %v6167_v29, %v6166_v30  ;;  %v6304_v35 = vpop.eup %6303 }
 0xe4a   :  { %v1742_v37 = vmul.f32 %v6304_v35, %v6300_v22 }
 0xe4b   :  { %5859 = vmatprep.subr.msk.bf16.mxu1 %vm6803_vm2, %v5857_v33 }
 0xe4d   :  { %v6306_v34 = vpop.eup %6305 }
 0xe4e   :  { %v1741_v36 = vmul.f32 %v6306_v34, %v6302_v24  ;;  %v2067_v24 = vld [vmem:[%s7764_s7 + $0x28] sm:$0xff] }
 0xe50   :  { %5442 = vmatprep.mubr.msk.f32.mxu1 %vm401_vm1, %v1741_v36 }
 0xe51   :  { %5443 = vmatmul.mubr.msk.f32.vlgmr.msra.gmra.mrb[26].mxu1 %vm401_vm1, %v1742_v37 }
 0xe52   :  { %5862 = vmatpush3.bf16.xpose.msk.msra.mxu1 %vm6803_vm2, %v5857_v33  ;;  %5449 = vmatprep.mubr.msk.f32.mxu1 %vm401_vm1, %v1831_v38 }
 0xe59   :  { %5450 = vmatmul.mubr.msk.f32.vlgmr.msra.gmra.mrb[28].mxu1 %vm401_vm1, %v1833_v32 }
 0xf24   :  { %v5444_v41 = vpop.f32.mrb[26].mxu1 }
 0xf25   :  { %v6991_v31 = vpop.f32.mrb[27].mxu1 }
 0xf2c   :  { %v5451_v43 = vpop.f32.mrb[28].mxu1 }
 0xf2d   :  { %v1922_v44 = vmul.f32 0.25, %v5451_v43  ;;  %v1912_v45 = vpop.f32.mrb[29].mxu1 }
 0xf2e   :  { %v1921_v49 = vmul.f32 0.25, %v1912_v45 }
 0xf2f   :  { %v1926_v23 = vsel %vm401_vm1, %v1922_v44, -inf }
 0xf30   :  { %1927 = vmax.xlane.f32.xlu0 %v1926_v23  ;;  %v1923_v50 = vsel %vm401_vm1, %v1921_v49, -inf }
 0xf31   :  { %1924 = vmax.xlane.f32.xlu1 %v1923_v50 }
 0xf42   :  { %1200 = vrot.lane.b32.xlu1 %v6893_v15, %s6457_s23  ;;  %v2063_v15 = vld [vmem:[%s7764_s7 + $0x8] sm:$0xff] }
 0xf46   :  { %1202 = vrot.lane.b32.xlu0 %v6891_v14, %s6457_s23  ;;  %1208 = vrot.lane.b32.xlu1 %v6937_v46, %s6456_s22  ;;  %v2062_v14 = vld [vmem:[%s7764_s7] sm:$0xff] }
 0xf47   :  { %v5867_v46 = vpack.c.bf16 %v2063_v15, %v2062_v14 }
 0xf49   :  { %5868 = vmatprep.subr.bf16.mxu1 %v5867_v46 }
 0xf4a   :  { %1210 = vrot.lane.b32.xlu1 %v6935_v42, %s6456_s22  ;;  %v2064_v42 = vld [vmem:[%s7764_s7 + $0x10] sm:$0xff]  ;;  %5870 = vmatpush3.bf16.msra.mxu1 %v5867_v46 }
 0xf4e   :  { %1216 = vrot.lane.b32.xlu1 %v6941_v3, %s6455_s21 }
 0xf52   :  { %6169 = vrot.lane.b32.xlu1 %v6817_v48, %s7777_s29  ;;  %v2065_v48 = vld [vmem:[%s7764_s7 + $0x18] sm:$0xff] }
 0xf53   :  { %v5871_v3 = vpack.c.bf16 %v2065_v48, %v2064_v42 }
 0xf55   :  { %5872 = vmatprep.subr.bf16.mxu1 %v5871_v3 }
 0xf56   :  { %2036 = vrot.lane.b32.xlu1 %v6967_v55, %s6457_s23  ;;  %5874 = vmatpush3.bf16.msra.mxu1 %v5871_v3 }
 0xf5a   :  { %2044 = vrot.lane.b32.xlu1 %v5444_v41, %s6456_s22  ;;  %v7057_v41 = vld [vmem:[%s7765_s8] ss:$0 sm:$0xff] }
 0xfbd   :  { %v1928_v51 = vpop.xlane.xlu0 %1927 }
 0xfbe   :  { %v1930_v53 = vsub.f32 %v1922_v44, %v1928_v51  ;;  %v1925_v55 = vpop.xlane.xlu1 %1924 }
 0xfbf   :  { %v1929_v59 = vsub.f32 %v1921_v49, %v1925_v55 }
 0xfc0   :  { %v1933_v60 = vmul.f32 1.442695, %v1930_v53 }
 0xfc1   :  { %v1931_v61 = vmul.f32 1.442695, %v1929_v59  ;;  %v1203_v29 = vpop.permute.xlu0 %1202 }
 0xfc2   :  { %6307 = vpow2.f32 %v1933_v60  ;;  %v1201_v62 = vpop.permute.xlu1 %1200  ;;  %v1223_v35 = vsel %vm401_vm1, %v6833_v12, %v1203_v29 }
 0xfc3   :  { %6309 = vpow2.f32 %v1931_v61  ;;  %v1222_v6 = vsel %vm401_vm1, %v6835_v19, %v1201_v62  ;;  %v2066_v19 = vld [vmem:[%s7764_s7 + $0x20] sm:$0xff] }
 0xfc4   :  { %v5875_v58 = vpack.c.bf16 %v2067_v24, %v2066_v19  ;;  %v2257_v19 = vld [vmem:[%s7768_s11 + $0x28] sm:$0xff] }
 0xfc6   :  { %v1209_v63 = vpop.permute.xlu1 %1208  ;;  %5876 = vmatprep.subr.bf16.mxu1 %v5875_v58 }
 0xfc7   :  { %v1225_v9 = vsel %vm1224_vm3, %v1222_v6, %v1209_v63  ;;  %5878 = vmatpush3.bf16.msra.mxu1 %v5875_v58  ;;  %v2258_v58 = vld [vmem:[%s7768_s11 + $0x30] sm:$0xff] }
 0xfc8   :  { %5880 = vmatprep.subr.bf16.mxu1 %v5879_v28  ;;  %v5895_v26 = vpack.c.bf16 %v2259_v25, %v2258_v58 }
 0xfca   :  { %v1211_v1 = vpop.permute.xlu1 %1210 }
 0xfcb   :  { %5882 = vmatpush3.bf16.msra.mxu1 %v5879_v28  ;;  %v1226_v34 = vsel %vm1224_vm3, %v1223_v35, %v1211_v1  ;;  %v7114_v35 = vld [vmem:[%s7766_s9] ss:$0 sm:$0xff] }
 0xfcc   :  { %v6308_v20 = vpop.eup %6307 }
 0xfcd   :  { %v1938_v7 = vsel %vm401_vm1, %v6308_v20, 0.0  ;;  %v6310_v0 = vpop.eup %6309 }
 0xfce   :  { %1939 = vadd.xlane.f32.xlu0 %v1938_v7  ;;  %v1217_v5 = vpop.permute.xlu1 %1216  ;;  %v1935_v11 = vsel %vm401_vm1, %v6310_v0, 0.0 }
 0xfcf   :  { %v1228_v10 = vsel %vm1227_vm4, %v1225_v9, %v1217_v5  ;;  %v2252_v5 = vld [vmem:[%s7768_s11] sm:$0xff] }
 0xfd0   :  { %5475 = vmatprep.mubr.msk.f32.mxu1 %vm93_vm0, %v1228_v10  ;;  %v2253_v10 = vld [vmem:[%s7768_s11 + $0x8] sm:$0xff] }
 0xfd2   :  { %1936 = vadd.xlane.f32.xlu0 %v1935_v11  ;;  %v6170_v13 = vpop.permute.xlu1 %6169  ;;  %v5883_v11 = vpack.c.bf16 %v2253_v10, %v2252_v5  ;;  %v2414_v5 = vld [vmem:[%s7770_s13 + $0x70] sm:$0xff]  ;;  %v2415_v10 = vld [vmem:[%s7770_s13 + $0x78] sm:$0xff] }
 0xfd3   :  { %v6172_v16 = vunpack.i.h.bf16 %v6170_v13  ;;  %v6171_v22 = vunpack.i.l.bf16 %v6170_v13  ;;  %v2254_v13 = vld [vmem:[%s7768_s11 + $0x10] sm:$0xff] }
 0xfd4   :  { %5884 = vmatprep.subr.bf16.mxu1 %v5883_v11 }
 0xfd5   :  { %v5863_v54 = vpack.c.bf16 %v6172_v16, %v6171_v22  ;;  %v2255_v16 = vld [vmem:[%s7768_s11 + $0x18] sm:$0xff] }
 0xfd6   :  { %v2037_v42 = vpop.permute.xlu1 %2036  ;;  %v5887_v22 = vpack.c.bf16 %v2255_v16, %v2254_v13 }
 0xfd7   :  { %5864 = vmatprep.subr.bf16.mxu0 %v5863_v54  ;;  %v2057_v53 = vsel %vm401_vm1, %v6943_v27, %v2037_v42 }
 0xfd8   :  { %5866 = vmatpush3.bf16.msra.mxu0 %v5863_v54  ;;  %v2256_v54 = vld [vmem:[%s7768_s11 + $0x20] sm:$0xff] }
 0xfd9   :  { %v5891_v24 = vpack.c.bf16 %v2257_v19, %v2256_v54 }
 0xfda   :  { %v2045_v3 = vpop.permute.xlu1 %2044 }
 0xfe8   :  { %1218 = vrot.lane.b32.xlu0 %v6939_v2, %s6455_s21 }
 0xfec   :  { %2034 = vrot.lane.b32.xlu0 %v6969_v56, %s6457_s23 }
 0xff0   :  { %2042 = vrot.lane.b32.xlu0 %v6991_v31, %s6456_s22 }
0x105b   :  { %v1940_v30 = vpop.xlane.xlu0 %1939 }
0x105c   :  { %6311 = vrcp.f32 %v1940_v30 }
0x105f   :  { %v1937_v33 = vpop.xlane.xlu0 %1936 }
0x1060   :  { %6313 = vrcp.f32 %v1937_v33 }
0x1063   :  { %v1219_v36 = vpop.permute.xlu0 %1218 }
0x1064   :  { %v1229_v37 = vsel %vm1227_vm4, %v1226_v34, %v1219_v36  ;;  %v7119_v36 = vld [vmem:[%s7767_s10] ss:$0 sm:$0xff] }
0x1065   :  { %5476 = vmatmul.mubr.msk.f32.vlgmr.msra.gmra.mrb[30].mxu1 %vm93_vm0, %v1229_v37 }
0x1066   :  { %v6312_v2 = vpop.eup %6311  ;;  %5886 = vmatpush3.bf16.msra.mxu1 %v5883_v11  ;;  %v5927_v11 = vpack.c.bf16 %v2415_v10, %v2414_v5 }
0x1067   :  { %v1944_v32 = vmul.f32 %v6312_v2, %v6308_v20  ;;  %5888 = vmatprep.subr.bf16.mxu1 %v5887_v22 }
0x106a   :  { %v6314_v56 = vpop.eup %6313  ;;  %5890 = vmatpush3.bf16.msra.mxu1 %v5887_v22 }
0x106b   :  { %v1943_v38 = vmul.f32 %v6314_v56, %v6310_v0  ;;  %5892 = vmatprep.subr.bf16.mxu1 %v5891_v24 }
0x106d   :  { %5456 = vmatprep.mubr.msk.f32.mxu0 %vm401_vm1, %v1943_v38 }
0x106e   :  { %5457 = vmatmul.mubr.msk.f32.vlgmr.msra.gmra.mrb[16].mxu0 %vm401_vm1, %v1944_v32  ;;  %5894 = vmatpush3.bf16.msra.mxu1 %v5891_v24 }
0x106f   :  { %5896 = vmatprep.subr.bf16.mxu1 %v5895_v26 }
0x1072   :  { %5898 = vmatpush3.bf16.msra.mxu1 %v5895_v26 }
0x1138   :  { %v5477_v12 = vpop.f32.mrb[30].mxu1 }
0x1139   :  { %v2155_v31 = vpop.f32.mrb[31].mxu1  ;;  %v2161_v50 = vadd.f32 %v5477_v12, %v7057_v41 }
0x113a   :  { %v2156_v43 = vadd.f32 %v7057_v41, %v2155_v31 }
0x113b   :  { %v7069_v14 = vadd.f32 %v2161_v50, %v6663_v52  ;;  %v2059_v52 = vsel %vm1224_vm3, %v2057_v53, %v2045_v3  ;;  %v2402_v3 = vld [vmem:[%s7770_s13 + $0x10] sm:$0xff] }
0x113c   :  { %v7061_v44 = vadd.f32 %v2156_v43, %v6656_v47  ;;  %v2035_v47 = vpop.permute.xlu0 %2034 }
0x113d   :  { %v2183_v15 = vsel %vm93_vm0, %v7069_v14, 0.0  ;;  %v2056_v51 = vsel %vm401_vm1, %v6945_v4, %v2035_v47 }
0x113e   :  { %v2180_v45 = vsel %vm93_vm0, %v7061_v44, 0.0 }
0x113f   :  { %2181 = vadd.xlane.f32.xlu1 %v2180_v45 }
0x1140   :  { %v2043_v46 = vpop.permute.xlu0 %2042 }
0x1141   :  { %v5458_v49 = vpop.f32.mrb[16].mxu0  ;;  %v2058_v55 = vsel %vm1224_vm3, %v2056_v51, %v2043_v46  ;;  %v2403_v51 = vld [vmem:[%s7770_s13 + $0x18] sm:$0xff] }
0x1142   :  { %2052 = vrot.lane.b32.xlu0 %v5458_v49, %s6455_s21  ;;  %v2023_v23 = vpop.f32.mrb[17].mxu0  ;;  %v5903_v53 = vpack.c.bf16 %v2403_v51, %v2402_v3 }
0x1146   :  { %2050 = vrot.lane.b32.xlu0 %v2023_v23, %s6455_s21 }
0x1165   :  { %2184 = vadd.xlane.f32.xlu0 %v2183_v15 }
0x11b4   :  { %v2053_v48 = vpop.permute.xlu0 %2052 }
0x11b5   :  { %v2061_v61 = vsel %vm1227_vm4, %v2059_v52, %v2053_v48 }
0x11b8   :  { %v2051_v59 = vpop.permute.xlu0 %2050 }
0x11b9   :  { %v2060_v60 = vsel %vm1227_vm4, %v2058_v55, %v2051_v59  ;;  %v2404_v55 = vld [vmem:[%s7770_s13 + $0x20] sm:$0xff]  ;;  %v2405_v59 = vld [vmem:[%s7770_s13 + $0x28] sm:$0xff] }
0x11ba   :  { %5478 = vmatprep.mubr.msk.f32.mxu1 %vm93_vm0, %v2060_v60  ;;  %v5907_v52 = vpack.c.bf16 %v2405_v59, %v2404_v55  ;;  %v2406_v60 = vld [vmem:[%s7770_s13 + $0x30] sm:$0xff] }
0x11bb   :  { %5479 = vmatmul.mubr.msk.f32.gmra.mrb[32].mxu1 %vm93_vm0, %v2061_v61  ;;  %v2407_v61 = vld [vmem:[%s7770_s13 + $0x38] sm:$0xff] }
0x11cc   :  { %v2182_v62 = vpop.xlane.xlu1 %2181 }
0x11cd   :  { %v2192_v63 = vmul.f32 0.015625, %v2182_v62  ;;  %v5911_v62 = vpack.c.bf16 %v2407_v61, %v2406_v60 }
0x11cf   :  { %v2196_v4 = vsub.f32 %v7061_v44, %v2192_v63  ;;  %v2408_v63 = vld [vmem:[%s7770_s13 + $0x40] sm:$0xff] }
0x11d1   :  { %v2200_v1 = vmul.f32 %v2196_v4, %v2196_v4 }
0x11d3   :  { %v2204_v27 = vsel %vm93_vm0, %v2200_v1, 0.0  ;;  %v2410_v1 = vld [vmem:[%s7770_s13 + $0x50] sm:$0xff] }
0x11d4   :  { %2205 = vadd.xlane.f32.xlu0 %v2204_v27 }
0x11f2   :  { %v2185_v20 = vpop.xlane.xlu0 %2184 }
0x11f3   :  { %v2193_v6 = vmul.f32 0.015625, %v2185_v20  ;;  %v2411_v20 = vld [vmem:[%s7770_s13 + $0x58] sm:$0xff] }
0x11f5   :  { %v2197_v7 = vsub.f32 %v7069_v14, %v2193_v6  ;;  %v5919_v6 = vpack.c.bf16 %v2411_v20, %v2410_v1 }
0x11f7   :  { %v2201_v0 = vmul.f32 %v2197_v7, %v2197_v7 }
0x11f9   :  { %v2207_v9 = vsel %vm93_vm0, %v2201_v0, 0.0  ;;  %v2413_v0 = vld [vmem:[%s7770_s13 + $0x68] sm:$0xff] }
0x11fa   :  { %2208 = vadd.xlane.f32.xlu1 %v2207_v9 }
0x1261   :  { %v2206_v28 = vpop.xlane.xlu0 %2205 }
0x1262   :  { %v2216_v29 = vmul.f32 0.015625, %v2206_v28 }
0x1264   :  { %v2220_v30 = vadd.f32 1e-06, %v2216_v29  ;;  %v5000_v29 = vld [vmem:[%s7769_s12] ss:$0 sm:$0xff] }
0x1266   :  { %6315 = vrsqrt.f32 %v2220_v30 }
0x1270   :  { %v6316_v33 = vpop.eup %6315 }
0x1271   :  { %v2228_v34 = vmul.f32 %v6316_v33, %v2196_v4  ;;  %v2409_v4 = vld [vmem:[%s7770_s13 + $0x48] sm:$0xff] }
0x1272   :  { %v5915_v27 = vpack.c.bf16 %v2409_v4, %v2408_v63 }
0x1273   :  { %v2238_v37 = vmul.f32 %v7114_v35, %v2228_v34 }
0x1275   :  { %v2248_v2 = vadd.f32 %v7119_v36, %v2238_v37 }
0x1277   :  { %5497 = vmatprep.mubr.msk.f32.mxu1 %vm93_vm0, %v2248_v2 }
0x1287   :  { %v2209_v56 = vpop.xlane.xlu1 %2208 }
0x1288   :  { %v2217_v38 = vmul.f32 0.015625, %v2209_v56 }
0x128a   :  { %v2221_v32 = vadd.f32 1e-06, %v2217_v38 }
0x128c   :  { %6317 = vrsqrt.f32 %v2221_v32 }
0x128e   :  { %v5480_v12 = vpop.f32.mrb[32].mxu1 }
0x128f   :  { %v2171_v31 = vadd.f32 %v5480_v12, %v7057_v41  ;;  %v2165_v43 = vpop.f32.mrb[33].mxu1 }
0x1290   :  { %v2166_v45 = vadd.f32 %v7057_v41, %v2165_v43 }
0x1291   :  { %v7127_v49 = vadd.f32 %v2171_v31, %v6686_v8  ;;  %v2401_v8 = vld [vmem:[%s7770_s13 + $0x8] sm:$0xff] }
0x1292   :  { %v7130_v23 = vadd.f32 %v2166_v45, %v6670_v57  ;;  %v2400_v57 = vld [vmem:[%s7770_s13] sm:$0xff] }
0x1293   :  { %v2189_v50 = vsel %vm93_vm0, %v7127_v49, 0.0  ;;  %v5899_v48 = vpack.c.bf16 %v2401_v8, %v2400_v57 }
0x1294   :  { %2190 = vadd.xlane.f32.xlu1 %v2189_v50  ;;  %v2186_v15 = vsel %vm93_vm0, %v7130_v23, 0.0 }
0x1295   :  { %2187 = vadd.xlane.f32.xlu0 %v2186_v15  ;;  %5900 = vmatprep.subr.bf16.mxu0 %v5899_v48 }
0x1296   :  { %v6318_v47 = vpop.eup %6317  ;;  %5902 = vmatpush3.bf16.msra.mxu0 %v5899_v48 }
0x1297   :  { %v2229_v42 = vmul.f32 %v6318_v47, %v2197_v7  ;;  %5904 = vmatprep.subr.bf16.mxu0 %v5903_v53  ;;  %v2412_v7 = vld [vmem:[%s7770_s13 + $0x60] sm:$0xff] }
0x1298   :  { %v5923_v9 = vpack.c.bf16 %v2413_v0, %v2412_v7  ;;  %v7204_v7 = vld [vmem:[%s7771_s14] ss:$0 sm:$0xff] }
0x1299   :  { %v2239_v46 = vmul.f32 %v7114_v35, %v2229_v42 }
0x129a   :  { %5906 = vmatpush3.bf16.msra.mxu0 %v5903_v53 }
0x129b   :  { %v2249_v41 = vadd.f32 %v7119_v36, %v2239_v46  ;;  %5908 = vmatprep.subr.bf16.mxu0 %v5907_v52 }
0x129d   :  { %5498 = vmatmul.mubr.msk.f32.vlgmr.msra.gmra.mrb[34].mxu1 %vm93_vm0, %v2249_v41 }
0x129e   :  { %5910 = vmatpush3.bf16.msra.mxu0 %v5907_v52 }
0x129f   :  { %5912 = vmatprep.subr.bf16.mxu0 %v5911_v62 }
0x12a2   :  { %5914 = vmatpush3.bf16.msra.mxu0 %v5911_v62 }
0x12a3   :  { %5916 = vmatprep.subr.bf16.mxu0 %v5915_v27 }
0x12a6   :  { %5918 = vmatpush3.bf16.msra.mxu0 %v5915_v27 }
0x12a7   :  { %5920 = vmatprep.subr.bf16.mxu0 %v5919_v6 }
0x12aa   :  { %5922 = vmatpush3.bf16.msra.mxu0 %v5919_v6 }
0x12ab   :  { %5924 = vmatprep.subr.bf16.mxu0 %v5923_v9 }
0x12ae   :  { %5926 = vmatpush3.bf16.msra.mxu0 %v5923_v9 }
0x12af   :  { %5928 = vmatprep.subr.bf16.mxu0 %v5927_v11 }
0x12b2   :  { %5930 = vmatpush3.bf16.msra.mxu0 %v5927_v11 }
0x1321   :  { %v2191_v13 = vpop.xlane.xlu1 %2190 }
0x1322   :  { %v2195_v16 = vmul.f32 0.015625, %v2191_v13  ;;  %v2188_v22 = vpop.xlane.xlu0 %2187 }
0x1323   :  { %v2194_v54 = vmul.f32 0.015625, %v2188_v22 }
0x1324   :  { %v2199_v19 = vsub.f32 %v7127_v49, %v2195_v16 }
0x1325   :  { %v2198_v24 = vsub.f32 %v7130_v23, %v2194_v54 }
0x1326   :  { %v2203_v58 = vmul.f32 %v2199_v19, %v2199_v19 }
0x1327   :  { %v2202_v25 = vmul.f32 %v2198_v24, %v2198_v24 }
0x1328   :  { %v2213_v26 = vsel %vm93_vm0, %v2203_v58, 0.0 }
0x1329   :  { %2214 = vadd.xlane.f32.xlu1 %v2213_v26  ;;  %v2210_v28 = vsel %vm93_vm0, %v2202_v25, 0.0 }
0x132a   :  { %2211 = vadd.xlane.f32.xlu0 %v2210_v28 }
0x1370   :  { %v5499_v30 = vpop.f32.mrb[34].mxu1 }
0x1371   :  { %v2351_v33 = vadd.f32 %v5499_v30, %v5000_v29  ;;  %v2345_v34 = vpop.f32.mrb[35].mxu1 }
0x1372   :  { %v2346_v37 = vadd.f32 %v5000_v29, %v2345_v34 }
0x1373   :  { %v2369_v2 = vmul.f32 0.044715, %v2351_v33  ;;  %v2365_v8 = vmul.f32 0.5, %v2351_v33 }
0x1374   :  { %v2368_v56 = vmul.f32 0.044715, %v2346_v37  ;;  %v2364_v41 = vmul.f32 0.5, %v2346_v37 }
0x1375   :  { %v2373_v38 = vmul.f32 %v2369_v2, %v2351_v33 }
0x1376   :  { %v2372_v32 = vmul.f32 %v2368_v56, %v2346_v37 }
0x1377   :  { %v2377_v12 = vmul.f32 %v2373_v38, %v2351_v33 }
0x1378   :  { %v2376_v31 = vmul.f32 %v2372_v32, %v2346_v37 }
0x1379   :  { %v2381_v43 = vadd.f32 %v2377_v12, %v2351_v33 }
0x137a   :  { %v2380_v45 = vadd.f32 %v2376_v31, %v2346_v37 }
0x137b   :  { %v2385_v50 = vmul.f32 0.7978846, %v2381_v43 }
0x137c   :  { %v2384_v15 = vmul.f32 0.7978846, %v2380_v45 }
0x137d   :  { %6319 = vtanh.f32 %v2385_v50 }
0x137e   :  { %6321 = vtanh.f32 %v2384_v15 }
0x1387   :  { %v6320_v47 = vpop.eup %6319 }
0x1388   :  { %v6322_v42 = vpop.eup %6321  ;;  %v2393_v46 = vadd.f32 1.0, %v6320_v47 }
0x1389   :  { %v2392_v57 = vadd.f32 1.0, %v6322_v42 }
0x138a   :  { %v2397_v3 = vmul.f32 %v2393_v46, %v2365_v8 }
0x138b   :  { %v2396_v48 = vmul.f32 %v2392_v57, %v2364_v41 }
0x138d   :  { %5535 = vmatprep.mubr.f32.mxu0 %v2396_v48  ;;  %v5011_v48 = vld [vmem:[%s7762_s5 + $0x88] sm:$0xff] }
0x138e   :  { %5536 = vmatmul.mubr.f32.vlgmr.msra.gmra.mrb[18].mxu0 %v2397_v3  ;;  %v5013_v3 = vld [vmem:[%s7762_s5 + $0x98] sm:$0xff] }
0x13b6   :  { %v2215_v51 = vpop.xlane.xlu1 %2214 }
0x13b7   :  { %v2219_v53 = vmul.f32 0.015625, %v2215_v51  ;;  %v2212_v55 = vpop.xlane.xlu0 %2211  ;;  %v5931_v51 = vpack.c.bf16 %v5013_v3, %v5011_v48  ;;  %v5026_v3 = vld [vmem:[%s7763_s6 + $0x2] sm:$0x3]  ;;  %s7785_s6 = smov 80  }
0x13b8   :  { %v2218_v59 = vmul.f32 0.015625, %v2212_v55  ;;  %v5012_v55 = vld [vmem:[%s7762_s5 + $0x90] sm:$0xff] }
0x13b9   :  { %v2223_v52 = vadd.f32 1e-06, %v2219_v53  ;;  %v5010_v53 = vld [vmem:[%s7762_s5 + $0x80] sm:$0xff]  ;;  %5932 = vmatprep.subr.bf16.mxu1 %v5931_v51 }
0x13ba   :  { %v2222_v60 = vadd.f32 1e-06, %v2218_v59  ;;  %v5933_v59 = vpack.c.bf16 %v5012_v55, %v5010_v53  ;;  %v7301_v53 = vrot.slane %v5026_v3, %v286_v18 }
0x13bb   :  { %6323 = vrsqrt.f32 %v2223_v52  ;;  %v5015_v52 = vld [vmem:[%s7762_s5 + $0xa8] sm:$0xff] }
0x13bc   :  { %6325 = vrsqrt.f32 %v2222_v60  ;;  %v5017_v60 = vld [vmem:[%s7762_s5 + $0xb8] sm:$0xff]  ;;  %5934 = vmatpush1.bf16.msra.mxu1 %v5933_v59  ;;  %v7305_v59 = vrot.slane %v5026_v3, %v290_v21 }
0x13c5   :  { %v6324_v61 = vpop.eup %6323 }
0x13c6   :  { %v6326_v62 = vpop.eup %6325  ;;  %v2231_v63 = vmul.f32 %v6324_v61, %v2199_v19  ;;  %v5935_v61 = vpack.c.bf16 %v5017_v60, %v5015_v52 }
0x13c7   :  { %v2230_v4 = vmul.f32 %v6326_v62, %v2198_v24  ;;  %v5014_v62 = vld [vmem:[%s7762_s5 + $0xa0] sm:$0xff] }
0x13c8   :  { %v2241_v1 = vmul.f32 %v7114_v35, %v2231_v63  ;;  %v5016_v63 = vld [vmem:[%s7762_s5 + $0xb0] sm:$0xff]  ;;  %5936 = vmatprep.subr.bf16.mxu1 %v5935_v61 }
0x13c9   :  { %v2240_v27 = vmul.f32 %v7114_v35, %v2230_v4  ;;  %v5937_v4 = vpack.c.bf16 %v5016_v63, %v5014_v62 }
0x13ca   :  { %v2251_v6 = vadd.f32 %v7119_v36, %v2241_v1  ;;  %v5019_v1 = vld [vmem:[%s7762_s5 + $0xc8] sm:$0xff] }
0x13cb   :  { %v2250_v20 = vadd.f32 %v7119_v36, %v2240_v27  ;;  %v5021_v27 = vld [vmem:[%s7762_s5 + $0xd8] sm:$0xff]  ;;  %5938 = vmatpush1.bf16.msra.mxu1 %v5937_v4 }
0x13cd   :  { %5500 = vmatprep.mubr.msk.f32.mxu1 %vm93_vm0, %v2250_v20  ;;  %v5939_v20 = vpack.c.bf16 %v5021_v27, %v5019_v1 }
0x13ce   :  { %5501 = vmatmul.mubr.msk.f32.gmra.mrb[36].mxu1 %vm93_vm0, %v2251_v6  ;;  %v5018_v6 = vld [vmem:[%s7762_s5 + $0xc0] sm:$0xff] }
0x13cf   :  { %2694 = vmatprep.mubr.f32.mxu1 %v6452_v40  ;;  %5940 = vmatprep.subr.bf16.mxu1 %v5939_v20 }
0x1461   :  { %v5537_v0 = vpop.f32.mrb[18].mxu0 }
0x1462   :  { %v2495_v9 = vadd.f32 %v5537_v0, %v7204_v7  ;;  %v2489_v5 = vpop.f32.mrb[19].mxu0  ;;  %v5020_v0 = vld [vmem:[%s7762_s5 + $0xd0] sm:$0xff] }
0x1463   :  { %v2490_v35 = vadd.f32 %v7204_v7, %v2489_v5  ;;  %v5023_v5 = vld [vmem:[%s7762_s5 + $0xe8] sm:$0xff] }
0x1464   :  { %v7209_v10 = vadd.f32 %v2495_v9, %v7069_v14  ;;  %v5941_v9 = vpack.c.bf16 %v5020_v0, %v5018_v6 }
0x1465   :  { %v7212_v36 = vadd.f32 %v2490_v35, %v7061_v44  ;;  %v5025_v35 = vld [vmem:[%s7762_s5 + $0xf8] sm:$0xff] }
0x1466   :  { %v2519_v11 = vsel %vm93_vm0, %v7209_v10, 0.0  ;;  %5942 = vmatpush1.bf16.msra.mxu1 %v5941_v9 }
0x1467   :  { %2520 = vadd.xlane.f32.xlu1 %v2519_v11  ;;  %v2516_v13 = vsel %vm93_vm0, %v7212_v36, 0.0  ;;  %v5943_v11 = vpack.c.bf16 %v5025_v35, %v5023_v5 }
0x1468   :  { %2517 = vadd.xlane.f32.xlu0 %v2516_v13  ;;  %v5022_v13 = vld [vmem:[%s7762_s5 + $0xe0] sm:$0xff] }
0x1469   :  { %5944 = vmatprep.subr.bf16.mxu1 %v5943_v11 }
0x14a1   :  { %v5502_v16 = vpop.f32.mrb[36].mxu1 }
0x14a2   :  { %v2361_v22 = vadd.f32 %v5502_v16, %v5000_v29  ;;  %v2355_v54 = vpop.f32.mrb[37].mxu1  ;;  %v5024_v16 = vld [vmem:[%s7762_s5 + $0xf0] sm:$0xff] }
0x14a3   :  { %v2356_v19 = vadd.f32 %v5000_v29, %v2355_v54 }
0x14a4   :  { %v2371_v24 = vmul.f32 0.044715, %v2361_v22  ;;  %v2367_v12 = vmul.f32 0.5, %v2361_v22 }
0x14a5   :  { %v2370_v58 = vmul.f32 0.044715, %v2356_v19  ;;  %v2366_v38 = vmul.f32 0.5, %v2356_v19 }
0x14a6   :  { %v2375_v25 = vmul.f32 %v2371_v24, %v2361_v22 }
0x14a7   :  { %v2374_v14 = vmul.f32 %v2370_v58, %v2356_v19 }
0x14a8   :  { %v2379_v26 = vmul.f32 %v2375_v25, %v2361_v22 }
0x14a9   :  { %v2378_v28 = vmul.f32 %v2374_v14, %v2356_v19 }
0x14aa   :  { %v2383_v44 = vadd.f32 %v2379_v26, %v2361_v22  ;;  %v5945_v22 = vpack.c.bf16 %v5024_v16, %v5022_v13 }
0x14ab   :  { %v2382_v30 = vadd.f32 %v2378_v28, %v2356_v19 }
0x14ac   :  { %v2387_v33 = vmul.f32 0.7978846, %v2383_v44  ;;  %5946 = vmatpush1.bf16.msra.mxu1 %v5945_v22 }
0x14ad   :  { %v2386_v34 = vmul.f32 0.7978846, %v2382_v30 }
0x14ae   :  { %6327 = vtanh.f32 %v2387_v33 }
0x14af   :  { %6329 = vtanh.f32 %v2386_v34 }
0x14b8   :  { %v6328_v37 = vpop.eup %6327 }
0x14b9   :  { %v6330_v2 = vpop.eup %6329  ;;  %v2395_v56 = vadd.f32 1.0, %v6328_v37 }
0x14ba   :  { %v2394_v32 = vadd.f32 1.0, %v6330_v2 }
0x14bb   :  { %v2399_v29 = vmul.f32 %v2395_v56, %v2367_v12 }
0x14bc   :  { %v2398_v31 = vmul.f32 %v2394_v32, %v2366_v38  ;;  %v5008_v32 = vld [vmem:[%s7760_s3 + $0x1] ss:$0 sm:$0xff] }
0x14be   :  { %5538 = vmatprep.mubr.f32.mxu0 %v2398_v31 }
0x14bf   :  { %5539 = vmatmul.mubr.f32.gmra.mrb[20].mxu0 %v2399_v29 }
0x14f4   :  { %v2521_v43 = vpop.xlane.xlu1 %2520 }
0x14f5   :  { %v2529_v45 = vmul.f32 0.015625, %v2521_v43  ;;  %v2518_v50 = vpop.xlane.xlu0 %2517 }
0x14f6   :  { %v2528_v15 = vmul.f32 0.015625, %v2518_v50 }
0x14f7   :  { %v2533_v47 = vsub.f32 %v7209_v10, %v2529_v45 }
0x14f8   :  { %v2532_v42 = vsub.f32 %v7212_v36, %v2528_v15 }
0x14f9   :  { %v2537_v46 = vmul.f32 %v2533_v47, %v2533_v47 }
0x14fa   :  { %v2536_v41 = vmul.f32 %v2532_v42, %v2532_v42 }
0x14fb   :  { %v2543_v57 = vsel %vm93_vm0, %v2537_v46, 0.0 }
0x14fc   :  { %2544 = vadd.xlane.f32.xlu1 %v2543_v57  ;;  %v2540_v8 = vsel %vm93_vm0, %v2536_v41, 0.0 }
0x14fd   :  { %2541 = vadd.xlane.f32.xlu0 %v2540_v8 }
0x1589   :  { %v2545_v54 = vpop.xlane.xlu1 %2544 }
0x158a   :  { %v2553_v19 = vmul.f32 0.015625, %v2545_v54  ;;  %v2542_v24 = vpop.xlane.xlu0 %2541 }
0x158b   :  { %v2552_v58 = vmul.f32 0.015625, %v2542_v24 }
0x158c   :  { %v2557_v25 = vadd.f32 1e-06, %v2553_v19 }
0x158d   :  { %v2556_v14 = vadd.f32 1e-06, %v2552_v58 }
0x158e   :  { %6331 = vrsqrt.f32 %v2557_v25 }
0x158f   :  { %6333 = vrsqrt.f32 %v2556_v14 }
0x1592   :  { %v5540_v26 = vpop.f32.mrb[20].mxu0 }
0x1593   :  { %v2505_v28 = vadd.f32 %v5540_v26, %v7204_v7  ;;  %v2499_v44 = vpop.f32.mrb[21].mxu0 }
0x1594   :  { %v2500_v30 = vadd.f32 %v7204_v7, %v2499_v44 }
0x1595   :  { %v7273_v33 = vadd.f32 %v2505_v28, %v7127_v49 }
0x1596   :  { %v7276_v34 = vadd.f32 %v2500_v30, %v7130_v23  ;;  %v5009_v23 = vld [vmem:[%s7761_s4 + $0x1] ss:$0 sm:$0xff] }
0x1597   :  { %v2525_v37 = vsel %vm93_vm0, %v7273_v33, 0.0 }
0x1598   :  { %v6332_v2 = vpop.eup %6331  ;;  %2526 = vadd.xlane.f32.xlu1 %v2525_v37  ;;  %v2522_v56 = vsel %vm93_vm0, %v7276_v34, 0.0 }
0x1599   :  { %v6334_v38 = vpop.eup %6333  ;;  %2523 = vadd.xlane.f32.xlu0 %v2522_v56  ;;  %v2565_v49 = vmul.f32 %v6332_v2, %v2533_v47 }
0x159a   :  { %v2564_v7 = vmul.f32 %v6334_v38, %v2532_v42 }
0x159b   :  { %v2575_v29 = vmul.f32 %v5008_v32, %v2565_v49 }
0x159c   :  { %v2574_v12 = vmul.f32 %v5008_v32, %v2564_v7 }
0x159d   :  { %v2585_v43 = vadd.f32 %v5009_v23, %v2575_v29 }
0x159e   :  { %v2584_v31 = vadd.f32 %v5009_v23, %v2574_v12 }
0x15a0   :  { %5027 = vmatmul.mubr.msk.f32.vlgmr.msra.gmra.mrb[38].mxu1 %vm93_vm0, %v2584_v31 }
0x15a1   :  { %2700 = vmatprep.mubr.f32.mxu1 %v6452_v40 }
0x15a4   :  { %5028 = vmatmul.mubr.msk.f32.gmra.mrb[40].mxu1 %vm93_vm0, %v2585_v43 }
0x15a5   :  { %2706 = vmatprep.mubr.f32.mxu1 %v6452_v40 }
0x1625   :  { %v2527_v45 = vpop.xlane.xlu1 %2526 }
0x1626   :  { %v2531_v50 = vmul.f32 0.015625, %v2527_v45  ;;  %v2524_v15 = vpop.xlane.xlu0 %2523 }
0x1627   :  { %v2530_v47 = vmul.f32 0.015625, %v2524_v15 }
0x1628   :  { %v2535_v42 = vsub.f32 %v7273_v33, %v2531_v50 }
0x1629   :  { %v2534_v46 = vsub.f32 %v7276_v34, %v2530_v47 }
0x162a   :  { %v2539_v41 = vmul.f32 %v2535_v42, %v2535_v42 }
0x162b   :  { %v2538_v57 = vmul.f32 %v2534_v46, %v2534_v46 }
0x162c   :  { %v2549_v8 = vsel %vm93_vm0, %v2539_v41, 0.0 }
0x162d   :  { %2550 = vadd.xlane.f32.xlu1 %v2549_v8  ;;  %v2546_v48 = vsel %vm93_vm0, %v2538_v57, 0.0 }
0x162e   :  { %2547 = vadd.xlane.f32.xlu0 %v2546_v48 }
0x1673   :  { %v2696_v51 = vpop.f32.mrb[38].mxu1 }
0x1674   :  { %v2698_v55 = vpop.f32.mrb[39].mxu1  ;;  %v7308_v60 = vadd.f32 %v2696_v51, %v7301_v53 }
0x1675   :  { %v2699_v63 = vadd.f32 %v2698_v55, %v7305_v59 }
0x1677   :  { %v2702_v52 = vpop.f32.mrb[40].mxu1 }
0x1678   :  { %v7311_v61 = vadd.f32 %v2702_v52, %v7301_v53  ;;  %v2704_v62 = vpop.f32.mrb[41].mxu1 }
0x1679   :  { %v2705_v4 = vadd.f32 %v2704_v62, %v7305_v59 }
0x167a   :  { %v7317_v18 = vpack.i.bf16 %v7311_v61, %v7308_v60 }
0x167b   :  { %v5953_v1 = vpack.c.bf16 %v2705_v4, %v2699_v63  ;;  %v7319_v17 = vpack.i.bf16 %v2705_v4, %v2699_v63 }
0x167c   :  { %6179 = vrot.lane.b32.xlu1 %v7317_v18, %s6455_s21  ;;  %6174 = vrot.lane.b32.xlu0 %v7317_v18, %s6453_s1 }
0x1680   :  { %2913 = vrot.lane.b32.xlu1 %v7308_v60, %s6454_s20  ;;  %2915 = vrot.lane.b32.xlu0 %v7311_v61, %s6454_s20 }
0x1684   :  { %6184 = vrot.lane.b32.xlu1 %v7317_v18, %s6456_s22  ;;  %3119 = vrot.lane.b32.xlu0 %v7311_v61, %s6458_s24 }
0x1688   :  { %3117 = vrot.lane.b32.xlu1 %v7308_v60, %s6458_s24 }
0x16ba   :  { %v2551_v21 = vpop.xlane.xlu1 %2550 }
0x16bb   :  { %v2555_v27 = vmul.f32 0.015625, %v2551_v21  ;;  %v2548_v20 = vpop.xlane.xlu0 %2547 }
0x16bc   :  { %v2554_v6 = vmul.f32 0.015625, %v2548_v20 }
0x16bd   :  { %v2559_v0 = vadd.f32 1e-06, %v2555_v27 }
0x16be   :  { %v2558_v9 = vadd.f32 1e-06, %v2554_v6 }
0x16bf   :  { %6335 = vrsqrt.f32 %v2559_v0 }
0x16c0   :  { %6337 = vrsqrt.f32 %v2558_v9 }
0x16c9   :  { %v6336_v5 = vpop.eup %6335 }
0x16ca   :  { %v6338_v35 = vpop.eup %6337  ;;  %v2567_v13 = vmul.f32 %v6336_v5, %v2535_v42 }
0x16cb   :  { %v2566_v11 = vmul.f32 %v6338_v35, %v2534_v46 }
0x16cc   :  { %v2577_v54 = vmul.f32 %v5008_v32, %v2567_v13 }
0x16cd   :  { %v2576_v16 = vmul.f32 %v5008_v32, %v2566_v11 }
0x16ce   :  { %v2587_v19 = vadd.f32 %v5009_v23, %v2577_v54 }
0x16cf   :  { %v2586_v22 = vadd.f32 %v5009_v23, %v2576_v16 }
0x16d1   :  { %5029 = vmatmul.mubr.msk.f32.gmra.mrb[42].mxu1 %vm93_vm0, %v2586_v22 }
0x16d2   :  { %2712 = vmatprep.mubr.f32.mxu1 %v6452_v40 }
0x16d5   :  { %5030 = vmatmul.mubr.msk.f32.gmra.mrb[44].mxu1 %vm93_vm0, %v2587_v19 }
0x16d6   :  { %5545 = vmatprep.mubr.msk.f32.mxu1 %vm401_vm1, %v7308_v60 }
0x16ee   :  { %v6180_v24 = vpop.permute.xlu1 %6179  ;;  %v6175_v58 = vpop.permute.xlu0 %6174 }
0x16ef   :  { %v6182_v25 = vunpack.i.h.bf16 %v6180_v24  ;;  %v6181_v14 = vunpack.i.l.bf16 %v6180_v24  ;;  %v6177_v26 = vunpack.i.h.bf16 %v6175_v58  ;;  %v6176_v28 = vunpack.i.l.bf16 %v6175_v58 }
0x16f1   :  { %v5957_v44 = vpack.c.bf16 %v6182_v25, %v6181_v14  ;;  %v5947_v30 = vpack.c.bf16 %v6177_v26, %v6176_v28 }
0x16f2   :  { %v2914_v37 = vpop.permute.xlu1 %2913  ;;  %v2916_v7 = vpop.permute.xlu0 %2915 }
0x16f3   :  { %5949 = vmatprep.subr.msk.bf16.mxu1 %vm6803_vm2, %v5947_v30  ;;  %5959 = vmatprep.subr.msk.bf16.mxu0 %vm6803_vm2, %v5957_v44 }
0x16f4   :  { %5559 = vmatprep.mubr.msk.f32.mxu0 %vm401_vm1, %v2914_v37  ;;  %5952 = vmatpush3.bf16.xpose.msk.msra.mxu1 %vm6803_vm2, %v5947_v30 }
0x16f5   :  { %5962 = vmatpush3.bf16.xpose.msk.msra.mxu0 %vm6803_vm2, %v5957_v44  ;;  %5954 = vmatprep.subr.bf16.mxu1 %v5953_v1 }
0x16f6   :  { %v6185_v40 = vpop.permute.xlu1 %6184  ;;  %v3120_v49 = vpop.permute.xlu0 %3119 }
0x16f7   :  { %v6187_v2 = vunpack.i.h.bf16 %v6185_v40  ;;  %v6186_v56 = vunpack.i.l.bf16 %v6185_v40 }
0x16f9   :  { %v5967_v38 = vpack.c.bf16 %v6187_v2, %v6186_v56 }
0x16fa   :  { %v3118_v32 = vpop.permute.xlu1 %3117 }
0x16fb   :  { %5546 = vmatmul.mubr.msk.f32.vlgmr.msra.gmra.mrb[46].mxu1 %vm401_vm1, %v7311_v61  ;;  %5969 = vmatprep.subr.msk.bf16.mxu0 %vm6803_vm2, %v5967_v38 }
0x16fc   :  { %5560 = vmatmul.mubr.msk.f32.vlgmr.msra.gmra.mrb[22].mxu0 %vm401_vm1, %v2916_v7  ;;  %5956 = vmatpush3.bf16.msra.mxu1 %v5953_v1 }
0x16fd   :  { %5972 = vmatpush3.bf16.xpose.msk.msra.mxu0 %vm6803_vm2, %v5967_v38  ;;  %5573 = vmatprep.mubr.msk.f32.mxu0 %vm401_vm1, %v3118_v32 }
0x1704   :  { %5574 = vmatmul.mubr.msk.f32.vlgmr.msra.gmra.mrb[24].mxu0 %vm401_vm1, %v3120_v49 }
0x17a4   :  { %v7358_v23 = vpop.f32.mrb[42].mxu1 }
0x17a5   :  { %v2710_v12 = vpop.f32.mrb[43].mxu1 }
0x17a6   :  { %v2711_v43 = vadd.f32 %v2710_v12, %v7305_v59 }
0x17a8   :  { %v7360_v31 = vpop.f32.mrb[44].mxu1 }
0x17a9   :  { %v2716_v29 = vpop.f32.mrb[45].mxu1 }
0x17aa   :  { %v2717_v45 = vadd.f32 %v2716_v29, %v7305_v59 }
0x17ac   :  { %v7364_v50 = vpack.c.bf16 %v2717_v45, %v2711_v43  ;;  %v7366_v15 = vpack.i.bf16 %v2717_v45, %v2711_v43 }
0x17ce   :  { %v5547_v47 = vpop.f32.mrb[46].mxu1 }
0x17cf   :  { %v2809_v42 = vmul.f32 0.25, %v5547_v47  ;;  %v5561_v46 = vpop.f32.mrb[22].mxu0  ;;  %v2799_v41 = vpop.f32.mrb[47].mxu1 }
0x17d0   :  { %v2808_v57 = vmul.f32 0.25, %v2799_v41  ;;  %v2995_v8 = vpop.f32.mrb[23].mxu0  ;;  %v3005_v55 = vmul.f32 0.25, %v5561_v46 }
0x17d1   :  { %v3004_v48 = vmul.f32 0.25, %v2995_v8  ;;  %v2813_v3 = vsel %vm401_vm1, %v2809_v42, -inf }
0x17d2   :  { %2814 = vmax.xlane.f32.xlu0 %v2813_v3  ;;  %v2810_v51 = vsel %vm401_vm1, %v2808_v57, -inf  ;;  %v3009_v1 = vsel %vm401_vm1, %v3005_v55, -inf }
0x17d3   :  { %2811 = vmax.xlane.f32.xlu1 %v2810_v51  ;;  %v3006_v59 = vsel %vm401_vm1, %v3004_v48, -inf }
0x17d6   :  { %3007 = vmax.xlane.f32.xlu0 %v3006_v59 }
0x17d7   :  { %v5575_v52 = vpop.f32.mrb[24].mxu0 }
0x17d8   :  { %v3199_v62 = vpop.f32.mrb[25].mxu0  ;;  %v3209_v63 = vmul.f32 0.25, %v5575_v52 }
0x17d9   :  { %v3208_v4 = vmul.f32 0.25, %v3199_v62 }
0x17da   :  { %3010 = vmax.xlane.f32.xlu0 %v3009_v1  ;;  %v3213_v27 = vsel %vm401_vm1, %v3209_v63, -inf }
0x17db   :  { %v3210_v21 = vsel %vm401_vm1, %v3208_v4, -inf }
0x17dc   :  { %3211 = vmax.xlane.f32.xlu1 %v3210_v21 }
0x17de   :  { %3214 = vmax.xlane.f32.xlu0 %v3213_v27 }
0x185f   :  { %v2815_v20 = vpop.xlane.xlu0 %2814 }
0x1860   :  { %v2812_v0 = vpop.xlane.xlu1 %2811  ;;  %v2817_v22 = vsub.f32 %v2809_v42, %v2815_v20 }
0x1861   :  { %v2816_v35 = vsub.f32 %v2808_v57, %v2812_v0 }
0x1862   :  { %v2820_v26 = vmul.f32 1.442695, %v2817_v22 }
0x1863   :  { %v3008_v6 = vpop.xlane.xlu0 %3007  ;;  %v2818_v24 = vmul.f32 1.442695, %v2816_v35 }
0x1864   :  { %v3012_v9 = vsub.f32 %v3004_v48, %v3008_v6 }
0x1866   :  { %v3014_v5 = vmul.f32 1.442695, %v3012_v9 }
0x1867   :  { %v3011_v11 = vpop.xlane.xlu0 %3010 }
0x1868   :  { %6339 = vpow2.f32 %v3014_v5  ;;  %v3013_v13 = vsub.f32 %v3005_v55, %v3011_v11 }
0x1869   :  { %v3212_v16 = vpop.xlane.xlu1 %3211 }
0x186a   :  { %v3016_v54 = vmul.f32 1.442695, %v3013_v13  ;;  %v3216_v19 = vsub.f32 %v3208_v4, %v3212_v16 }
0x186b   :  { %v3215_v58 = vpop.xlane.xlu0 %3214 }
0x186c   :  { %6341 = vpow2.f32 %v3016_v54  ;;  %v3218_v25 = vmul.f32 1.442695, %v3216_v19  ;;  %v3217_v14 = vsub.f32 %v3209_v63, %v3215_v58 }
0x186e   :  { %6343 = vpow2.f32 %v3218_v25  ;;  %v3220_v28 = vmul.f32 1.442695, %v3217_v14 }
0x186f   :  { %6345 = vpow2.f32 %v2818_v24 }
0x1870   :  { %6347 = vpow2.f32 %v3220_v28 }
0x1871   :  { %6349 = vpow2.f32 %v2820_v26 }
0x1872   :  { %v6340_v44 = vpop.eup %6339 }
0x1873   :  { %v3018_v30 = vsel %vm401_vm1, %v6340_v44, 0.0 }
0x1874   :  { %3019 = vadd.xlane.f32.xlu1 %v3018_v30 }
0x1876   :  { %v6342_v37 = vpop.eup %6341 }
0x1877   :  { %v3021_v40 = vsel %vm401_vm1, %v6342_v37, 0.0 }
0x1878   :  { %v6344_v2 = vpop.eup %6343  ;;  %3022 = vadd.xlane.f32.xlu0 %v3021_v40  ;;  %v7424_v40 = vadd.f32 %v7358_v23, %v7301_v53 }
0x1879   :  { %v6346_v56 = vpop.eup %6345  ;;  %v3222_v38 = vsel %vm401_vm1, %v6344_v2, 0.0 }
0x187a   :  { %v6348_v32 = vpop.eup %6347  ;;  %3223 = vadd.xlane.f32.xlu1 %v3222_v38  ;;  %v2822_v12 = vsel %vm401_vm1, %v6346_v56, 0.0 }
0x187b   :  { %v3225_v7 = vsel %vm401_vm1, %v6348_v32, 0.0  ;;  %v6350_v49 = vpop.eup %6349 }
0x187c   :  { %3226 = vadd.xlane.f32.xlu0 %v3225_v7  ;;  %v2825_v29 = vsel %vm401_vm1, %v6350_v49, 0.0 }
0x187e   :  { %2823 = vadd.xlane.f32.xlu1 %v2822_v12 }
0x1880   :  { %2826 = vadd.xlane.f32.xlu0 %v2825_v29 }
0x188f   :  { %6189 = vrot.lane.b32.xlu1 %v7319_v17, %s6454_s20 }
0x1893   :  { %6199 = vrot.lane.b32.xlu1 %v7317_v18, %s6457_s23 }
0x1896   :  { %6194 = vrot.lane.b32.xlu0 %v7319_v17, %s6458_s24 }
0x1897   :  { %3319 = vrot.lane.b32.xlu1 %v7308_v60, %s7785_s6 }
0x189b   :  { %3321 = vrot.lane.b32.xlu1 %v7311_v61, %s7785_s6 }
0x1901   :  { %v3020_v43 = vpop.xlane.xlu1 %3019 }
0x1905   :  { %v3023_v45 = vpop.xlane.xlu0 %3022 }
0x1907   :  { %v3224_v47 = vpop.xlane.xlu1 %3223 }
0x1909   :  { %v3227_v42 = vpop.xlane.xlu0 %3226 }
0x190b   :  { %v2824_v46 = vpop.xlane.xlu1 %2823 }
0x190c   :  { %6351 = vrcp.f32 %v2824_v46 }
0x190d   :  { %6353 = vrcp.f32 %v3020_v43  ;;  %v2827_v41 = vpop.xlane.xlu0 %2826 }
0x190e   :  { %6355 = vrcp.f32 %v2827_v41 }
0x190f   :  { %v6190_v57 = vpop.permute.xlu1 %6189  ;;  %6357 = vrcp.f32 %v3023_v45 }
0x1910   :  { %v6192_v18 = vunpack.i.h.bf16 %v6190_v57  ;;  %v6191_v8 = vunpack.i.l.bf16 %v6190_v57  ;;  %6359 = vrcp.f32 %v3224_v47 }
0x1911   :  { %6361 = vrcp.f32 %v3227_v42  ;;  %v6195_v60 = vpop.permute.xlu0 %6194 }
0x1912   :  { %v5963_v48 = vpack.c.bf16 %v6192_v18, %v6191_v8  ;;  %v6197_v51 = vunpack.i.h.bf16 %v6195_v60  ;;  %v6196_v55 = vunpack.i.l.bf16 %v6195_v60 }
0x1913   :  { %v6200_v62 = vpop.permute.xlu1 %6199 }
0x1914   :  { %5964 = vmatprep.subr.bf16.mxu1 %v5963_v48  ;;  %v5973_v27 = vpack.c.bf16 %v6197_v51, %v6196_v55  ;;  %v6202_v20 = vunpack.i.h.bf16 %v6200_v62  ;;  %v6201_v6 = vunpack.i.l.bf16 %v6200_v62 }
0x1916   :  { %v6352_v3 = vpop.eup %6351  ;;  %v5977_v35 = vpack.c.bf16 %v6202_v20, %v6201_v6 }
0x1917   :  { %v6354_v61 = vpop.eup %6353  ;;  %v2830_v59 = vmul.f32 %v6352_v3, %v6346_v56  ;;  %v3320_v13 = vpop.permute.xlu1 %3319 }
0x1918   :  { %v6356_v52 = vpop.eup %6355  ;;  %v3026_v1 = vmul.f32 %v6354_v61, %v6340_v44 }
0x1919   :  { %v2831_v63 = vmul.f32 %v6356_v52, %v6350_v49  ;;  %5552 = vmatprep.mubr.msk.f32.mxu1 %vm401_vm1, %v2830_v59  ;;  %v6358_v4 = vpop.eup %6357 }
0x191a   :  { %v6360_v21 = vpop.eup %6359  ;;  %v3027_v0 = vmul.f32 %v6358_v4, %v6342_v37  ;;  %v7420_v37 = vadd.f32 %v7360_v31, %v7301_v53 }
0x191b   :  { %5553 = vmatmul.mubr.msk.f32.vlgmr.msra.gmra.mrb[48].mxu1 %vm401_vm1, %v2831_v63  ;;  %v6362_v9 = vpop.eup %6361  ;;  %v3230_v5 = vmul.f32 %v6360_v21, %v6344_v2  ;;  %v3322_v16 = vpop.permute.xlu1 %3321 }
0x191c   :  { %5966 = vmatpush3.bf16.msra.mxu1 %v5963_v48  ;;  %5566 = vmatprep.mubr.msk.f32.mxu1 %vm401_vm1, %v3026_v1  ;;  %v3231_v11 = vmul.f32 %v6362_v9, %v6348_v32  ;;  %v7428_v2 = vpack.i.bf16 %v7420_v37, %v7424_v40 }
0x191d   :  { %5974 = vmatprep.subr.bf16.mxu1 %v5973_v27 }
0x191f   :  { %5567 = vmatmul.mubr.msk.f32.vlgmr.msra.gmra.mrb[50].mxu1 %vm401_vm1, %v3027_v0 }
0x1920   :  { %5976 = vmatpush3.bf16.msra.mxu1 %v5973_v27  ;;  %5580 = vmatprep.mubr.msk.f32.mxu1 %vm401_vm1, %v3230_v5 }
0x1921   :  { %5979 = vmatprep.subr.msk.bf16.mxu1 %vm6803_vm2, %v5977_v35 }
0x1923   :  { %5581 = vmatmul.mubr.msk.f32.vlgmr.msra.gmra.mrb[52].mxu1 %vm401_vm1, %v3231_v11 }
0x1924   :  { %5587 = vmatprep.mubr.msk.f32.mxu1 %vm401_vm1, %v3320_v13 }
0x1929   :  { %5982 = vmatpush3.bf16.xpose.msk.msra.mxu1 %vm6803_vm2, %v5977_v35 }
0x192a   :  { %5994 = vmatprep.subr.bf16.mxu1 %v7364_v50 }
0x1930   :  { %5588 = vmatmul.mubr.msk.f32.vlgmr.msra.gmra.mrb[54].mxu1 %vm401_vm1, %v3322_v16 }
0x1931   :  { %5996 = vmatpush3.bf16.msra.mxu1 %v7364_v50 }
0x19ee   :  { %v7404_v22 = vpop.f32.mrb[48].mxu1 }
0x19ef   :  { %v7406_v54 = vpop.f32.mrb[49].mxu1 }
0x19f2   :  { %v7408_v19 = vpop.f32.mrb[50].mxu1 }
0x19f3   :  { %v7410_v24 = vpop.f32.mrb[51].mxu1 }
0x19f6   :  { %v7412_v58 = vpop.f32.mrb[52].mxu1 }
0x19f7   :  { %v7414_v25 = vpop.f32.mrb[53].mxu1 }
0x1a03   :  { %v5589_v14 = vpop.f32.mrb[54].mxu1 }
0x1a04   :  { %v3411_v26 = vmul.f32 0.25, %v5589_v14  ;;  %v3401_v28 = vpop.f32.mrb[55].mxu1 }
0x1a05   :  { %v3410_v44 = vmul.f32 0.25, %v3401_v28 }
0x1a06   :  { %v3415_v30 = vsel %vm401_vm1, %v3411_v26, -inf }
0x1a07   :  { %3416 = vmax.xlane.f32.xlu1 %v3415_v30  ;;  %v3412_v50 = vsel %vm401_vm1, %v3410_v44, -inf }
0x1a08   :  { %3413 = vmax.xlane.f32.xlu0 %v3412_v50 }
0x1a18   :  { %6209 = vrot.lane.b32.xlu1 %v7428_v2, %s6453_s1 }
0x1a94   :  { %v3417_v56 = vpop.xlane.xlu1 %3416 }
0x1a95   :  { %v3419_v38 = vsub.f32 %v3411_v26, %v3417_v56  ;;  %v3414_v32 = vpop.xlane.xlu0 %3413 }
0x1a96   :  { %v3418_v7 = vsub.f32 %v3410_v44, %v3414_v32 }
0x1a97   :  { %v3422_v49 = vmul.f32 1.442695, %v3419_v38 }
0x1a98   :  { %v3420_v12 = vmul.f32 1.442695, %v3418_v7  ;;  %v6210_v47 = vpop.permute.xlu1 %6209 }
0x1a99   :  { %6363 = vpow2.f32 %v3422_v49  ;;  %v6212_v46 = vunpack.i.h.bf16 %v6210_v47  ;;  %v6211_v41 = vunpack.i.l.bf16 %v6210_v47 }
0x1a9a   :  { %6365 = vpow2.f32 %v3420_v12 }
0x1a9b   :  { %v5987_v48 = vpack.c.bf16 %v6212_v46, %v6211_v41 }
0x1aa3   :  { %v6364_v31 = vpop.eup %6363 }
0x1aa4   :  { %v3427_v29 = vsel %vm401_vm1, %v6364_v31, 0.0  ;;  %v6366_v53 = vpop.eup %6365 }
0x1aa5   :  { %3428 = vadd.xlane.f32.xlu0 %v3427_v29  ;;  %v3424_v23 = vsel %vm401_vm1, %v6366_v53, 0.0 }
0x1aa9   :  { %3425 = vadd.xlane.f32.xlu0 %v3424_v23 }
0x1abf   :  { %6204 = vrot.lane.b32.xlu0 %v7319_v17, %s7785_s6 }
0x1b32   :  { %v3429_v43 = vpop.xlane.xlu0 %3428 }
0x1b33   :  { %6367 = vrcp.f32 %v3429_v43 }
0x1b36   :  { %v3426_v45 = vpop.xlane.xlu0 %3425 }
0x1b37   :  { %6369 = vrcp.f32 %v3426_v45 }
0x1b3a   :  { %v6205_v42 = vpop.permute.xlu0 %6204 }
0x1b3b   :  { %v6207_v57 = vunpack.i.h.bf16 %v6205_v42  ;;  %v6206_v18 = vunpack.i.l.bf16 %v6205_v42 }
0x1b3d   :  { %v5983_v8 = vpack.c.bf16 %v6207_v57, %v6206_v18  ;;  %v6368_v60 = vpop.eup %6367 }
0x1b3e   :  { %v3433_v61 = vmul.f32 %v6368_v60, %v6364_v31 }
0x1b3f   :  { %5984 = vmatprep.subr.bf16.mxu0 %v5983_v8 }
0x1b40   :  { %5986 = vmatpush3.bf16.msra.mxu0 %v5983_v8 }
0x1b41   :  { %v6370_v3 = vpop.eup %6369  ;;  %5989 = vmatprep.subr.msk.bf16.mxu0 %vm6803_vm2, %v5987_v48 }
0x1b42   :  { %v3432_v17 = vmul.f32 %v6370_v3, %v6366_v53 }
0x1b44   :  { %5594 = vmatprep.mubr.msk.f32.mxu0 %vm401_vm1, %v3432_v17 }
0x1b45   :  { %5595 = vmatmul.mubr.msk.f32.vlgmr.msra.gmra.mrb[26].mxu0 %vm401_vm1, %v3433_v61 }
0x1b46   :  { %5601 = vmatprep.mubr.msk.f32.mxu0 %vm401_vm1, %v7424_v40 }
0x1b49   :  { %5992 = vmatpush3.bf16.xpose.msk.msra.mxu0 %vm6803_vm2, %v5987_v48 }
0x1b50   :  { %5602 = vmatmul.mubr.msk.f32.vlgmr.msra.gmra.mrb[28].mxu0 %vm401_vm1, %v7420_v37 }
0x1c18   :  { %v7446_v51 = vpop.f32.mrb[26].mxu0 }
0x1c19   :  { %v7448_v55 = vpop.f32.mrb[27].mxu0 }
0x1c23   :  { %v5603_v59 = vpop.f32.mrb[28].mxu0 }
0x1c24   :  { %v3641_v52 = vmul.f32 0.25, %v5603_v59  ;;  %v3631_v62 = vpop.f32.mrb[29].mxu0 }
0x1c25   :  { %v3640_v63 = vmul.f32 0.25, %v3631_v62 }
0x1c26   :  { %v3645_v4 = vsel %vm401_vm1, %v3641_v52, -inf }
0x1c27   :  { %3646 = vmax.xlane.f32.xlu0 %v3645_v4  ;;  %v3642_v1 = vsel %vm401_vm1, %v3640_v63, -inf }
0x1c28   :  { %3643 = vmax.xlane.f32.xlu1 %v3642_v1 }
0x1cb4   :  { %v3647_v21 = vpop.xlane.xlu0 %3646 }
0x1cb5   :  { %v3649_v27 = vsub.f32 %v3641_v52, %v3647_v21  ;;  %v3644_v20 = vpop.xlane.xlu1 %3643 }
0x1cb6   :  { %v3648_v6 = vsub.f32 %v3640_v63, %v3644_v20 }
0x1cb7   :  { %v3652_v0 = vmul.f32 1.442695, %v3649_v27 }
0x1cb8   :  { %v3650_v9 = vmul.f32 1.442695, %v3648_v6 }
0x1cb9   :  { %6371 = vpow2.f32 %v3652_v0 }
0x1cba   :  { %6373 = vpow2.f32 %v3650_v9 }
0x1cc3   :  { %v6372_v5 = vpop.eup %6371 }
0x1cc4   :  { %v6374_v35 = vpop.eup %6373  ;;  %v3657_v11 = vsel %vm401_vm1, %v6372_v5, 0.0 }
0x1cc5   :  { %3658 = vadd.xlane.f32.xlu1 %v3657_v11  ;;  %v3654_v13 = vsel %vm401_vm1, %v6374_v35, 0.0 }
0x1cc6   :  { %3655 = vadd.xlane.f32.xlu0 %v3654_v13 }
0x1cd6   :  { %3745 = vrot.lane.b32.xlu1 %v7424_v40, %s6454_s20 }
0x1cda   :  { %3747 = vrot.lane.b32.xlu1 %v7420_v37, %s6454_s20 }
0x1cdc   :  { %6214 = vrot.lane.b32.xlu0 %v7428_v2, %s6455_s21 }
0x1d52   :  { %v3659_v16 = vpop.xlane.xlu1 %3658 }
0x1d53   :  { %6375 = vrcp.f32 %v3659_v16  ;;  %v3656_v14 = vpop.xlane.xlu0 %3655 }
0x1d54   :  { %6377 = vrcp.f32 %v3656_v14 }
0x1d56   :  { %v3746_v7 = vpop.permute.xlu1 %3745 }
0x1d57   :  { %v6215_v26 = vpop.permute.xlu0 %6214 }
0x1d58   :  { %v6217_v28 = vunpack.i.h.bf16 %v6215_v26  ;;  %v6216_v44 = vunpack.i.l.bf16 %v6215_v26 }
0x1d5a   :  { %v5997_v30 = vpack.c.bf16 %v6217_v28, %v6216_v44  ;;  %v3748_v49 = vpop.permute.xlu1 %3747 }
0x1d5c   :  { %5999 = vmatprep.subr.msk.bf16.mxu1 %vm6803_vm2, %v5997_v30 }
0x1d5d   :  { %v6376_v50 = vpop.eup %6375 }
0x1d5e   :  { %v6378_v56 = vpop.eup %6377  ;;  %v3663_v32 = vmul.f32 %v6376_v50, %v6372_v5 }
0x1d5f   :  { %v3662_v38 = vmul.f32 %v6378_v56, %v6374_v35 }
0x1d61   :  { %5608 = vmatprep.mubr.msk.f32.mxu1 %vm401_vm1, %v3662_v38 }
0x1d62   :  { %5609 = vmatmul.mubr.msk.f32.vlgmr.msra.gmra.mrb[56].mxu1 %vm401_vm1, %v3663_v32 }
0x1d63   :  { %6002 = vmatpush3.bf16.xpose.msk.msra.mxu1 %vm6803_vm2, %v5997_v30  ;;  %5615 = vmatprep.mubr.msk.f32.mxu1 %vm401_vm1, %v3746_v7 }
0x1d6a   :  { %5616 = vmatmul.mubr.msk.f32.vlgmr.msra.gmra.mrb[58].mxu1 %vm401_vm1, %v3748_v49 }
0x1e35   :  { %v7468_v12 = vpop.f32.mrb[56].mxu1 }
0x1e36   :  { %v7470_v31 = vpop.f32.mrb[57].mxu1 }
0x1e3d   :  { %v5617_v29 = vpop.f32.mrb[58].mxu1 }
0x1e3e   :  { %v3837_v53 = vmul.f32 0.25, %v5617_v29  ;;  %v3827_v23 = vpop.f32.mrb[59].mxu1 }
0x1e3f   :  { %v3836_v43 = vmul.f32 0.25, %v3827_v23 }
0x1e40   :  { %v3841_v45 = vsel %vm401_vm1, %v3837_v53, -inf }
0x1e41   :  { %3842 = vmax.xlane.f32.xlu0 %v3841_v45  ;;  %v3838_v47 = vsel %vm401_vm1, %v3836_v43, -inf }
0x1e42   :  { %3839 = vmax.xlane.f32.xlu1 %v3838_v47 }
0x1e53   :  { %6219 = vrot.lane.b32.xlu1 %v7366_v15, %s6454_s20 }
0x1e57   :  { %3949 = vrot.lane.b32.xlu1 %v7424_v40, %s6458_s24 }
0x1e5b   :  { %3951 = vrot.lane.b32.xlu1 %v7420_v37, %s6458_s24 }
0x1ece   :  { %v3843_v42 = vpop.xlane.xlu0 %3842 }
0x1ecf   :  { %v3845_v46 = vsub.f32 %v3837_v53, %v3843_v42  ;;  %v3840_v41 = vpop.xlane.xlu1 %3839 }
0x1ed0   :  { %v3844_v57 = vsub.f32 %v3836_v43, %v3840_v41 }
0x1ed1   :  { %v3848_v18 = vmul.f32 1.442695, %v3845_v46 }
0x1ed2   :  { %v3846_v8 = vmul.f32 1.442695, %v3844_v57 }
0x1ed3   :  { %6379 = vpow2.f32 %v3848_v18  ;;  %v6220_v48 = vpop.permute.xlu1 %6219 }
0x1ed4   :  { %v6222_v60 = vunpack.i.h.bf16 %v6220_v48  ;;  %v6221_v3 = vunpack.i.l.bf16 %v6220_v48  ;;  %6381 = vpow2.f32 %v3846_v8 }
0x1ed6   :  { %v6003_v17 = vpack.c.bf16 %v6222_v60, %v6221_v3 }
0x1ed7   :  { %v3950_v35 = vpop.permute.xlu1 %3949 }
0x1ed8   :  { %6004 = vmatprep.subr.bf16.mxu0 %v6003_v17 }
0x1ed9   :  { %6006 = vmatpush3.bf16.msra.mxu0 %v6003_v17 }
0x1edb   :  { %v3952_v11 = vpop.permute.xlu1 %3951 }
0x1edd   :  { %v6380_v61 = vpop.eup %6379 }
0x1ede   :  { %v3853_v59 = vsel %vm401_vm1, %v6380_v61, 0.0  ;;  %v6382_v52 = vpop.eup %6381 }
0x1edf   :  { %3854 = vadd.xlane.f32.xlu0 %v3853_v59  ;;  %v3850_v62 = vsel %vm401_vm1, %v6382_v52, 0.0 }
0x1ee3   :  { %3851 = vadd.xlane.f32.xlu0 %v3850_v62 }
0x1ef9   :  { %6224 = vrot.lane.b32.xlu0 %v7428_v2, %s6456_s22 }
0x1f6c   :  { %v3855_v63 = vpop.xlane.xlu0 %3854 }
0x1f6d   :  { %6383 = vrcp.f32 %v3855_v63 }
0x1f70   :  { %v3852_v4 = vpop.xlane.xlu0 %3851 }
0x1f71   :  { %6385 = vrcp.f32 %v3852_v4 }
0x1f74   :  { %v6225_v1 = vpop.permute.xlu0 %6224 }
0x1f75   :  { %v6227_v21 = vunpack.i.h.bf16 %v6225_v1  ;;  %v6226_v27 = vunpack.i.l.bf16 %v6225_v1 }
0x1f77   :  { %v6007_v20 = vpack.c.bf16 %v6227_v21, %v6226_v27  ;;  %v6384_v6 = vpop.eup %6383 }
0x1f78   :  { %v3859_v5 = vmul.f32 %v6384_v6, %v6380_v61 }
0x1f79   :  { %6009 = vmatprep.subr.msk.bf16.mxu0 %vm6803_vm2, %v6007_v20 }
0x1f7b   :  { %v6386_v0 = vpop.eup %6385 }
0x1f7c   :  { %v3858_v9 = vmul.f32 %v6386_v0, %v6382_v52 }
0x1f7e   :  { %5622 = vmatprep.mubr.msk.f32.mxu0 %vm401_vm1, %v3858_v9 }
0x1f7f   :  { %5623 = vmatmul.mubr.msk.f32.vlgmr.msra.gmra.mrb[30].mxu0 %vm401_vm1, %v3859_v5 }
0x1f80   :  { %6012 = vmatpush3.bf16.xpose.msk.msra.mxu0 %vm6803_vm2, %v6007_v20  ;;  %5629 = vmatprep.mubr.msk.f32.mxu0 %vm401_vm1, %v3950_v35 }
0x1f87   :  { %5630 = vmatmul.mubr.msk.f32.vlgmr.msra.gmra.mrb[32].mxu0 %vm401_vm1, %v3952_v11 }
0x2052   :  { %v7492_v13 = vpop.f32.mrb[30].mxu0 }
0x2053   :  { %v7494_v16 = vpop.f32.mrb[31].mxu0 }
0x205a   :  { %v5631_v14 = vpop.f32.mrb[32].mxu0 }
0x205b   :  { %v4041_v26 = vmul.f32 0.25, %v5631_v14  ;;  %v4031_v28 = vpop.f32.mrb[33].mxu0 }
0x205c   :  { %v4040_v44 = vmul.f32 0.25, %v4031_v28  ;;  %v5080_v28 = vld [vmem:[%s7764_s7 + $0x48] sm:$0xff] }
0x205d   :  { %v4045_v30 = vsel %vm401_vm1, %v4041_v26, -inf }
0x205e   :  { %4046 = vmax.xlane.f32.xlu0 %v4045_v30  ;;  %v4042_v50 = vsel %vm401_vm1, %v4040_v44, -inf }
0x205f   :  { %4043 = vmax.xlane.f32.xlu1 %v4042_v50 }
0x2070   :  { %6229 = vrot.lane.b32.xlu1 %v7366_v15, %s6458_s24 }
0x2074   :  { %4151 = vrot.lane.b32.xlu1 %v7424_v40, %s7785_s6 }
0x2078   :  { %4153 = vrot.lane.b32.xlu1 %v7420_v37, %s7785_s6 }
0x20eb   :  { %v4047_v56 = vpop.xlane.xlu0 %4046 }
0x20ec   :  { %v4049_v38 = vsub.f32 %v4041_v26, %v4047_v56  ;;  %v4044_v32 = vpop.xlane.xlu1 %4043  ;;  %v5079_v26 = vld [vmem:[%s7764_s7 + $0x40] sm:$0xff] }
0x20ed   :  { %v4048_v7 = vsub.f32 %v4040_v44, %v4044_v32  ;;  %v6027_v44 = vpack.c.bf16 %v5080_v28, %v5079_v26 }
0x20ee   :  { %v4052_v49 = vmul.f32 1.442695, %v4049_v38 }
0x20ef   :  { %v4050_v29 = vmul.f32 1.442695, %v4048_v7  ;;  %v5081_v7 = vld [vmem:[%s7764_s7 + $0x50] sm:$0xff] }
0x20f0   :  { %6387 = vpow2.f32 %v4052_v49  ;;  %v6230_v53 = vpop.permute.xlu1 %6229 }
0x20f1   :  { %v6232_v23 = vunpack.i.h.bf16 %v6230_v53  ;;  %v6231_v43 = vunpack.i.l.bf16 %v6230_v53  ;;  %6389 = vpow2.f32 %v4050_v29 }
0x20f3   :  { %v6013_v45 = vpack.c.bf16 %v6232_v23, %v6231_v43 }
0x20f4   :  { %v4152_v59 = vpop.permute.xlu1 %4151 }
0x20f5   :  { %6014 = vmatprep.subr.bf16.mxu1 %v6013_v45 }
0x20f6   :  { %6016 = vmatpush3.bf16.msra.mxu1 %v6013_v45 }
0x20fa   :  { %v6388_v47 = vpop.eup %6387 }
0x20fb   :  { %v4057_v40 = vsel %vm401_vm1, %v6388_v47, 0.0  ;;  %v6390_v42 = vpop.eup %6389 }
0x20fc   :  { %4058 = vadd.xlane.f32.xlu0 %v4057_v40  ;;  %v4054_v37 = vsel %vm401_vm1, %v6390_v42, 0.0  ;;  %v5084_v40 = vld [vmem:[%s7764_s7 + $0x68] sm:$0xff] }
0x2100   :  { %4055 = vadd.xlane.f32.xlu0 %v4054_v37  ;;  %v5085_v37 = vld [vmem:[%s7764_s7 + $0x70] sm:$0xff] }
0x2116   :  { %6234 = vrot.lane.b32.xlu0 %v7428_v2, %s6457_s23  ;;  %v4154_v2 = vpop.permute.xlu1 %4153 }
0x2189   :  { %v4059_v46 = vpop.xlane.xlu0 %4058 }
0x218a   :  { %6391 = vrcp.f32 %v4059_v46  ;;  %v5086_v46 = vld [vmem:[%s7764_s7 + $0x78] sm:$0xff] }
0x218d   :  { %v4056_v41 = vpop.xlane.xlu0 %4055 }
0x218e   :  { %6393 = vrcp.f32 %v4056_v41 }
0x2191   :  { %v6235_v57 = vpop.permute.xlu0 %6234 }
0x2192   :  { %v6237_v18 = vunpack.i.h.bf16 %v6235_v57  ;;  %v6236_v8 = vunpack.i.l.bf16 %v6235_v57  ;;  %v6039_v57 = vpack.c.bf16 %v5086_v46, %v5085_v37 }
0x2194   :  { %v6017_v48 = vpack.c.bf16 %v6237_v18, %v6236_v8  ;;  %v6392_v60 = vpop.eup %6391 }
0x2195   :  { %v4063_v61 = vmul.f32 %v6392_v60, %v6388_v47  ;;  %v5083_v47 = vld [vmem:[%s7764_s7 + $0x60] sm:$0xff] }
0x2196   :  { %6019 = vmatprep.subr.msk.bf16.mxu1 %vm6803_vm2, %v6017_v48 }
0x2198   :  { %v6394_v3 = vpop.eup %6393 }
0x2199   :  { %v4062_v17 = vmul.f32 %v6394_v3, %v6390_v42 }
0x219b   :  { %5636 = vmatprep.mubr.msk.f32.mxu1 %vm401_vm1, %v4062_v17 }
0x219c   :  { %5637 = vmatmul.mubr.msk.f32.vlgmr.msra.gmra.mrb[60].mxu1 %vm401_vm1, %v4063_v61 }
0x219d   :  { %6022 = vmatpush3.bf16.xpose.msk.msra.mxu1 %vm6803_vm2, %v6017_v48  ;;  %5643 = vmatprep.mubr.msk.f32.mxu1 %vm401_vm1, %v4152_v59 }
0x21a4   :  { %5644 = vmatmul.mubr.msk.f32.vlgmr.msra.gmra.mrb[62].mxu1 %vm401_vm1, %v4154_v2  ;;  %v5088_v2 = vld [vmem:[%s7765_s8 + $0x1] ss:$0 sm:$0xff] }
0x226f   :  { %v5638_v52 = vpop.f32.mrb[60].mxu1 }
0x2270   :  { %v4142_v62 = vpop.f32.mrb[61].mxu1 }
0x2277   :  { %v5645_v63 = vpop.f32.mrb[62].mxu1 }
0x2278   :  { %v4243_v4 = vmul.f32 0.25, %v5645_v63  ;;  %v4233_v1 = vpop.f32.mrb[63].mxu1 }
0x2279   :  { %v4242_v21 = vmul.f32 0.25, %v4233_v1 }
0x227a   :  { %v4247_v27 = vsel %vm401_vm1, %v4243_v4, -inf }
0x227b   :  { %4248 = vmax.xlane.f32.xlu0 %v4247_v27  ;;  %v4244_v20 = vsel %vm401_vm1, %v4242_v21, -inf }
0x227c   :  { %4245 = vmax.xlane.f32.xlu1 %v4244_v20 }
0x228d   :  { %6239 = vrot.lane.b32.xlu1 %v7366_v15, %s7785_s6 }
0x2291   :  { %3525 = vrot.lane.b32.xlu1 %v7408_v19, %s6457_s23 }
0x2295   :  { %3531 = vrot.lane.b32.xlu1 %v7414_v25, %s6456_s22 }
0x2299   :  { %3533 = vrot.lane.b32.xlu1 %v7412_v58, %s6456_s22 }
0x229d   :  { %3541 = vrot.lane.b32.xlu1 %v7446_v51, %s6455_s21 }
0x22a1   :  { %4357 = vrot.lane.b32.xlu1 %v7492_v13, %s6457_s23 }
0x22a5   :  { %4365 = vrot.lane.b32.xlu1 %v5638_v52, %s6456_s22 }
0x2308   :  { %v4249_v39 = vpop.xlane.xlu0 %4248 }
0x2309   :  { %v4251_v6 = vsub.f32 %v4243_v4, %v4249_v39  ;;  %v4246_v15 = vpop.xlane.xlu1 %4245 }
0x230a   :  { %v4250_v0 = vsub.f32 %v4242_v21, %v4246_v15 }
0x230b   :  { %v4254_v9 = vmul.f32 1.442695, %v4251_v6 }
0x230c   :  { %v4252_v19 = vmul.f32 1.442695, %v4250_v0 }
0x230d   :  { %v6240_v5 = vpop.permute.xlu1 %6239 }
0x230e   :  { %6395 = vpow2.f32 %v4252_v19  ;;  %v6242_v25 = vunpack.i.h.bf16 %v6240_v5  ;;  %v6241_v35 = vunpack.i.l.bf16 %v6240_v5 }
0x230f   :  { %6397 = vpow2.f32 %v4254_v9 }
0x2310   :  { %v6023_v58 = vpack.c.bf16 %v6242_v25, %v6241_v35 }
0x2311   :  { %v3526_v56 = vpop.permute.xlu1 %3525 }
0x2312   :  { %6024 = vmatprep.subr.bf16.mxu0 %v6023_v58  ;;  %v3546_v8 = vsel %vm401_vm1, %v7404_v22, %v3526_v56 }
0x2313   :  { %6026 = vmatpush3.bf16.msra.mxu0 %v6023_v58 }
0x2314   :  { %6028 = vmatprep.subr.bf16.mxu0 %v6027_v44 }
0x2315   :  { %v3532_v53 = vpop.permute.xlu1 %3531 }
0x2318   :  { %v6396_v51 = vpop.eup %6395 }
0x2319   :  { %v4256_v11 = vsel %vm401_vm1, %v6396_v51, 0.0  ;;  %v6398_v13 = vpop.eup %6397  ;;  %v3534_v41 = vpop.permute.xlu1 %3533 }
0x231a   :  { %4257 = vadd.xlane.f32.xlu0 %v4256_v11  ;;  %v4259_v14 = vsel %vm401_vm1, %v6398_v13, 0.0  ;;  %v3548_v48 = vsel %vm1224_vm3, %v3546_v8, %v3534_v41 }
0x231d   :  { %v3542_v18 = vpop.permute.xlu1 %3541 }
0x231e   :  { %4260 = vadd.xlane.f32.xlu0 %v4259_v14  ;;  %v3550_v60 = vsel %vm1227_vm4, %v3548_v48, %v3542_v18 }
0x2321   :  { %v4358_v21 = vpop.permute.xlu1 %4357 }
0x2325   :  { %v4366_v20 = vpop.permute.xlu1 %4365 }
0x2334   :  { %3523 = vrot.lane.b32.xlu0 %v7410_v24, %s6457_s23 }
0x2338   :  { %3539 = vrot.lane.b32.xlu0 %v7448_v55, %s6455_s21  ;;  %v5082_v55 = vld [vmem:[%s7764_s7 + $0x58] sm:$0xff] }
0x2339   :  { %v6031_v43 = vpack.c.bf16 %v5082_v55, %v5081_v7  ;;  %v5099_v7 = vld [vmem:[%s7768_s11 + $0x50] sm:$0xff] }
0x233c   :  { %4355 = vrot.lane.b32.xlu0 %v7494_v16, %s6457_s23 }
0x2340   :  { %4363 = vrot.lane.b32.xlu0 %v4142_v62, %s6456_s22 }
0x23a7   :  { %v4258_v30 = vpop.xlane.xlu0 %4257 }
0x23a8   :  { %6399 = vrcp.f32 %v4258_v30 }
0x23ab   :  { %v4261_v24 = vpop.xlane.xlu0 %4260 }
0x23ac   :  { %6401 = vrcp.f32 %v4261_v24 }
0x23af   :  { %v3524_v50 = vpop.permute.xlu0 %3523 }
0x23b0   :  { %v3545_v16 = vsel %vm401_vm1, %v7406_v54, %v3524_v50  ;;  %v6035_v54 = vpack.c.bf16 %v5084_v40, %v5083_v47 }
0x23b1   :  { %v3547_v45 = vsel %vm1224_vm3, %v3545_v16, %v3532_v53  ;;  %v5100_v16 = vld [vmem:[%s7768_s11 + $0x58] sm:$0xff]  ;;  %v5102_v53 = vld [vmem:[%s7768_s11 + $0x68] sm:$0xff] }
0x23b2   :  { %v6400_v38 = vpop.eup %6399 }
0x23b3   :  { %v4264_v32 = vmul.f32 %v6400_v38, %v6396_v51  ;;  %v3540_v29 = vpop.permute.xlu0 %3539 }
0x23b4   :  { %v3549_v42 = vsel %vm1227_vm4, %v3547_v45, %v3540_v29  ;;  %v5101_v29 = vld [vmem:[%s7768_s11 + $0x60] sm:$0xff]  ;;  %v5104_v45 = vld [vmem:[%s7768_s11 + $0x78] sm:$0xff] }
0x23b5   :  { %5650 = vmatprep.mubr.msk.f32.mxu0 %vm401_vm1, %v4264_v32 }
0x23b6   :  { %v6402_v49 = vpop.eup %6401 }
0x23b7   :  { %v4265_v23 = vmul.f32 %v6402_v49, %v6398_v13  ;;  %v4356_v27 = vpop.permute.xlu0 %4355  ;;  %v6047_v49 = vpack.c.bf16 %v5100_v16, %v5099_v7 }
0x23b8   :  { %v4377_v6 = vsel %vm401_vm1, %v7470_v31, %v4356_v27 }
0x23b9   :  { %5651 = vmatmul.mubr.msk.f32.vlgmr.msra.gmra.mrb[34].mxu0 %vm401_vm1, %v4265_v23  ;;  %v6051_v23 = vpack.c.bf16 %v5102_v53, %v5101_v29 }
0x23ba   :  { %6030 = vmatpush3.bf16.msra.mxu0 %v6027_v44  ;;  %5669 = vmatprep.mubr.msk.f32.mxu0 %vm93_vm0, %v3549_v42 }
0x23bb   :  { %6032 = vmatprep.subr.bf16.mxu0 %v6031_v43  ;;  %v4364_v39 = vpop.permute.xlu0 %4363 }
0x23bc   :  { %v4379_v15 = vsel %vm1224_vm3, %v4377_v6, %v4364_v39 }
0x23be   :  { %6034 = vmatpush3.bf16.msra.mxu0 %v6031_v43  ;;  %v5103_v43 = vld [vmem:[%s7768_s11 + $0x70] sm:$0xff] }
0x23bf   :  { %6036 = vmatprep.subr.bf16.mxu0 %v6035_v54  ;;  %v6055_v47 = vpack.c.bf16 %v5104_v45, %v5103_v43 }
0x23c2   :  { %6038 = vmatpush3.bf16.msra.mxu0 %v6035_v54 }
0x23c3   :  { %6040 = vmatprep.subr.bf16.mxu0 %v6039_v57 }
0x23c6   :  { %6042 = vmatpush3.bf16.msra.mxu0 %v6039_v57 }
0x23c9   :  { %5670 = vmatmul.mubr.msk.f32.vlgmr.msra.gmra.mrb[36].mxu0 %vm93_vm0, %v3550_v60 }
0x248c   :  { %v5652_v3 = vpop.f32.mrb[34].mxu0 }
0x248d   :  { %4373 = vrot.lane.b32.xlu1 %v5652_v3, %s6455_s21  ;;  %v4344_v17 = vpop.f32.mrb[35].mxu0 }
0x248e   :  { %4371 = vrot.lane.b32.xlu0 %v4344_v17, %s6455_s21 }
0x249c   :  { %v5671_v61 = vpop.f32.mrb[36].mxu0 }
0x249d   :  { %v4478_v59 = vpop.f32.mrb[37].mxu0  ;;  %v4484_v52 = vadd.f32 %v5671_v61, %v5088_v2 }
0x249e   :  { %v4479_v22 = vadd.f32 %v5088_v2, %v4478_v59 }
0x249f   :  { %v7585_v63 = vadd.f32 %v4484_v52, %v7209_v10  ;;  %v4378_v10 = vsel %vm401_vm1, %v7468_v12, %v4358_v21 }
0x24a0   :  { %v7582_v62 = vadd.f32 %v4479_v22, %v7212_v36  ;;  %v4380_v9 = vsel %vm1224_vm3, %v4378_v10, %v4366_v20  ;;  %v5096_v20 = vld [vmem:[%s7767_s10 + $0x1] ss:$0 sm:$0xff] }
0x24a1   :  { %v4508_v1 = vsel %vm93_vm0, %v7585_v63, 0.0  ;;  %v5111_v10 = vld [vmem:[%s7770_s13 + $0x80] sm:$0xff] }
0x24a2   :  { %v4505_v4 = vsel %vm93_vm0, %v7582_v62, 0.0 }
0x24ad   :  { %4506 = vadd.xlane.f32.xlu0 %v4505_v4  ;;  %v7654_v4 = vld [vmem:[%s7766_s9 + $0x1] ss:$0 sm:$0xff] }
0x24b1   :  { %4509 = vadd.xlane.f32.xlu1 %v4508_v1 }
0x24ff   :  { %v4374_v36 = vpop.permute.xlu1 %4373 }
0x2500   :  { %v4372_v0 = vpop.permute.xlu0 %4371  ;;  %v4382_v5 = vsel %vm1227_vm4, %v4380_v9, %v4374_v36  ;;  %v5113_v9 = vld [vmem:[%s7770_s13 + $0x90] sm:$0xff] }
0x2501   :  { %v4381_v19 = vsel %vm1227_vm4, %v4379_v15, %v4372_v0  ;;  %v5112_v15 = vld [vmem:[%s7770_s13 + $0x88] sm:$0xff] }
0x2502   :  { %5672 = vmatprep.mubr.msk.f32.mxu0 %vm93_vm0, %v4381_v19  ;;  %v6059_v0 = vpack.c.bf16 %v5112_v15, %v5111_v10  ;;  %v5114_v19 = vld [vmem:[%s7770_s13 + $0x98] sm:$0xff] }
0x2503   :  { %5673 = vmatmul.mubr.msk.f32.gmra.mrb[38].mxu0 %vm93_vm0, %v4382_v5  ;;  %v6063_v5 = vpack.c.bf16 %v5114_v19, %v5113_v9 }
0x2504   :  { %6060 = vmatprep.subr.bf16.mxu0 %v6059_v0 }
0x2505   :  { %6062 = vmatpush3.bf16.msra.mxu0 %v6059_v0 }
0x2506   :  { %6064 = vmatprep.subr.bf16.mxu0 %v6063_v5 }
0x2509   :  { %6066 = vmatpush3.bf16.msra.mxu0 %v6063_v5 }
0x253a   :  { %v4507_v51 = vpop.xlane.xlu0 %4506 }
0x253b   :  { %v4517_v14 = vmul.f32 0.015625, %v4507_v51 }
0x253d   :  { %v4521_v30 = vsub.f32 %v7582_v62, %v4517_v14 }
0x253e   :  { %v4510_v25 = vpop.xlane.xlu1 %4509 }
0x253f   :  { %v4518_v35 = vmul.f32 0.015625, %v4510_v25  ;;  %v4525_v38 = vmul.f32 %v4521_v30, %v4521_v30  ;;  %v5115_v25 = vld [vmem:[%s7770_s13 + $0xa0] sm:$0xff] }
0x2541   :  { %v4522_v31 = vsub.f32 %v7585_v63, %v4518_v35  ;;  %v4529_v32 = vsel %vm93_vm0, %v4525_v38, 0.0  ;;  %v5116_v35 = vld [vmem:[%s7770_s13 + $0xa8] sm:$0xff] }
0x2543   :  { %v4526_v58 = vmul.f32 %v4522_v31, %v4522_v31 }
0x2545   :  { %v4532_v12 = vsel %vm93_vm0, %v4526_v58, 0.0  ;;  %v5117_v58 = vld [vmem:[%s7770_s13 + $0xb0] sm:$0xff] }
0x2546   :  { %4533 = vadd.xlane.f32.xlu1 %v4532_v12  ;;  %v5118_v12 = vld [vmem:[%s7770_s13 + $0xb8] sm:$0xff] }
0x2547   :  { %v6071_v51 = vpack.c.bf16 %v5118_v12, %v5117_v58 }
0x25d3   :  { %v4534_v40 = vpop.xlane.xlu1 %4533 }
0x25d4   :  { %v4542_v42 = vmul.f32 0.015625, %v4534_v40 }
0x25d6   :  { %v5674_v11 = vpop.f32.mrb[38].mxu0  ;;  %v4546_v41 = vadd.f32 1e-06, %v4542_v42 }
0x25d7   :  { %v4488_v13 = vpop.f32.mrb[39].mxu0  ;;  %v4494_v26 = vadd.f32 %v5674_v11, %v5088_v2  ;;  %v5119_v11 = vld [vmem:[%s7770_s13 + $0xc0] sm:$0xff] }
0x25d8   :  { %v4489_v28 = vadd.f32 %v5088_v2, %v4488_v13  ;;  %6403 = vrsqrt.f32 %v4546_v41  ;;  %v5120_v13 = vld [vmem:[%s7770_s13 + $0xc8] sm:$0xff]  ;;  %v5106_v41 = vld [vmem:[%s7769_s12 + $0x1] ss:$0 sm:$0xff] }
0x25d9   :  { %v7608_v24 = vadd.f32 %v4494_v26, %v7273_v33  ;;  %v5098_v33 = vld [vmem:[%s7768_s11 + $0x48] sm:$0xff]  ;;  %v6075_v14 = vpack.c.bf16 %v5120_v13, %v5119_v11  ;;  %v5121_v26 = vld [vmem:[%s7770_s13 + $0xd0] sm:$0xff] }
0x25da   :  { %v7604_v44 = vadd.f32 %v4489_v28, %v7276_v34  ;;  %v5097_v34 = vld [vmem:[%s7768_s11 + $0x40] sm:$0xff]  ;;  %v5122_v28 = vld [vmem:[%s7770_s13 + $0xd8] sm:$0xff] }
0x25db   :  { %v4514_v56 = vsel %vm93_vm0, %v7608_v24, 0.0  ;;  %v6043_v55 = vpack.c.bf16 %v5098_v33, %v5097_v34  ;;  %v5126_v34 = vld [vmem:[%s7770_s13 + $0xf8] sm:$0xff] }
0x25dc   :  { %v4511_v50 = vsel %vm93_vm0, %v7604_v44, 0.0 }
0x25dd   :  { %4512 = vadd.xlane.f32.xlu0 %v4511_v50  ;;  %6044 = vmatprep.subr.bf16.mxu1 %v6043_v55  ;;  %v5123_v50 = vld [vmem:[%s7770_s13 + $0xe0] sm:$0xff] }
0x25de   :  { %6046 = vmatpush3.bf16.msra.mxu1 %v6043_v55 }
0x25df   :  { %6048 = vmatprep.subr.bf16.mxu1 %v6047_v49 }
0x25e1   :  { %4515 = vadd.xlane.f32.xlu0 %v4514_v56  ;;  %v5124_v56 = vld [vmem:[%s7770_s13 + $0xe8] sm:$0xff] }
0x25e2   :  { %6050 = vmatpush3.bf16.msra.mxu1 %v6047_v49  ;;  %v6404_v22 = vpop.eup %6403  ;;  %v6083_v38 = vpack.c.bf16 %v5124_v56, %v5123_v50 }
0x25e3   :  { %6052 = vmatprep.subr.bf16.mxu1 %v6051_v23  ;;  %v4554_v52 = vmul.f32 %v6404_v22, %v4522_v31  ;;  %v6067_v31 = vpack.c.bf16 %v5116_v35, %v5115_v25 }
0x25e5   :  { %4530 = vadd.xlane.f32.xlu0 %v4529_v32  ;;  %v4564_v27 = vmul.f32 %v7654_v4, %v4554_v52  ;;  %6068 = vmatprep.subr.bf16.mxu0 %v6067_v31  ;;  %v5125_v32 = vld [vmem:[%s7770_s13 + $0xf0] sm:$0xff] }
0x25e6   :  { %6054 = vmatpush3.bf16.msra.mxu1 %v6051_v23  ;;  %6070 = vmatpush3.bf16.msra.mxu0 %v6067_v31  ;;  %v6087_v33 = vpack.c.bf16 %v5126_v34, %v5125_v32 }
0x25e7   :  { %6056 = vmatprep.subr.bf16.mxu1 %v6055_v47  ;;  %v4574_v36 = vadd.f32 %v5096_v20, %v4564_v27  ;;  %6072 = vmatprep.subr.bf16.mxu0 %v6071_v51 }
0x25ea   :  { %6058 = vmatpush3.bf16.msra.mxu1 %v6055_v47  ;;  %6074 = vmatpush3.bf16.msra.mxu0 %v6071_v51 }
0x25eb   :  { %6076 = vmatprep.subr.bf16.mxu0 %v6075_v14 }
0x25ee   :  { %6078 = vmatpush3.bf16.msra.mxu0 %v6075_v14 }
0x266a   :  { %v4513_v54 = vpop.xlane.xlu0 %4512 }
0x266b   :  { %v4519_v37 = vmul.f32 0.015625, %v4513_v54 }
0x266d   :  { %v7640_v46 = vsub.f32 %v7604_v44, %v4519_v37 }
0x266e   :  { %v4516_v57 = vpop.xlane.xlu0 %4515 }
0x266f   :  { %v4520_v18 = vmul.f32 0.015625, %v4516_v57  ;;  %v4527_v8 = vmul.f32 %v7640_v46, %v7640_v46 }
0x2671   :  { %v7645_v48 = vsub.f32 %v7608_v24, %v4520_v18  ;;  %v4535_v60 = vsel %vm93_vm0, %v4527_v8, 0.0 }
0x2672   :  { %4536 = vadd.xlane.f32.xlu0 %v4535_v60  ;;  %v4531_v3 = vpop.xlane.xlu0 %4530 }
0x2673   :  { %v4541_v17 = vmul.f32 0.015625, %v4531_v3  ;;  %v4528_v61 = vmul.f32 %v7645_v48, %v7645_v48 }
0x2675   :  { %v4545_v59 = vadd.f32 1e-06, %v4541_v17  ;;  %v4538_v2 = vsel %vm93_vm0, %v4528_v61, 0.0 }
0x2676   :  { %4539 = vadd.xlane.f32.xlu1 %v4538_v2 }
0x2677   :  { %6405 = vrsqrt.f32 %v4545_v59 }
0x2681   :  { %v6406_v1 = vpop.eup %6405 }
0x2682   :  { %v4553_v21 = vmul.f32 %v6406_v1, %v4521_v30  ;;  %v6079_v30 = vpack.c.bf16 %v5122_v28, %v5121_v26 }
0x2684   :  { %v4563_v39 = vmul.f32 %v7654_v4, %v4553_v21  ;;  %6080 = vmatprep.subr.bf16.mxu0 %v6079_v30 }
0x2685   :  { %6082 = vmatpush3.bf16.msra.mxu0 %v6079_v30 }
0x2686   :  { %v4573_v6 = vadd.f32 %v5096_v20, %v4563_v39  ;;  %6084 = vmatprep.subr.bf16.mxu0 %v6083_v38 }
0x2688   :  { %5691 = vmatprep.mubr.msk.f32.mxu1 %vm93_vm0, %v4573_v6 }
0x2689   :  { %5692 = vmatmul.mubr.msk.f32.vlgmr.msra.gmra.mrb[64].mxu1 %vm93_vm0, %v4574_v36  ;;  %6086 = vmatpush3.bf16.msra.mxu0 %v6083_v38 }
0x268a   :  { %6088 = vmatprep.subr.bf16.mxu0 %v6087_v33 }
0x268d   :  { %6090 = vmatpush3.bf16.msra.mxu0 %v6087_v33  ;;  %v5128_v33 = vld [vmem:[%s7771_s14 + $0x1] ss:$0 sm:$0xff] }
0x26ff   :  { %v4537_v7 = vpop.xlane.xlu0 %4536 }
0x2700   :  { %v4543_v55 = vmul.f32 0.015625, %v4537_v7 }
0x2702   :  { %v4547_v16 = vadd.f32 1e-06, %v4543_v55 }
0x2703   :  { %v4540_v49 = vpop.xlane.xlu1 %4539 }
0x2704   :  { %6407 = vrsqrt.f32 %v4547_v16  ;;  %v4544_v29 = vmul.f32 0.015625, %v4540_v49 }
0x2706   :  { %v4548_v53 = vadd.f32 1e-06, %v4544_v29 }
0x2708   :  { %6409 = vrsqrt.f32 %v4548_v53 }
0x270e   :  { %v6408_v23 = vpop.eup %6407 }
0x270f   :  { %v4555_v43 = vmul.f32 %v6408_v23, %v7640_v46 }
0x2711   :  { %v4565_v45 = vmul.f32 %v7654_v4, %v4555_v43 }
0x2712   :  { %v6410_v47 = vpop.eup %6409 }
0x2713   :  { %v4575_v40 = vadd.f32 %v5096_v20, %v4565_v45  ;;  %v4556_v42 = vmul.f32 %v6410_v47, %v7645_v48 }
0x2715   :  { %5694 = vmatprep.mubr.msk.f32.mxu1 %vm93_vm0, %v4575_v40  ;;  %v4566_v54 = vmul.f32 %v7654_v4, %v4556_v42 }
0x2717   :  { %v4576_v37 = vadd.f32 %v5096_v20, %v4566_v54 }
0x2719   :  { %5695 = vmatmul.mubr.msk.f32.gmra.mrb[66].mxu1 %vm93_vm0, %v4576_v37 }
0x275c   :  { %v5693_v57 = vpop.f32.mrb[64].mxu1 }
0x275d   :  { %v4678_v18 = vadd.f32 %v5693_v57, %v5106_v41  ;;  %v4672_v46 = vpop.f32.mrb[65].mxu1 }
0x275e   :  { %v4673_v8 = vadd.f32 %v5106_v41, %v4672_v46 }
0x275f   :  { %v4696_v60 = vmul.f32 0.044715, %v4678_v18  ;;  %v4692_v6 = vmul.f32 0.5, %v4678_v18 }
0x2760   :  { %v4695_v3 = vmul.f32 0.044715, %v4673_v8  ;;  %v4691_v20 = vmul.f32 0.5, %v4673_v8 }
0x2761   :  { %v4700_v17 = vmul.f32 %v4696_v60, %v4678_v18 }
0x2762   :  { %v4699_v61 = vmul.f32 %v4695_v3, %v4673_v8 }
0x2763   :  { %v4704_v48 = vmul.f32 %v4700_v17, %v4678_v18 }
0x2764   :  { %v4703_v59 = vmul.f32 %v4699_v61, %v4673_v8 }
0x2765   :  { %v4708_v2 = vadd.f32 %v4704_v48, %v4678_v18 }
0x2766   :  { %v4707_v22 = vadd.f32 %v4703_v59, %v4673_v8 }
0x2767   :  { %v4712_v52 = vmul.f32 0.7978846, %v4708_v2 }
0x2768   :  { %v4711_v4 = vmul.f32 0.7978846, %v4707_v22 }
0x2769   :  { %6411 = vtanh.f32 %v4712_v52 }
0x276a   :  { %6413 = vtanh.f32 %v4711_v4 }
0x2773   :  { %v6412_v1 = vpop.eup %6411 }
0x2774   :  { %v6414_v21 = vpop.eup %6413  ;;  %v4720_v27 = vadd.f32 1.0, %v6412_v1 }
0x2775   :  { %v4719_v39 = vadd.f32 1.0, %v6414_v21 }
0x2776   :  { %v4724_v10 = vmul.f32 %v4720_v27, %v4692_v6 }
0x2777   :  { %v4723_v36 = vmul.f32 %v4719_v39, %v4691_v20 }
0x2779   :  { %5729 = vmatprep.mubr.f32.mxu0 %v4723_v36 }
0x277a   :  { %5730 = vmatmul.mubr.f32.vlgmr.msra.gmra.mrb[40].mxu0 %v4724_v10 }
0x27ec   :  { %v5696_v15 = vpop.f32.mrb[66].mxu1 }
0x27ed   :  { %v4688_v0 = vadd.f32 %v5696_v15, %v5106_v41  ;;  %v4682_v9 = vpop.f32.mrb[67].mxu1 }
0x27ee   :  { %v4683_v19 = vadd.f32 %v5106_v41, %v4682_v9  ;;  %v5129_v9 = vld [vmem:[%s7772_s15] ss:$0 sm:$0xff]  ;;  %s6460_s15 = smov [#allocation2]  }
0x27ef   :  { %v4698_v5 = vmul.f32 0.044715, %v4688_v0  ;;  %v4694_v38 = vmul.f32 0.5, %v4688_v0 }
0x27f0   :  { %v4697_v25 = vmul.f32 0.044715, %v4683_v19  ;;  %v4693_v50 = vmul.f32 0.5, %v4683_v19 }
0x27f1   :  { %v4702_v35 = vmul.f32 %v4698_v5, %v4688_v0 }
0x27f2   :  { %v4701_v31 = vmul.f32 %v4697_v25, %v4683_v19  ;;  %v5130_v25 = vld [vmem:[%s7773_s16] ss:$0 sm:$0xff]  ;;  %s4924_s16 = sshll.u32 %s6460_s15, 4  ;;  %s4925_s16 = int_to_ptr.vmem [resolvable:$true] %s4924_s16 }
0x27f3   :  { %v4706_v58 = vmul.f32 %v4702_v35, %v4688_v0  ;;  %s6427_s28 = scalar_lea.vmem %s4925_s16, 512  ;;  %p6432_p1 = scmp.lt.s32.totalorder %s4925_s16, %s4925_s16 }
0x27f4   :  { %v4705_v12 = vmul.f32 %v4701_v31, %v4683_v19  ;;  %p6428_p0 = scmp.ne.s32.totalorder %s4925_s16, %s6427_s28  ;;  %p6433_p2 = scmp.lt.s32.totalorder %s6427_s28, %s6427_s28 }
0x27f5   :  { %v4710_v51 = vadd.f32 %v4706_v58, %v4688_v0 }
0x27f6   :  { %v4709_v11 = vadd.f32 %v4705_v12, %v4683_v19  ;;  %p6434_p3 = por %p6433_p2, %p6432_p1 }
0x27f7   :  { %v4714_v13 = vmul.f32 0.7978846, %v4710_v51 }
0x27f8   :  { %v4713_v14 = vmul.f32 0.7978846, %v4709_v11  ;;  %p6435_p4 = pnand %p6434_p3, %p6428_p0 }
0x27f9   :  { %6415 = vtanh.f32 %v4714_v13 }
0x27fa   :  { %6417 = vtanh.f32 %v4713_v14 }
0x2803   :  { %v6416_v26 = vpop.eup %6415 }
0x2804   :  { %v6418_v28 = vpop.eup %6417  ;;  %v4722_v30 = vadd.f32 1.0, %v6416_v26 }
0x2805   :  { %v4721_v56 = vadd.f32 1.0, %v6418_v28 }
0x2806   :  { %v4726_v34 = vmul.f32 %v4722_v30, %v4694_v38 }
0x2807   :  { %v4725_v32 = vmul.f32 %v4721_v56, %v4693_v50 }
0x2809   :  { %5732 = vmatprep.mubr.f32.mxu0 %v4725_v32 }
0x280a   :  { %5733 = vmatmul.mubr.f32.gmra.mrb[42].mxu0 %v4726_v34 }
0x284d   :  { %v5731_v7 = vpop.f32.mrb[40].mxu0 }
0x284e   :  { %v4824_v55 = vadd.f32 %v5731_v7, %v5128_v33  ;;  %v4818_v16 = vpop.f32.mrb[41].mxu0 }
0x284f   :  { %v4819_v49 = vadd.f32 %v5128_v33, %v4818_v16 }
0x2850   :  { %v4838_v29 = vadd.f32 %v4824_v55, %v7585_v63 }
0x2851   :  { %v4837_v53 = vadd.f32 %v4819_v49, %v7582_v62 }
0x2852   :  { %v4846_v23 = vsel %vm93_vm0, %v4838_v29, 0.0 }
0x2853   :  { %4847 = vadd.xlane.f32.xlu1 %v4846_v23  ;;  %v4843_v43 = vsel %vm93_vm0, %v4837_v53, 0.0 }
0x2854   :  { %4844 = vadd.xlane.f32.xlu0 %v4843_v43 }
0x28dd   :  { %v5734_v45 = vpop.f32.mrb[42].mxu0 }
0x28de   :  { %v4834_v47 = vadd.f32 %v5734_v45, %v5128_v33  ;;  %v4828_v40 = vpop.f32.mrb[43].mxu0 }
0x28df   :  { %v4829_v42 = vadd.f32 %v5128_v33, %v4828_v40 }
0x28e0   :  { %v4840_v54 = vadd.f32 %v4834_v47, %v7608_v24  ;;  %v4848_v37 = vpop.xlane.xlu1 %4847 }
0x28e1   :  { %v4839_v41 = vadd.f32 %v4829_v42, %v7604_v44  ;;  %v4856_v57 = vmul.f32 0.015625, %v4848_v37  ;;  %v4845_v18 = vpop.xlane.xlu0 %4844 }
0x28e2   :  { %v4855_v63 = vmul.f32 0.015625, %v4845_v18  ;;  %v4852_v62 = vsel %vm93_vm0, %v4840_v54, 0.0 }
0x28e3   :  { %v4860_v46 = vsub.f32 %v4838_v29, %v4856_v57  ;;  %4853 = vadd.xlane.f32.xlu1 %v4852_v62  ;;  %v4849_v8 = vsel %vm93_vm0, %v4839_v41, 0.0 }
0x28e4   :  { %v4859_v60 = vsub.f32 %v4837_v53, %v4855_v63  ;;  %4850 = vadd.xlane.f32.xlu0 %v4849_v8 }
0x28e5   :  { %v4864_v3 = vmul.f32 %v4860_v46, %v4860_v46 }
0x28e6   :  { %v4863_v17 = vmul.f32 %v4859_v60, %v4859_v60 }
0x28e7   :  { %v4870_v61 = vsel %vm93_vm0, %v4864_v3, 0.0 }
0x28e8   :  { %4871 = vadd.xlane.f32.xlu1 %v4870_v61  ;;  %v4867_v24 = vsel %vm93_vm0, %v4863_v17, 0.0 }
0x28e9   :  { %4868 = vadd.xlane.f32.xlu0 %v4867_v24 }
0x2970   :  { %v4854_v44 = vpop.xlane.xlu1 %4853 }
0x2971   :  { %v4858_v48 = vmul.f32 0.015625, %v4854_v44  ;;  %v4851_v59 = vpop.xlane.xlu0 %4850 }
0x2972   :  { %v4857_v2 = vmul.f32 0.015625, %v4851_v59 }
0x2973   :  { %v4862_v22 = vsub.f32 %v4840_v54, %v4858_v48 }
0x2974   :  { %v4861_v52 = vsub.f32 %v4839_v41, %v4857_v2 }
0x2975   :  { %v4872_v4 = vpop.xlane.xlu1 %4871  ;;  %v4866_v1 = vmul.f32 %v4862_v22, %v4862_v22 }
0x2976   :  { %v4880_v21 = vmul.f32 0.015625, %v4872_v4  ;;  %v4869_v27 = vpop.xlane.xlu0 %4868  ;;  %v4865_v20 = vmul.f32 %v4861_v52, %v4861_v52 }
0x2977   :  { %v4879_v39 = vmul.f32 0.015625, %v4869_v27  ;;  %v4876_v6 = vsel %vm93_vm0, %v4866_v1, 0.0 }
0x2978   :  { %v4884_v36 = vadd.f32 1e-06, %v4880_v21  ;;  %4877 = vadd.xlane.f32.xlu1 %v4876_v6  ;;  %v4873_v10 = vsel %vm93_vm0, %v4865_v20, 0.0 }
0x2979   :  { %v4883_v15 = vadd.f32 1e-06, %v4879_v39  ;;  %4874 = vadd.xlane.f32.xlu0 %v4873_v10 }
0x297a   :  { %6419 = vrsqrt.f32 %v4884_v36 }
0x297b   :  { %6421 = vrsqrt.f32 %v4883_v15 }
0x2984   :  { %v6420_v0 = vpop.eup %6419 }
0x2985   :  { %v6422_v19 = vpop.eup %6421  ;;  %v4892_v5 = vmul.f32 %v6420_v0, %v4860_v46 }
0x2986   :  { %v4891_v35 = vmul.f32 %v6422_v19, %v4859_v60 }
0x2987   :  { %v4902_v31 = vmul.f32 %v5129_v9, %v4892_v5 }
0x2988   :  { %v4901_v58 = vmul.f32 %v5129_v9, %v4891_v35 }
0x2989   :  { %v4912_v12 = vadd.f32 %v5130_v25, %v4902_v31 }
0x298a   :  { %v4911_v51 = vadd.f32 %v5130_v25, %v4901_v58 }
0x298b   :  { %4916 = vst.msk [vmem:[#allocation2 + $0x8] sm:$0xff] %vm93_vm0, %v4912_v12 }
0x298c   :  { %4915 = vst.msk [vmem:[#allocation2] sm:$0xff] %vm93_vm0, %v4911_v51 }
0x2a05   :  { %v4878_v11 = vpop.xlane.xlu1 %4877 }
0x2a06   :  { %v4882_v13 = vmul.f32 0.015625, %v4878_v11  ;;  %v4875_v14 = vpop.xlane.xlu0 %4874 }
0x2a07   :  { %v4881_v26 = vmul.f32 0.015625, %v4875_v14 }
0x2a08   :  { %v4886_v28 = vadd.f32 1e-06, %v4882_v13 }
0x2a09   :  { %v4885_v30 = vadd.f32 1e-06, %v4881_v26 }
0x2a0a   :  { %6423 = vrsqrt.f32 %v4886_v28 }
0x2a0b   :  { %6425 = vrsqrt.f32 %v4885_v30 }
0x2a14   :  { %v6424_v50 = vpop.eup %6423 }
0x2a15   :  { %v6426_v56 = vpop.eup %6425  ;;  %v4894_v38 = vmul.f32 %v6424_v50, %v4862_v22 }
0x2a16   :  { %v4893_v32 = vmul.f32 %v6426_v56, %v4861_v52 }
0x2a17   :  { %v4904_v34 = vmul.f32 %v5129_v9, %v4894_v38 }
0x2a18   :  { %v4903_v33 = vmul.f32 %v5129_v9, %v4893_v32 }
0x2a19   :  { %v4914_v7 = vadd.f32 %v5130_v25, %v4904_v34 }
0x2a1a   :  { %v4913_v55 = vadd.f32 %v5130_v25, %v4903_v33 }
0x2a1b   :  { %4918 = vst.msk [vmem:[#allocation2 + $0x18] sm:$0xff] %vm93_vm0, %v4914_v7 }
0x2a1c   :  { %4917 = vst.msk [vmem:[#allocation2 + $0x10] sm:$0xff] %vm93_vm0, %v4913_v55 }
0x2a1d   :  { %6438 = shalt.err (!%p6435_p4)
}
0x2a1e   :  { %s6439_s18 = scalar_lea.hbm %s7774_s17, 512 }
0x2a1f   :  { %p6440_p5 = scmp.ne.s32.totalorder %s7774_s17, %s6439_s18  ;;  %p6443_p6 = scmp.lt.u32.totalorder %s6439_s18, %s7774_s17 }
0x2a21   :  { %p6445_p7 = pnand %p6443_p6, %p6440_p5 }
0x2a23   :  { %6448 = shalt.err (!%p6445_p7)
}
0x2a24   :  { %s6461_s25 = smov 128   ;;  %s6462_s11 = smov 8  }
0x2a25   :  { %4930 = dma.vmem_to_hbm [thread:$0]  %s4925_s16, 512, %s7774_s17, [#allocation3], %s6461_s25, %s6461_s25, %s6462_s11  }
0x2a26   :  { %6449 = dma.done.wait [#allocation3], 512  }
0x2a27   :  { %6450 = vsyncadd [#allocation3], 4294966784 }
0x2a28   :  { %4934 = vsyncpa [#allocation3], 1 }

</bundles_post_ra>
